<compile_context>
chip_gen: v7x
topology: tpu7x:2x2x1
jax: 0.10.0
libtpu: 0.0.40
codegen_flags: <defaults>
</compile_context>

<pallas_src>
import functools

import jax
import jax.numpy as jnp
from jax.experimental import pallas as pl
from jax.experimental.pallas import tpu as pltpu


# ------------------------------ Pallas kernel ------------------------------

def _residual_block_kernel(xp_ref, mask_ref, w1_ref, b1_ref, g1_ref, be1_ref,
                           w2_ref, b2_ref, g2_ref, be2_ref,
                           o_ref, h1s_ref, acc_ref,
                           *, wp, mp, pad, n_valid, eps):
    """Fully fused ResidualBlock on a flattened zero-padded NHWC layout.

    xp_ref  : (mp + 2*pad, C)  zero-padded x rows live at [pad, pad+mp)
    mask_ref: (mp, 1)          1.0 at real pixels, 0.0 at spatial padding rows
    w*_ref  : (9, C, C)        conv taps, index t = ky*3 + kx, each (Cin, Cout)
    b*/g*/be*: (1, C)          conv bias / BN gamma / BN beta
    o_ref   : (mp, C)          x + block(x) (padding rows are garbage, sliced off outside)
    h1s_ref : (mp + 2*pad, C)  VMEM staging for the padded intermediate activation
    acc_ref : (mp, C)          f32 matmul accumulator
    """
    shifts = [(ky - 1) * wp + (kx - 1) for ky in range(3) for kx in range(3)]
    mask = mask_ref[...]                       # (mp, 1)
    inv_m = 1.0 / n_valid

    def conv3x3(src_ref, w_ref, bias_ref):
        # 9 shifted matmuls on the MXU, accumulated in VMEM.  Tap 0 initialises
        # the accumulator with the conv bias folded in.
        acc_ref[...] = jnp.dot(src_ref[pl.ds(pad + shifts[0], mp), :], w_ref[0],
                               preferred_element_type=jnp.float32) + bias_ref[...]
        for t in range(1, 9):                  # statically unrolled
            acc_ref[...] += jnp.dot(src_ref[pl.ds(pad + shifts[t], mp), :], w_ref[t],
                                    preferred_element_type=jnp.float32)
        return acc_ref[...]

    def batchnorm(a, gamma_ref, beta_ref):
        # Training-mode batch stats over the n_valid real pixels only
        # (padding rows are masked out, biased variance like torch).
        mean = jnp.sum(a * mask, axis=0, keepdims=True) * inv_m
        cen = (a - mean) * mask
        var = jnp.sum(cen * cen, axis=0, keepdims=True) * inv_m
        scale = jax.lax.rsqrt(var + eps) * gamma_ref[...]        # (1, C)
        return (a - mean) * scale + beta_ref[...]

    # conv1 -> BN1 -> ReLU; stage with a proper zero halo for conv2.
    h1 = jnp.maximum(batchnorm(conv3x3(xp_ref, w1_ref, b1_ref), g1_ref, be1_ref), 0.0)
    zero_margin = jnp.zeros((pad, h1s_ref.shape[1]), jnp.float32)
    h1s_ref[pl.ds(0, pad), :] = zero_margin                 # top margin
    h1s_ref[pl.ds(pad + mp, pad), :] = zero_margin          # bottom margin
    h1s_ref[pl.ds(pad, mp), :] = h1 * mask                  # body (padding rows zeroed)

    # conv2 -> BN2 -> residual add (x rows read back from the padded input).
    y = batchnorm(conv3x3(h1s_ref, w2_ref, b2_ref), g2_ref, be2_ref)
    o_ref[...] = xp_ref[pl.ds(pad, mp), :] + y


# ------------------------------ wrapper ------------------------------

def residual_block(x_nchw, params, *, eps=1e-5):
    """Forward pass of ResidualBlock(in_channels=C, out_channels=C) via one Pallas call."""
    N, C, H, W = x_nchw.shape
    assert params['w1'].shape == (C, C, 3, 3) and params['w2'].shape == (C, C, 3, 3)
    Hp, Wp = H + 2, W + 2
    Mp = N * Hp * Wp                                   # rows incl. spatial zero padding
    PAD = max(8, -(-(Wp + 1) // 8) * 8)                # row margin (>= Wp+1, multiple of 8)

    # NHWC, zero-pad spatially, flatten to lane-dense (Mp, C) rows; add row margin
    # so every shifted tap read stays in-bounds.
    x = jnp.transpose(x_nchw, (0, 2, 3, 1)).astype(jnp.float32)
    xpad = jnp.pad(x, ((0, 0), (1, 1), (1, 1), (0, 0))).reshape(Mp, C)
    xp = jnp.pad(xpad, ((PAD, PAD), (0, 0)))

    # 1.0 at real-pixel rows, 0.0 at spatial padding rows.
    ii = jnp.arange(Hp)[:, None]
    jj = jnp.arange(Wp)[None, :]
    m2d = ((ii >= 1) & (ii <= H) & (jj >= 1) & (jj <= W)).astype(jnp.float32)
    mask = jnp.tile(m2d.reshape(1, Hp * Wp), (N, 1)).reshape(Mp, 1)

    # PyTorch Conv2d weights (Cout, Cin, 3, 3) -> 9 taps of (Cin, Cout), t = ky*3+kx.
    def taps(w):
        return jnp.transpose(w, (2, 3, 1, 0)).reshape(9, C, C)

    row = lambda v: v.reshape(1, C)
    kern = functools.partial(_residual_block_kernel, wp=Wp, mp=Mp, pad=PAD,
                             n_valid=float(N * H * W), eps=eps)
    vmem = pl.BlockSpec(memory_space=pltpu.MemorySpace.VMEM)

    out = pl.pallas_call(
        kern,
        out_shape=jax.ShapeDtypeStruct((Mp, C), jnp.float32),
        in_specs=[vmem] * 10,
        out_specs=vmem,
        scratch_shapes=[pltpu.VMEM((Mp + 2 * PAD, C), jnp.float32),   # staged padded h1
                        pltpu.VMEM((Mp, C), jnp.float32)],            # matmul accumulator
    )(xp, mask,
      taps(params['w1']), row(params['b1']), row(params['g1']), row(params['be1']),
      taps(params['w2']), row(params['b2']), row(params['g2']), row(params['be2']))

    out = out.reshape(N, Hp, Wp, C)[:, 1:1 + H, 1:1 + W, :]            # drop padding rows
    return jnp.transpose(out, (0, 3, 1, 2))                           # back to NCHW


# ------------------------------ pure-JAX reference ------------------------------

def residual_block_ref(x, p, *, eps=1e-5):
    dn = ('NCHW', 'OIHW', 'NCHW')
    hi = jax.lax.Precision.HIGHEST

    def bn(h, g, b):
        mean = jnp.mean(h, axis=(0, 2, 3), keepdims=True)
        var = jnp.mean(jnp.square(h - mean), axis=(0, 2, 3), keepdims=True)
        return (h - mean) * jax.lax.rsqrt(var + eps) * g[None, :, None, None] \
               + b[None, :, None, None]

    h = jax.lax.conv_general_dilated(x, p['w1'], (1, 1), 'SAME',
                                     dimension_numbers=dn, precision=hi)
    h = jnp.maximum(bn(h + p['b1'][None, :, None, None], p['g1'], p['be1']), 0.0)
    h = jax.lax.conv_general_dilated(h, p['w2'], (1, 1), 'SAME',
                                     dimension_numbers=dn, precision=hi)
    h = bn(h + p['b2'][None, :, None, None], p['g2'], p['be2'])
    return x + h


# ------------------------------ demo ------------------------------

if __name__ == "__main__":
    key = jax.random.PRNGKey(0)
    k1, k2, k3, k4, k5, k6, k7 = jax.random.split(key, 7)

    # ResidualBlock requires in_channels == out_channels for the skip; use the
    # 128-channel / downsampled-spatial shape the diffusion model feeds it.
    N, C, H, W = 2, 128, 8, 8
    x = jax.random.normal(k1, (N, C, H, W), jnp.float32)
    params = {
        'w1': 0.05 * jax.random.normal(k2, (C, C, 3, 3), jnp.float32),
        'b1': 0.02 * jax.random.normal(k3, (C,), jnp.float32),
        'g1': jnp.ones((C,), jnp.float32),
        'be1': jnp.zeros((C,), jnp.float32),
        'w2': 0.05 * jax.random.normal(k4, (C, C, 3, 3), jnp.float32),
        'b2': 0.02 * jax.random.normal(k5, (C,), jnp.float32),
        'g2': jnp.ones((C,), jnp.float32) + 0.1 * jax.random.normal(k6, (C,), jnp.float32),
        'be2': 0.1 * jax.random.normal(k7, (C,), jnp.float32),
    }
    # TODO(synk): torch BatchNorm2d also updates running_mean/var buffers in
    # train(); only the forward output (batch statistics) is reproduced here.

    out = jax.block_until_ready(residual_block(x, params))
    assert out.shape == (N, C, H, W) and out.dtype == jnp.float32

    ref = jax.block_until_ready(residual_block_ref(x, params))
    err = float(jnp.max(jnp.abs(out - ref)))
    assert err < 5e-2, f"mismatch vs pure-JAX reference: max abs err = {err}"

    print("KERNEL_OK")
</pallas_src>

<mosaic_0001>
module attributes {stable_mosaic.version = 11 : i64} {
  func.func @_residual_block_kernel(%arg0: memref<232x128xf32, #tpu.memory_space<vmem>>, %arg1: memref<200x1xf32, #tpu.memory_space<vmem>>, %arg2: memref<9x128x128xf32, #tpu.memory_space<vmem>>, %arg3: memref<1x128xf32, #tpu.memory_space<vmem>>, %arg4: memref<1x128xf32, #tpu.memory_space<vmem>>, %arg5: memref<1x128xf32, #tpu.memory_space<vmem>>, %arg6: memref<9x128x128xf32, #tpu.memory_space<vmem>>, %arg7: memref<1x128xf32, #tpu.memory_space<vmem>>, %arg8: memref<1x128xf32, #tpu.memory_space<vmem>>, %arg9: memref<1x128xf32, #tpu.memory_space<vmem>>, %arg10: memref<200x128xf32, #tpu.memory_space<vmem>>, %arg11: memref<232x128xf32, #tpu.memory_space<vmem>>, %arg12: memref<200x128xf32, #tpu.memory_space<vmem>>) attributes {dimension_semantics = [], scalar_prefetch = 0 : i64, scratch_operands = 2 : i64, tpu.core_type = #tpu.core_type<tc>} {
    %c0 = arith.constant 0 : index
    %c0_0 = arith.constant 0 : index
    %0 = vector.load %arg1[%c0, %c0_0] : memref<200x1xf32, #tpu.memory_space<vmem>>, vector<200x1xf32>
    %c5 = arith.constant 5 : index
    %c0_1 = arith.constant 0 : index
    %1 = vector.load %arg0[%c5, %c0_1] : memref<232x128xf32, #tpu.memory_space<vmem>>, vector<200x128xf32>
    %c0_2 = arith.constant 0 : index
    %c0_3 = arith.constant 0 : index
    %c0_4 = arith.constant 0 : index
    %2 = vector.load %arg2[%c0_2, %c0_3, %c0_4] : memref<9x128x128xf32, #tpu.memory_space<vmem>>, vector<1x128x128xf32>
    %3 = vector.shape_cast %2 : vector<1x128x128xf32> to vector<128x128xf32>
    %cst = arith.constant dense<0.000000e+00> : vector<200x128xf32>
    %4 = tpu.matmul %1, %3, %cst {dimension_numbers = #tpu.dot_dimension_numbers<[1], [0], [0], [1], [0, 0, 1, 1], [], []>} : vector<200x128xf32>, vector<128x128xf32>, vector<200x128xf32> -> vector<200x128xf32>
    %c0_5 = arith.constant 0 : index
    %c0_6 = arith.constant 0 : index
    %5 = vector.load %arg3[%c0_5, %c0_6] : memref<1x128xf32, #tpu.memory_space<vmem>>, vector<1x128xf32>
    %6 = vector.broadcast %5 : vector<1x128xf32> to vector<200x128xf32>
    %7 = arith.addf %4, %6 : vector<200x128xf32>
    %c0_7 = arith.constant 0 : index
    %c0_8 = arith.constant 0 : index
    %8 = vector.load %arg12[%c0_7, %c0_8] : memref<200x128xf32, #tpu.memory_space<vmem>>, vector<200x128xf32>
    tpu.vector_store %arg12[%c0_7, %c0_8], %7 {strides = array<i32>} : memref<200x128xf32, #tpu.memory_space<vmem>>, vector<200x128xf32>,
    %c0_9 = arith.constant 0 : index
    %c0_10 = arith.constant 0 : index
    %9 = vector.load %arg12[%c0_9, %c0_10] : memref<200x128xf32, #tpu.memory_space<vmem>>, vector<200x128xf32>
    %c6 = arith.constant 6 : index
    %c0_11 = arith.constant 0 : index
    %10 = vector.load %arg0[%c6, %c0_11] : memref<232x128xf32, #tpu.memory_space<vmem>>, vector<200x128xf32>
    %c1 = arith.constant 1 : index
    %c0_12 = arith.constant 0 : index
    %c0_13 = arith.constant 0 : index
    %11 = vector.load %arg2[%c1, %c0_12, %c0_13] : memref<9x128x128xf32, #tpu.memory_space<vmem>>, vector<1x128x128xf32>
    %12 = vector.shape_cast %11 : vector<1x128x128xf32> to vector<128x128xf32>
    %cst_14 = arith.constant dense<0.000000e+00> : vector<200x128xf32>
    %13 = tpu.matmul %10, %12, %cst_14 {dimension_numbers = #tpu.dot_dimension_numbers<[1], [0], [0], [1], [0, 0, 1, 1], [], []>} : vector<200x128xf32>, vector<128x128xf32>, vector<200x128xf32> -> vector<200x128xf32>
    %14 = arith.addf %9, %13 : vector<200x128xf32>
    %c0_15 = arith.constant 0 : index
    %c0_16 = arith.constant 0 : index
    %15 = vector.load %arg12[%c0_15, %c0_16] : memref<200x128xf32, #tpu.memory_space<vmem>>, vector<200x128xf32>
    tpu.vector_store %arg12[%c0_15, %c0_16], %14 {strides = array<i32>} : memref<200x128xf32, #tpu.memory_space<vmem>>, vector<200x128xf32>,
    %c0_17 = arith.constant 0 : index
    %c0_18 = arith.constant 0 : index
    %16 = vector.load %arg12[%c0_17, %c0_18] : memref<200x128xf32, #tpu.memory_space<vmem>>, vector<200x128xf32>
    %c7 = arith.constant 7 : index
    %c0_19 = arith.constant 0 : index
    %17 = vector.load %arg0[%c7, %c0_19] : memref<232x128xf32, #tpu.memory_space<vmem>>, vector<200x128xf32>
    %c2 = arith.constant 2 : index
    %c0_20 = arith.constant 0 : index
    %c0_21 = arith.constant 0 : index
    %18 = vector.load %arg2[%c2, %c0_20, %c0_21] : memref<9x128x128xf32, #tpu.memory_space<vmem>>, vector<1x128x128xf32>
    %19 = vector.shape_cast %18 : vector<1x128x128xf32> to vector<128x128xf32>
    %cst_22 = arith.constant dense<0.000000e+00> : vector<200x128xf32>
    %20 = tpu.matmul %17, %19, %cst_22 {dimension_numbers = #tpu.dot_dimension_numbers<[1], [0], [0], [1], [0, 0, 1, 1], [], []>} : vector<200x128xf32>, vector<128x128xf32>, vector<200x128xf32> -> vector<200x128xf32>
    %21 = arith.addf %16, %20 : vector<200x128xf32>
    %c0_23 = arith.constant 0 : index
    %c0_24 = arith.constant 0 : index
    %22 = vector.load %arg12[%c0_23, %c0_24] : memref<200x128xf32, #tpu.memory_space<vmem>>, vector<200x128xf32>
    tpu.vector_store %arg12[%c0_23, %c0_24], %21 {strides = array<i32>} : memref<200x128xf32, #tpu.memory_space<vmem>>, vector<200x128xf32>,
    %c0_25 = arith.constant 0 : index
    %c0_26 = arith.constant 0 : index
    %23 = vector.load %arg12[%c0_25, %c0_26] : memref<200x128xf32, #tpu.memory_space<vmem>>, vector<200x128xf32>
    %c15 = arith.constant 15 : index
    %c0_27 = arith.constant 0 : index
    %24 = vector.load %arg0[%c15, %c0_27] : memref<232x128xf32, #tpu.memory_space<vmem>>, vector<200x128xf32>
    %c3 = arith.constant 3 : index
    %c0_28 = arith.constant 0 : index
    %c0_29 = arith.constant 0 : index
    %25 = vector.load %arg2[%c3, %c0_28, %c0_29] : memref<9x128x128xf32, #tpu.memory_space<vmem>>, vector<1x128x128xf32>
    %26 = vector.shape_cast %25 : vector<1x128x128xf32> to vector<128x128xf32>
    %cst_30 = arith.constant dense<0.000000e+00> : vector<200x128xf32>
    %27 = tpu.matmul %24, %26, %cst_30 {dimension_numbers = #tpu.dot_dimension_numbers<[1], [0], [0], [1], [0, 0, 1, 1], [], []>} : vector<200x128xf32>, vector<128x128xf32>, vector<200x128xf32> -> vector<200x128xf32>
    %28 = arith.addf %23, %27 : vector<200x128xf32>
    %c0_31 = arith.constant 0 : index
    %c0_32 = arith.constant 0 : index
    %29 = vector.load %arg12[%c0_31, %c0_32] : memref<200x128xf32, #tpu.memory_space<vmem>>, vector<200x128xf32>
    tpu.vector_store %arg12[%c0_31, %c0_32], %28 {strides = array<i32>} : memref<200x128xf32, #tpu.memory_space<vmem>>, vector<200x128xf32>,
    %c0_33 = arith.constant 0 : index
    %c0_34 = arith.constant 0 : index
    %30 = vector.load %arg12[%c0_33, %c0_34] : memref<200x128xf32, #tpu.memory_space<vmem>>, vector<200x128xf32>
    %c16 = arith.constant 16 : index
    %c0_35 = arith.constant 0 : index
    %31 = vector.load %arg0[%c16, %c0_35] : memref<232x128xf32, #tpu.memory_space<vmem>>, vector<200x128xf32>
    %c4 = arith.constant 4 : index
    %c0_36 = arith.constant 0 : index
    %c0_37 = arith.constant 0 : index
    %32 = vector.load %arg2[%c4, %c0_36, %c0_37] : memref<9x128x128xf32, #tpu.memory_space<vmem>>, vector<1x128x128xf32>
    %33 = vector.shape_cast %32 : vector<1x128x128xf32> to vector<128x128xf32>
    %cst_38 = arith.constant dense<0.000000e+00> : vector<200x128xf32>
    %34 = tpu.matmul %31, %33, %cst_38 {dimension_numbers = #tpu.dot_dimension_numbers<[1], [0], [0], [1], [0, 0, 1, 1], [], []>} : vector<200x128xf32>, vector<128x128xf32>, vector<200x128xf32> -> vector<200x128xf32>
    %35 = arith.addf %30, %34 : vector<200x128xf32>
    %c0_39 = arith.constant 0 : index
    %c0_40 = arith.constant 0 : index
    %36 = vector.load %arg12[%c0_39, %c0_40] : memref<200x128xf32, #tpu.memory_space<vmem>>, vector<200x128xf32>
    tpu.vector_store %arg12[%c0_39, %c0_40], %35 {strides = array<i32>} : memref<200x128xf32, #tpu.memory_space<vmem>>, vector<200x128xf32>,
    %c0_41 = arith.constant 0 : index
    %c0_42 = arith.constant 0 : index
    %37 = vector.load %arg12[%c0_41, %c0_42] : memref<200x128xf32, #tpu.memory_space<vmem>>, vector<200x128xf32>
    %c17 = arith.constant 17 : index
    %c0_43 = arith.constant 0 : index
    %38 = vector.load %arg0[%c17, %c0_43] : memref<232x128xf32, #tpu.memory_space<vmem>>, vector<200x128xf32>
    %c5_44 = arith.constant 5 : index
    %c0_45 = arith.constant 0 : index
    %c0_46 = arith.constant 0 : index
    %39 = vector.load %arg2[%c5_44, %c0_45, %c0_46] : memref<9x128x128xf32, #tpu.memory_space<vmem>>, vector<1x128x128xf32>
    %40 = vector.shape_cast %39 : vector<1x128x128xf32> to vector<128x128xf32>
    %cst_47 = arith.constant dense<0.000000e+00> : vector<200x128xf32>
    %41 = tpu.matmul %38, %40, %cst_47 {dimension_numbers = #tpu.dot_dimension_numbers<[1], [0], [0], [1], [0, 0, 1, 1], [], []>} : vector<200x128xf32>, vector<128x128xf32>, vector<200x128xf32> -> vector<200x128xf32>
    %42 = arith.addf %37, %41 : vector<200x128xf32>
    %c0_48 = arith.constant 0 : index
    %c0_49 = arith.constant 0 : index
    %43 = vector.load %arg12[%c0_48, %c0_49] : memref<200x128xf32, #tpu.memory_space<vmem>>, vector<200x128xf32>
    tpu.vector_store %arg12[%c0_48, %c0_49], %42 {strides = array<i32>} : memref<200x128xf32, #tpu.memory_space<vmem>>, vector<200x128xf32>,
    %c0_50 = arith.constant 0 : index
    %c0_51 = arith.constant 0 : index
    %44 = vector.load %arg12[%c0_50, %c0_51] : memref<200x128xf32, #tpu.memory_space<vmem>>, vector<200x128xf32>
    %c25 = arith.constant 25 : index
    %c0_52 = arith.constant 0 : index
    %45 = vector.load %arg0[%c25, %c0_52] : memref<232x128xf32, #tpu.memory_space<vmem>>, vector<200x128xf32>
    %c6_53 = arith.constant 6 : index
    %c0_54 = arith.constant 0 : index
    %c0_55 = arith.constant 0 : index
    %46 = vector.load %arg2[%c6_53, %c0_54, %c0_55] : memref<9x128x128xf32, #tpu.memory_space<vmem>>, vector<1x128x128xf32>
    %47 = vector.shape_cast %46 : vector<1x128x128xf32> to vector<128x128xf32>
    %cst_56 = arith.constant dense<0.000000e+00> : vector<200x128xf32>
    %48 = tpu.matmul %45, %47, %cst_56 {dimension_numbers = #tpu.dot_dimension_numbers<[1], [0], [0], [1], [0, 0, 1, 1], [], []>} : vector<200x128xf32>, vector<128x128xf32>, vector<200x128xf32> -> vector<200x128xf32>
    %49 = arith.addf %44, %48 : vector<200x128xf32>
    %c0_57 = arith.constant 0 : index
    %c0_58 = arith.constant 0 : index
    %50 = vector.load %arg12[%c0_57, %c0_58] : memref<200x128xf32, #tpu.memory_space<vmem>>, vector<200x128xf32>
    tpu.vector_store %arg12[%c0_57, %c0_58], %49 {strides = array<i32>} : memref<200x128xf32, #tpu.memory_space<vmem>>, vector<200x128xf32>,
    %c0_59 = arith.constant 0 : index
    %c0_60 = arith.constant 0 : index
    %51 = vector.load %arg12[%c0_59, %c0_60] : memref<200x128xf32, #tpu.memory_space<vmem>>, vector<200x128xf32>
    %c26 = arith.constant 26 : index
    %c0_61 = arith.constant 0 : index
    %52 = vector.load %arg0[%c26, %c0_61] : memref<232x128xf32, #tpu.memory_space<vmem>>, vector<200x128xf32>
    %c7_62 = arith.constant 7 : index
    %c0_63 = arith.constant 0 : index
    %c0_64 = arith.constant 0 : index
    %53 = vector.load %arg2[%c7_62, %c0_63, %c0_64] : memref<9x128x128xf32, #tpu.memory_space<vmem>>, vector<1x128x128xf32>
    %54 = vector.shape_cast %53 : vector<1x128x128xf32> to vector<128x128xf32>
    %cst_65 = arith.constant dense<0.000000e+00> : vector<200x128xf32>
    %55 = tpu.matmul %52, %54, %cst_65 {dimension_numbers = #tpu.dot_dimension_numbers<[1], [0], [0], [1], [0, 0, 1, 1], [], []>} : vector<200x128xf32>, vector<128x128xf32>, vector<200x128xf32> -> vector<200x128xf32>
    %56 = arith.addf %51, %55 : vector<200x128xf32>
    %c0_66 = arith.constant 0 : index
    %c0_67 = arith.constant 0 : index
    %57 = vector.load %arg12[%c0_66, %c0_67] : memref<200x128xf32, #tpu.memory_space<vmem>>, vector<200x128xf32>
    tpu.vector_store %arg12[%c0_66, %c0_67], %56 {strides = array<i32>} : memref<200x128xf32, #tpu.memory_space<vmem>>, vector<200x128xf32>,
    %c0_68 = arith.constant 0 : index
    %c0_69 = arith.constant 0 : index
    %58 = vector.load %arg12[%c0_68, %c0_69] : memref<200x128xf32, #tpu.memory_space<vmem>>, vector<200x128xf32>
    %c27 = arith.constant 27 : index
    %c0_70 = arith.constant 0 : index
    %59 = vector.load %arg0[%c27, %c0_70] : memref<232x128xf32, #tpu.memory_space<vmem>>, vector<200x128xf32>
    %c8 = arith.constant 8 : index
    %c0_71 = arith.constant 0 : index
    %c0_72 = arith.constant 0 : index
    %60 = vector.load %arg2[%c8, %c0_71, %c0_72] : memref<9x128x128xf32, #tpu.memory_space<vmem>>, vector<1x128x128xf32>
    %61 = vector.shape_cast %60 : vector<1x128x128xf32> to vector<128x128xf32>
    %cst_73 = arith.constant dense<0.000000e+00> : vector<200x128xf32>
    %62 = tpu.matmul %59, %61, %cst_73 {dimension_numbers = #tpu.dot_dimension_numbers<[1], [0], [0], [1], [0, 0, 1, 1], [], []>} : vector<200x128xf32>, vector<128x128xf32>, vector<200x128xf32> -> vector<200x128xf32>
    %63 = arith.addf %58, %62 : vector<200x128xf32>
    %c0_74 = arith.constant 0 : index
    %c0_75 = arith.constant 0 : index
    %64 = vector.load %arg12[%c0_74, %c0_75] : memref<200x128xf32, #tpu.memory_space<vmem>>, vector<200x128xf32>
    tpu.vector_store %arg12[%c0_74, %c0_75], %63 {strides = array<i32>} : memref<200x128xf32, #tpu.memory_space<vmem>>, vector<200x128xf32>,
    %c0_76 = arith.constant 0 : index
    %c0_77 = arith.constant 0 : index
    %65 = vector.load %arg12[%c0_76, %c0_77] : memref<200x128xf32, #tpu.memory_space<vmem>>, vector<200x128xf32>
    %66 = vector.broadcast %0 : vector<200x1xf32> to vector<200x128xf32>
    %67 = arith.mulf %65, %66 : vector<200x128xf32>
    %cst_78 = arith.constant dense<0.000000e+00> : vector<128xf32>
    %68 = vector.multi_reduction <add>, %67, %cst_78 [0] : vector<200x128xf32> to vector<128xf32>
    %69 = vector.shape_cast %68 : vector<128xf32> to vector<1x128xf32>
    %cst_79 = arith.constant 7.812500e-03 : f32
    %70 = vector.broadcast %cst_79 : f32 to vector<1x128xf32>
    %71 = arith.mulf %69, %70 : vector<1x128xf32>
    %72 = vector.broadcast %71 : vector<1x128xf32> to vector<200x128xf32>
    %73 = arith.subf %65, %72 : vector<200x128xf32>
    %74 = vector.broadcast %0 : vector<200x1xf32> to vector<200x128xf32>
    %75 = arith.mulf %73, %74 : vector<200x128xf32>
    %76 = arith.mulf %75, %75 : vector<200x128xf32>
    %cst_80 = arith.constant dense<0.000000e+00> : vector<128xf32>
    %77 = vector.multi_reduction <add>, %76, %cst_80 [0] : vector<200x128xf32> to vector<128xf32>
    %78 = vector.shape_cast %77 : vector<128xf32> to vector<1x128xf32>
    %cst_81 = arith.constant 7.812500e-03 : f32
    %79 = vector.broadcast %cst_81 : f32 to vector<1x128xf32>
    %80 = arith.mulf %78, %79 : vector<1x128xf32>
    %cst_82 = arith.constant 9.99999974E-6 : f32
    %81 = vector.broadcast %cst_82 : f32 to vector<1x128xf32>
    %82 = arith.addf %80, %81 : vector<1x128xf32>
    %83 = math.rsqrt %82 : vector<1x128xf32>
    %c0_83 = arith.constant 0 : index
    %c0_84 = arith.constant 0 : index
    %84 = vector.load %arg4[%c0_83, %c0_84] : memref<1x128xf32, #tpu.memory_space<vmem>>, vector<1x128xf32>
    %85 = arith.mulf %83, %84 : vector<1x128xf32>
    %86 = vector.broadcast %71 : vector<1x128xf32> to vector<200x128xf32>
    %87 = arith.subf %65, %86 : vector<200x128xf32>
    %88 = vector.broadcast %85 : vector<1x128xf32> to vector<200x128xf32>
    %89 = arith.mulf %87, %88 : vector<200x128xf32>
    %c0_85 = arith.constant 0 : index
    %c0_86 = arith.constant 0 : index
    %90 = vector.load %arg5[%c0_85, %c0_86] : memref<1x128xf32, #tpu.memory_space<vmem>>, vector<1x128xf32>
    %91 = vector.broadcast %90 : vector<1x128xf32> to vector<200x128xf32>
    %92 = arith.addf %89, %91 : vector<200x128xf32>
    %cst_87 = arith.constant 0.000000e+00 : f32
    %93 = vector.broadcast %cst_87 : f32 to vector<200x128xf32>
    %94 = arith.maximumf %92, %93 : vector<200x128xf32>
    %cst_88 = arith.constant 0.000000e+00 : f32
    %95 = vector.broadcast %cst_88 : f32 to vector<16x128xf32>
    %c0_89 = arith.constant 0 : index
    %c0_90 = arith.constant 0 : index
    %96 = vector.load %arg11[%c0_89, %c0_90] : memref<232x128xf32, #tpu.memory_space<vmem>>, vector<16x128xf32>
    tpu.vector_store %arg11[%c0_89, %c0_90], %95 {strides = array<i32>} : memref<232x128xf32, #tpu.memory_space<vmem>>, vector<16x128xf32>,
    %c216 = arith.constant 216 : index
    %c0_91 = arith.constant 0 : index
    %97 = vector.load %arg11[%c216, %c0_91] : memref<232x128xf32, #tpu.memory_space<vmem>>, vector<16x128xf32>
    tpu.vector_store %arg11[%c216, %c0_91], %95 {strides = array<i32>} : memref<232x128xf32, #tpu.memory_space<vmem>>, vector<16x128xf32>,
    %98 = vector.broadcast %0 : vector<200x1xf32> to vector<200x128xf32>
    %99 = arith.mulf %94, %98 : vector<200x128xf32>
    %c16_92 = arith.constant 16 : index
    %c0_93 = arith.constant 0 : index
    %100 = vector.load %arg11[%c16_92, %c0_93] : memref<232x128xf32, #tpu.memory_space<vmem>>, vector<200x128xf32>
    tpu.vector_store %arg11[%c16_92, %c0_93], %99 {strides = array<i32>} : memref<232x128xf32, #tpu.memory_space<vmem>>, vector<200x128xf32>,
    %c5_94 = arith.constant 5 : index
    %c0_95 = arith.constant 0 : index
    %101 = vector.load %arg11[%c5_94, %c0_95] : memref<232x128xf32, #tpu.memory_space<vmem>>, vector<200x128xf32>
    %c0_96 = arith.constant 0 : index
    %c0_97 = arith.constant 0 : index
    %c0_98 = arith.constant 0 : index
    %102 = vector.load %arg6[%c0_96, %c0_97, %c0_98] : memref<9x128x128xf32, #tpu.memory_space<vmem>>, vector<1x128x128xf32>
    %103 = vector.shape_cast %102 : vector<1x128x128xf32> to vector<128x128xf32>
    %cst_99 = arith.constant dense<0.000000e+00> : vector<200x128xf32>
    %104 = tpu.matmul %101, %103, %cst_99 {dimension_numbers = #tpu.dot_dimension_numbers<[1], [0], [0], [1], [0, 0, 1, 1], [], []>} : vector<200x128xf32>, vector<128x128xf32>, vector<200x128xf32> -> vector<200x128xf32>
    %c0_100 = arith.constant 0 : index
    %c0_101 = arith.constant 0 : index
    %105 = vector.load %arg7[%c0_100, %c0_101] : memref<1x128xf32, #tpu.memory_space<vmem>>, vector<1x128xf32>
    %106 = vector.broadcast %105 : vector<1x128xf32> to vector<200x128xf32>
    %107 = arith.addf %104, %106 : vector<200x128xf32>
    %c0_102 = arith.constant 0 : index
    %c0_103 = arith.constant 0 : index
    %108 = vector.load %arg12[%c0_102, %c0_103] : memref<200x128xf32, #tpu.memory_space<vmem>>, vector<200x128xf32>
    tpu.vector_store %arg12[%c0_102, %c0_103], %107 {strides = array<i32>} : memref<200x128xf32, #tpu.memory_space<vmem>>, vector<200x128xf32>,
    %c0_104 = arith.constant 0 : index
    %c0_105 = arith.constant 0 : index
    %109 = vector.load %arg12[%c0_104, %c0_105] : memref<200x128xf32, #tpu.memory_space<vmem>>, vector<200x128xf32>
    %c6_106 = arith.constant 6 : index
    %c0_107 = arith.constant 0 : index
    %110 = vector.load %arg11[%c6_106, %c0_107] : memref<232x128xf32, #tpu.memory_space<vmem>>, vector<200x128xf32>
    %c1_108 = arith.constant 1 : index
    %c0_109 = arith.constant 0 : index
    %c0_110 = arith.constant 0 : index
    %111 = vector.load %arg6[%c1_108, %c0_109, %c0_110] : memref<9x128x128xf32, #tpu.memory_space<vmem>>, vector<1x128x128xf32>
    %112 = vector.shape_cast %111 : vector<1x128x128xf32> to vector<128x128xf32>
    %cst_111 = arith.constant dense<0.000000e+00> : vector<200x128xf32>
    %113 = tpu.matmul %110, %112, %cst_111 {dimension_numbers = #tpu.dot_dimension_numbers<[1], [0], [0], [1], [0, 0, 1, 1], [], []>} : vector<200x128xf32>, vector<128x128xf32>, vector<200x128xf32> -> vector<200x128xf32>
    %114 = arith.addf %109, %113 : vector<200x128xf32>
    %c0_112 = arith.constant 0 : index
    %c0_113 = arith.constant 0 : index
    %115 = vector.load %arg12[%c0_112, %c0_113] : memref<200x128xf32, #tpu.memory_space<vmem>>, vector<200x128xf32>
    tpu.vector_store %arg12[%c0_112, %c0_113], %114 {strides = array<i32>} : memref<200x128xf32, #tpu.memory_space<vmem>>, vector<200x128xf32>,
    %c0_114 = arith.constant 0 : index
    %c0_115 = arith.constant 0 : index
    %116 = vector.load %arg12[%c0_114, %c0_115] : memref<200x128xf32, #tpu.memory_space<vmem>>, vector<200x128xf32>
    %c7_116 = arith.constant 7 : index
    %c0_117 = arith.constant 0 : index
    %117 = vector.load %arg11[%c7_116, %c0_117] : memref<232x128xf32, #tpu.memory_space<vmem>>, vector<200x128xf32>
    %c2_118 = arith.constant 2 : index
    %c0_119 = arith.constant 0 : index
    %c0_120 = arith.constant 0 : index
    %118 = vector.load %arg6[%c2_118, %c0_119, %c0_120] : memref<9x128x128xf32, #tpu.memory_space<vmem>>, vector<1x128x128xf32>
    %119 = vector.shape_cast %118 : vector<1x128x128xf32> to vector<128x128xf32>
    %cst_121 = arith.constant dense<0.000000e+00> : vector<200x128xf32>
    %120 = tpu.matmul %117, %119, %cst_121 {dimension_numbers = #tpu.dot_dimension_numbers<[1], [0], [0], [1], [0, 0, 1, 1], [], []>} : vector<200x128xf32>, vector<128x128xf32>, vector<200x128xf32> -> vector<200x128xf32>
    %121 = arith.addf %116, %120 : vector<200x128xf32>
    %c0_122 = arith.constant 0 : index
    %c0_123 = arith.constant 0 : index
    %122 = vector.load %arg12[%c0_122, %c0_123] : memref<200x128xf32, #tpu.memory_space<vmem>>, vector<200x128xf32>
    tpu.vector_store %arg12[%c0_122, %c0_123], %121 {strides = array<i32>} : memref<200x128xf32, #tpu.memory_space<vmem>>, vector<200x128xf32>,
    %c0_124 = arith.constant 0 : index
    %c0_125 = arith.constant 0 : index
    %123 = vector.load %arg12[%c0_124, %c0_125] : memref<200x128xf32, #tpu.memory_space<vmem>>, vector<200x128xf32>
    %c15_126 = arith.constant 15 : index
    %c0_127 = arith.constant 0 : index
    %124 = vector.load %arg11[%c15_126, %c0_127] : memref<232x128xf32, #tpu.memory_space<vmem>>, vector<200x128xf32>
    %c3_128 = arith.constant 3 : index
    %c0_129 = arith.constant 0 : index
    %c0_130 = arith.constant 0 : index
    %125 = vector.load %arg6[%c3_128, %c0_129, %c0_130] : memref<9x128x128xf32, #tpu.memory_space<vmem>>, vector<1x128x128xf32>
    %126 = vector.shape_cast %125 : vector<1x128x128xf32> to vector<128x128xf32>
    %cst_131 = arith.constant dense<0.000000e+00> : vector<200x128xf32>
    %127 = tpu.matmul %124, %126, %cst_131 {dimension_numbers = #tpu.dot_dimension_numbers<[1], [0], [0], [1], [0, 0, 1, 1], [], []>} : vector<200x128xf32>, vector<128x128xf32>, vector<200x128xf32> -> vector<200x128xf32>
    %128 = arith.addf %123, %127 : vector<200x128xf32>
    %c0_132 = arith.constant 0 : index
    %c0_133 = arith.constant 0 : index
    %129 = vector.load %arg12[%c0_132, %c0_133] : memref<200x128xf32, #tpu.memory_space<vmem>>, vector<200x128xf32>
    tpu.vector_store %arg12[%c0_132, %c0_133], %128 {strides = array<i32>} : memref<200x128xf32, #tpu.memory_space<vmem>>, vector<200x128xf32>,
    %c0_134 = arith.constant 0 : index
    %c0_135 = arith.constant 0 : index
    %130 = vector.load %arg12[%c0_134, %c0_135] : memref<200x128xf32, #tpu.memory_space<vmem>>, vector<200x128xf32>
    %c16_136 = arith.constant 16 : index
    %c0_137 = arith.constant 0 : index
    %131 = vector.load %arg11[%c16_136, %c0_137] : memref<232x128xf32, #tpu.memory_space<vmem>>, vector<200x128xf32>
    %c4_138 = arith.constant 4 : index
    %c0_139 = arith.constant 0 : index
    %c0_140 = arith.constant 0 : index
    %132 = vector.load %arg6[%c4_138, %c0_139, %c0_140] : memref<9x128x128xf32, #tpu.memory_space<vmem>>, vector<1x128x128xf32>
    %133 = vector.shape_cast %132 : vector<1x128x128xf32> to vector<128x128xf32>
    %cst_141 = arith.constant dense<0.000000e+00> : vector<200x128xf32>
    %134 = tpu.matmul %131, %133, %cst_141 {dimension_numbers = #tpu.dot_dimension_numbers<[1], [0], [0], [1], [0, 0, 1, 1], [], []>} : vector<200x128xf32>, vector<128x128xf32>, vector<200x128xf32> -> vector<200x128xf32>
    %135 = arith.addf %130, %134 : vector<200x128xf32>
    %c0_142 = arith.constant 0 : index
    %c0_143 = arith.constant 0 : index
    %136 = vector.load %arg12[%c0_142, %c0_143] : memref<200x128xf32, #tpu.memory_space<vmem>>, vector<200x128xf32>
    tpu.vector_store %arg12[%c0_142, %c0_143], %135 {strides = array<i32>} : memref<200x128xf32, #tpu.memory_space<vmem>>, vector<200x128xf32>,
    %c0_144 = arith.constant 0 : index
    %c0_145 = arith.constant 0 : index
    %137 = vector.load %arg12[%c0_144, %c0_145] : memref<200x128xf32, #tpu.memory_space<vmem>>, vector<200x128xf32>
    %c17_146 = arith.constant 17 : index
    %c0_147 = arith.constant 0 : index
    %138 = vector.load %arg11[%c17_146, %c0_147] : memref<232x128xf32, #tpu.memory_space<vmem>>, vector<200x128xf32>
    %c5_148 = arith.constant 5 : index
    %c0_149 = arith.constant 0 : index
    %c0_150 = arith.constant 0 : index
    %139 = vector.load %arg6[%c5_148, %c0_149, %c0_150] : memref<9x128x128xf32, #tpu.memory_space<vmem>>, vector<1x128x128xf32>
    %140 = vector.shape_cast %139 : vector<1x128x128xf32> to vector<128x128xf32>
    %cst_151 = arith.constant dense<0.000000e+00> : vector<200x128xf32>
    %141 = tpu.matmul %138, %140, %cst_151 {dimension_numbers = #tpu.dot_dimension_numbers<[1], [0], [0], [1], [0, 0, 1, 1], [], []>} : vector<200x128xf32>, vector<128x128xf32>, vector<200x128xf32> -> vector<200x128xf32>
    %142 = arith.addf %137, %141 : vector<200x128xf32>
    %c0_152 = arith.constant 0 : index
    %c0_153 = arith.constant 0 : index
    %143 = vector.load %arg12[%c0_152, %c0_153] : memref<200x128xf32, #tpu.memory_space<vmem>>, vector<200x128xf32>
    tpu.vector_store %arg12[%c0_152, %c0_153], %142 {strides = array<i32>} : memref<200x128xf32, #tpu.memory_space<vmem>>, vector<200x128xf32>,
    %c0_154 = arith.constant 0 : index
    %c0_155 = arith.constant 0 : index
    %144 = vector.load %arg12[%c0_154, %c0_155] : memref<200x128xf32, #tpu.memory_space<vmem>>, vector<200x128xf32>
    %c25_156 = arith.constant 25 : index
    %c0_157 = arith.constant 0 : index
    %145 = vector.load %arg11[%c25_156, %c0_157] : memref<232x128xf32, #tpu.memory_space<vmem>>, vector<200x128xf32>
    %c6_158 = arith.constant 6 : index
    %c0_159 = arith.constant 0 : index
    %c0_160 = arith.constant 0 : index
    %146 = vector.load %arg6[%c6_158, %c0_159, %c0_160] : memref<9x128x128xf32, #tpu.memory_space<vmem>>, vector<1x128x128xf32>
    %147 = vector.shape_cast %146 : vector<1x128x128xf32> to vector<128x128xf32>
    %cst_161 = arith.constant dense<0.000000e+00> : vector<200x128xf32>
    %148 = tpu.matmul %145, %147, %cst_161 {dimension_numbers = #tpu.dot_dimension_numbers<[1], [0], [0], [1], [0, 0, 1, 1], [], []>} : vector<200x128xf32>, vector<128x128xf32>, vector<200x128xf32> -> vector<200x128xf32>
    %149 = arith.addf %144, %148 : vector<200x128xf32>
    %c0_162 = arith.constant 0 : index
    %c0_163 = arith.constant 0 : index
    %150 = vector.load %arg12[%c0_162, %c0_163] : memref<200x128xf32, #tpu.memory_space<vmem>>, vector<200x128xf32>
    tpu.vector_store %arg12[%c0_162, %c0_163], %149 {strides = array<i32>} : memref<200x128xf32, #tpu.memory_space<vmem>>, vector<200x128xf32>,
    %c0_164 = arith.constant 0 : index
    %c0_165 = arith.constant 0 : index
    %151 = vector.load %arg12[%c0_164, %c0_165] : memref<200x128xf32, #tpu.memory_space<vmem>>, vector<200x128xf32>
    %c26_166 = arith.constant 26 : index
    %c0_167 = arith.constant 0 : index
    %152 = vector.load %arg11[%c26_166, %c0_167] : memref<232x128xf32, #tpu.memory_space<vmem>>, vector<200x128xf32>
    %c7_168 = arith.constant 7 : index
    %c0_169 = arith.constant 0 : index
    %c0_170 = arith.constant 0 : index
    %153 = vector.load %arg6[%c7_168, %c0_169, %c0_170] : memref<9x128x128xf32, #tpu.memory_space<vmem>>, vector<1x128x128xf32>
    %154 = vector.shape_cast %153 : vector<1x128x128xf32> to vector<128x128xf32>
    %cst_171 = arith.constant dense<0.000000e+00> : vector<200x128xf32>
    %155 = tpu.matmul %152, %154, %cst_171 {dimension_numbers = #tpu.dot_dimension_numbers<[1], [0], [0], [1], [0, 0, 1, 1], [], []>} : vector<200x128xf32>, vector<128x128xf32>, vector<200x128xf32> -> vector<200x128xf32>
    %156 = arith.addf %151, %155 : vector<200x128xf32>
    %c0_172 = arith.constant 0 : index
    %c0_173 = arith.constant 0 : index
    %157 = vector.load %arg12[%c0_172, %c0_173] : memref<200x128xf32, #tpu.memory_space<vmem>>, vector<200x128xf32>
    tpu.vector_store %arg12[%c0_172, %c0_173], %156 {strides = array<i32>} : memref<200x128xf32, #tpu.memory_space<vmem>>, vector<200x128xf32>,
    %c0_174 = arith.constant 0 : index
    %c0_175 = arith.constant 0 : index
    %158 = vector.load %arg12[%c0_174, %c0_175] : memref<200x128xf32, #tpu.memory_space<vmem>>, vector<200x128xf32>
    %c27_176 = arith.constant 27 : index
    %c0_177 = arith.constant 0 : index
    %159 = vector.load %arg11[%c27_176, %c0_177] : memref<232x128xf32, #tpu.memory_space<vmem>>, vector<200x128xf32>
    %c8_178 = arith.constant 8 : index
    %c0_179 = arith.constant 0 : index
    %c0_180 = arith.constant 0 : index
    %160 = vector.load %arg6[%c8_178, %c0_179, %c0_180] : memref<9x128x128xf32, #tpu.memory_space<vmem>>, vector<1x128x128xf32>
    %161 = vector.shape_cast %160 : vector<1x128x128xf32> to vector<128x128xf32>
    %cst_181 = arith.constant dense<0.000000e+00> : vector<200x128xf32>
    %162 = tpu.matmul %159, %161, %cst_181 {dimension_numbers = #tpu.dot_dimension_numbers<[1], [0], [0], [1], [0, 0, 1, 1], [], []>} : vector<200x128xf32>, vector<128x128xf32>, vector<200x128xf32> -> vector<200x128xf32>
    %163 = arith.addf %158, %162 : vector<200x128xf32>
    %c0_182 = arith.constant 0 : index
    %c0_183 = arith.constant 0 : index
    %164 = vector.load %arg12[%c0_182, %c0_183] : memref<200x128xf32, #tpu.memory_space<vmem>>, vector<200x128xf32>
    tpu.vector_store %arg12[%c0_182, %c0_183], %163 {strides = array<i32>} : memref<200x128xf32, #tpu.memory_space<vmem>>, vector<200x128xf32>,
    %c0_184 = arith.constant 0 : index
    %c0_185 = arith.constant 0 : index
    %165 = vector.load %arg12[%c0_184, %c0_185] : memref<200x128xf32, #tpu.memory_space<vmem>>, vector<200x128xf32>
    %166 = vector.broadcast %0 : vector<200x1xf32> to vector<200x128xf32>
    %167 = arith.mulf %165, %166 : vector<200x128xf32>
    %cst_186 = arith.constant dense<0.000000e+00> : vector<128xf32>
    %168 = vector.multi_reduction <add>, %167, %cst_186 [0] : vector<200x128xf32> to vector<128xf32>
    %169 = vector.shape_cast %168 : vector<128xf32> to vector<1x128xf32>
    %cst_187 = arith.constant 7.812500e-03 : f32
    %170 = vector.broadcast %cst_187 : f32 to vector<1x128xf32>
    %171 = arith.mulf %169, %170 : vector<1x128xf32>
    %172 = vector.broadcast %171 : vector<1x128xf32> to vector<200x128xf32>
    %173 = arith.subf %165, %172 : vector<200x128xf32>
    %174 = vector.broadcast %0 : vector<200x1xf32> to vector<200x128xf32>
    %175 = arith.mulf %173, %174 : vector<200x128xf32>
    %176 = arith.mulf %175, %175 : vector<200x128xf32>
    %cst_188 = arith.constant dense<0.000000e+00> : vector<128xf32>
    %177 = vector.multi_reduction <add>, %176, %cst_188 [0] : vector<200x128xf32> to vector<128xf32>
    %178 = vector.shape_cast %177 : vector<128xf32> to vector<1x128xf32>
    %cst_189 = arith.constant 7.812500e-03 : f32
    %179 = vector.broadcast %cst_189 : f32 to vector<1x128xf32>
    %180 = arith.mulf %178, %179 : vector<1x128xf32>
    %cst_190 = arith.constant 9.99999974E-6 : f32
    %181 = vector.broadcast %cst_190 : f32 to vector<1x128xf32>
    %182 = arith.addf %180, %181 : vector<1x128xf32>
    %183 = math.rsqrt %182 : vector<1x128xf32>
    %c0_191 = arith.constant 0 : index
    %c0_192 = arith.constant 0 : index
    %184 = vector.load %arg8[%c0_191, %c0_192] : memref<1x128xf32, #tpu.memory_space<vmem>>, vector<1x128xf32>
    %185 = arith.mulf %183, %184 : vector<1x128xf32>
    %186 = vector.broadcast %171 : vector<1x128xf32> to vector<200x128xf32>
    %187 = arith.subf %165, %186 : vector<200x128xf32>
    %188 = vector.broadcast %185 : vector<1x128xf32> to vector<200x128xf32>
    %189 = arith.mulf %187, %188 : vector<200x128xf32>
    %c0_193 = arith.constant 0 : index
    %c0_194 = arith.constant 0 : index
    %190 = vector.load %arg9[%c0_193, %c0_194] : memref<1x128xf32, #tpu.memory_space<vmem>>, vector<1x128xf32>
    %191 = vector.broadcast %190 : vector<1x128xf32> to vector<200x128xf32>
    %192 = arith.addf %189, %191 : vector<200x128xf32>
    %c16_195 = arith.constant 16 : index
    %c0_196 = arith.constant 0 : index
    %193 = vector.load %arg0[%c16_195, %c0_196] : memref<232x128xf32, #tpu.memory_space<vmem>>, vector<200x128xf32>
    %194 = arith.addf %193, %192 : vector<200x128xf32>
    %c0_197 = arith.constant 0 : index
    %c0_198 = arith.constant 0 : index
    %195 = vector.load %arg10[%c0_197, %c0_198] : memref<200x128xf32, #tpu.memory_space<vmem>>, vector<200x128xf32>
    tpu.vector_store %arg10[%c0_197, %c0_198], %194 {strides = array<i32>} : memref<200x128xf32, #tpu.memory_space<vmem>>, vector<200x128xf32>,
    return
  }
}

</mosaic_0001>

<bundles_post_ra>
// kernel: tpu_custom_call.1
= control target key start
LH: loop header
LB: loop body
LE: loop exit
PB: predicated region body
PF: predicated region fallthrough
CT: control target
= control target key end

     0   :  { %15 = vsyncpa [#allocation5], 0  ;;  %s12795_s0 = inlined_call_operand.hbm [shape: f32[232,128], index: 0, kind: input, shape index: {}]   ;;  %s12796_s1 = inlined_call_operand.vmem [shape: f32[200,1], index: 1, kind: input, shape index: {}]   ;;  %s12797_s2 = inlined_call_operand.hbm [shape: f32[9,128,128], index: 2, kind: input, shape index: {}]   ;;  %s12798_s3 = inlined_call_operand.vmem [shape: f32[1,128], index: 3, kind: input, shape index: {}]   ;;  %s12799_s4 = inlined_call_operand.vmem [shape: f32[1,128], index: 4, kind: input, shape index: {}]   ;;  %s12800_s5 = inlined_call_operand.vmem [shape: f32[1,128], index: 5, kind: input, shape index: {}]   ;;  %s12801_s6 = inlined_call_operand.hbm [shape: f32[9,128,128], index: 6, kind: input, shape index: {}]   ;;  %s12802_s7 = inlined_call_operand.vmem [shape: f32[1,128], index: 7, kind: input, shape index: {}]   ;;  %s12803_s8 = inlined_call_operand.vmem [shape: f32[1,128], index: 8, kind: input, shape index: {}]   ;;  %s12804_s9 = inlined_call_operand.vmem [shape: f32[1,128], index: 9, kind: input, shape index: {}]   ;;  %s12805_s10 = inlined_call_operand.hbm [shape: f32[200,128], index: 10, kind: output, shape index: {}]  }
   0x1   :  { %16 = vsyncpa [#allocation8], 0 }
   0x2   :  { %17 = vsyncpa [#allocation6], 0  ;;  %s10405_s13 = smov [#allocation7]   ;;  %s10406_s15 = smov [#allocation4]  }
   0x3   :  { %s37_s14 = sshll.u32 %s10405_s13, 4  ;;  %s23_s16 = sshll.u32 %s10406_s15, 4  ;;  %s38_s14 = int_to_ptr.vmem [resolvable:$true] %s37_s14  ;;  %s10470_s16 = int_to_ptr.vmem [resolvable:$true] %s23_s16 }
   0x4   :  { %s10311_s19 = scalar_lea.hbm %s12797_s2, 18432 }
   0x5   :  { %p10312_p0 = scmp.ne.s32.totalorder %s12797_s2, %s10311_s19  ;;  %p10315_p1 = scmp.lt.u32.totalorder %s10311_s19, %s12797_s2 }
   0x7   :  { %p10317_p2 = pnand %p10315_p1, %p10312_p0 }
   0x9   :  { %10320 = shalt.err (!%p10317_p2)
}
   0xa   :  { %s10321_s24 = scalar_lea.vmem %s38_s14, 18432  ;;  %p10326_p4 = scmp.lt.s32.totalorder %s38_s14, %s38_s14 }
   0xb   :  { %p10322_p3 = scmp.ne.s32.totalorder %s38_s14, %s10321_s24  ;;  %p10327_p5 = scmp.lt.s32.totalorder %s10321_s24, %s10321_s24 }
   0xd   :  { %p10328_p6 = por %p10327_p5, %p10326_p4 }
   0xf   :  { %p10329_p7 = pnand %p10328_p6, %p10322_p3 }
  0x11   :  { %10332 = shalt.err (!%p10329_p7)
}
  0x12   :  { %s10407_s25 = smov 128   ;;  %s10408_s26 = smov 8  }
  0x13   :  { %43 = dma.hbm_to_vmem [thread:$0]  %s12797_s2, 18432, %s38_s14, [#allocation8], %s10407_s25, %s10407_s25, %s10408_s26  }
  0x14   :  { %s10333_s11 = scalar_lea.hbm %s12795_s0, 3712 }
  0x15   :  { %p10334_p8 = scmp.ne.s32.totalorder %s12795_s0, %s10333_s11  ;;  %p10337_p9 = scmp.lt.u32.totalorder %s10333_s11, %s12795_s0 }
  0x17   :  { %p10339_p10 = pnand %p10337_p9, %p10334_p8 }
  0x19   :  { %10342 = shalt.err (!%p10339_p10)
}
  0x1a   :  { %s10343_s18 = scalar_lea.vmem %s10470_s16, 3712  ;;  %p10348_p12 = scmp.lt.s32.totalorder %s10470_s16, %s10470_s16 }
  0x1b   :  { %p10344_p11 = scmp.ne.s32.totalorder %s10470_s16, %s10343_s18  ;;  %p10349_p13 = scmp.lt.s32.totalorder %s10343_s18, %s10343_s18 }
  0x1d   :  { %p10350_p0 = por %p10349_p13, %p10348_p12 }
  0x1f   :  { %p10351_p1 = pnand %p10350_p0, %p10344_p11 }
  0x21   :  { %10354 = shalt.err (!%p10351_p1)
}
  0x22   :  { %29 = dma.hbm_to_vmem [thread:$0]  %s12795_s0, 3712, %s10470_s16, [#allocation5], %s10407_s25, %s10407_s25, %s10408_s26  }
  0x23   :  { %s10409_s19 = smov [#allocation9]   ;;  %s10355_s23 = scalar_lea.hbm %s12801_s6, 18432 }
  0x24   :  { %s55_s20 = sshll.u32 %s10409_s19, 4  ;;  %p10356_p2 = scmp.ne.s32.totalorder %s12801_s6, %s10355_s23  ;;  %s56_s20 = int_to_ptr.vmem [resolvable:$true] %s55_s20 }
  0x25   :  { %p10359_p3 = scmp.lt.u32.totalorder %s10355_s23, %s12801_s6 }
  0x27   :  { %p10361_p4 = pnand %p10359_p3, %p10356_p2 }
  0x29   :  { %10364 = shalt.err (!%p10361_p4)
}
  0x2a   :  { %s10365_s30 = scalar_lea.vmem %s56_s20, 18432  ;;  %p10370_p6 = scmp.lt.s32.totalorder %s56_s20, %s56_s20 }
  0x2b   :  { %p10366_p5 = scmp.ne.s32.totalorder %s56_s20, %s10365_s30  ;;  %p10371_p7 = scmp.lt.s32.totalorder %s10365_s30, %s10365_s30 }
  0x2d   :  { %p10372_p8 = por %p10371_p7, %p10370_p6 }
  0x2f   :  { %p10373_p9 = pnand %p10372_p8, %p10366_p5 }
  0x31   :  { %10376 = shalt.err (!%p10373_p9)
}
  0x32   :  { %61 = dma.hbm_to_vmem [thread:$0]  %s12801_s6, 18432, %s56_s20, [#allocation8], %s10407_s25, %s10407_s25, %s10408_s26  }
  0x33   :  { %10399 = dma.done.wait [#allocation5], 3712  }
  0x34   :  { %10400 = vsyncadd [#allocation5], 4294963584 }
  0x35   :  { %10401 = dma.done.wait [#allocation8], 36864  }
  0x36   :  { %10402 = vsyncadd [#allocation8], 4294930432  ;;  %v12814_v0 = vmov 0.0|0.0   ;;  %vm10411_vm0 = vmmov 0   ;;  %v10412_v1 = vmov 0.0   ;;  %v127_v2 = vld [vmem:[#allocation7] sm:$0xff] }
  0x37   :  { %9009 = vmatprep.subr.bf16.mxu0 %v12814_v0  ;;  %7115 = vmatprep.mubr.msk.f32.mxu0 %vm10411_vm0, %v10412_v1  ;;  %3223 = vst [vmem:[#allocation2] sm:$0xff] %v10412_v1  ;;  %3224 = vst [vmem:[#allocation2 + $0x8] sm:$0xff] %v10412_v1  ;;  %v128_v3 = vld [vmem:[#allocation7 + $0x8] sm:$0xff]  ;;  %v129_v4 = vld [vmem:[#allocation7 + $0x10] sm:$0xff] }
  0x38   :  { %3225 = vst [vmem:[#allocation2 + $0xd8] sm:$0xff] %v10412_v1  ;;  %3226 = vst [vmem:[#allocation2 + $0xe0] sm:$0xff] %v10412_v1  ;;  %9225 = vmatprep.subr.bf16.mxu1 %v12814_v0  ;;  %8078 = vmatprep.mubr.msk.f32.mxu1 %vm10411_vm0, %v10412_v1  ;;  %v9010_v5 = vpack.c.bf16 %v128_v3, %v127_v2  ;;  %v130_v6 = vld [vmem:[#allocation7 + $0x18] sm:$0xff]  ;;  %v131_v8 = vld [vmem:[#allocation7 + $0x20] sm:$0xff] }
  0x39   :  { %v9013_v7 = vpack.c.bf16 %v130_v6, %v129_v4  ;;  %v132_v9 = vld [vmem:[#allocation7 + $0x28] sm:$0xff]  ;;  %v133_v11 = vld [vmem:[#allocation7 + $0x30] sm:$0xff]  ;;  %v134_v12 = vld [vmem:[#allocation7 + $0x38] sm:$0xff] }
  0x3a   :  { %9011 = vmatpush3.bf16.msra.mxu0 %v9010_v5  ;;  %v9016_v10 = vpack.c.bf16 %v132_v9, %v131_v8  ;;  %v9019_v13 = vpack.c.bf16 %v134_v12, %v133_v11  ;;  %v135_v14 = vld [vmem:[#allocation7 + $0x40] sm:$0xff]  ;;  %v136_v15 = vld [vmem:[#allocation7 + $0x48] sm:$0xff]  ;;  %v137_v17 = vld [vmem:[#allocation7 + $0x50] sm:$0xff] }
  0x3b   :  { %9012 = vmatprep.subr.bf16.mxu0 %v12814_v0  ;;  %v9022_v16 = vpack.c.bf16 %v136_v15, %v135_v14  ;;  %v138_v18 = vld [vmem:[#allocation7 + $0x58] sm:$0xff]  ;;  %v139_v20 = vld [vmem:[#allocation7 + $0x60] sm:$0xff]  ;;  %v140_v21 = vld [vmem:[#allocation7 + $0x68] sm:$0xff] }
  0x3c   :  { %v9025_v19 = vpack.c.bf16 %v138_v18, %v137_v17  ;;  %v9028_v22 = vpack.c.bf16 %v140_v21, %v139_v20  ;;  %v141_v23 = vld [vmem:[#allocation7 + $0x70] sm:$0xff]  ;;  %v142_v24 = vld [vmem:[#allocation7 + $0x78] sm:$0xff]  ;;  %v416_v26 = vld [vmem:[#allocation7 + $0x80] sm:$0xff] }
  0x3d   :  { %v9031_v25 = vpack.c.bf16 %v142_v24, %v141_v23  ;;  %v417_v27 = vld [vmem:[#allocation7 + $0x88] sm:$0xff]  ;;  %v102_v28 = vld [vmem:[#allocation4 + $0x5] sm:$0xff]  ;;  %v418_v30 = vld [vmem:[#allocation7 + $0x90] sm:$0xff] }
  0x3e   :  { %9014 = vmatpush3.bf16.msra.mxu0 %v9013_v7  ;;  %v9034_v29 = vpack.c.bf16 %v417_v27, %v416_v26  ;;  %v419_v31 = vld [vmem:[#allocation7 + $0x98] sm:$0xff]  ;;  %v103_v32 = vld [vmem:[#allocation4 + $0xd] sm:$0xff]  ;;  %v104_v36 = vld [vmem:[#allocation4 + $0x15] sm:$0xff] }
  0x3f   :  { %9015 = vmatprep.subr.bf16.mxu0 %v12814_v0  ;;  %v9037_v33 = vpack.c.bf16 %v419_v31, %v418_v30  ;;  %v420_v34 = vld [vmem:[#allocation7 + $0xa0] sm:$0xff]  ;;  %v421_v35 = vld [vmem:[#allocation7 + $0xa8] sm:$0xff]  ;;  %v422_v38 = vld [vmem:[#allocation7 + $0xb0] sm:$0xff] }
  0x40   :  { %v9040_v37 = vpack.c.bf16 %v421_v35, %v420_v34  ;;  %v423_v39 = vld [vmem:[#allocation7 + $0xb8] sm:$0xff]  ;;  %v424_v42 = vld [vmem:[#allocation7 + $0xc0] sm:$0xff]  ;;  %v425_v43 = vld [vmem:[#allocation7 + $0xc8] sm:$0xff] }
  0x41   :  { %v105_v40 = vld [vmem:[#allocation4 + $0x1d] sm:$0xff]  ;;  %v9043_v41 = vpack.c.bf16 %v423_v39, %v422_v38  ;;  %v106_v44 = vld [vmem:[#allocation4 + $0x25] sm:$0xff]  ;;  %v9046_v45 = vpack.c.bf16 %v425_v43, %v424_v42  ;;  %v107_v48 = vld [vmem:[#allocation4 + $0x2d] sm:$0xff] }
  0x42   :  { %9017 = vmatpush3.bf16.msra.mxu0 %v9016_v10  ;;  %v426_v46 = vld [vmem:[#allocation7 + $0xd0] sm:$0xff]  ;;  %v427_v47 = vld [vmem:[#allocation7 + $0xd8] sm:$0xff]  ;;  %v428_v50 = vld [vmem:[#allocation7 + $0xe0] sm:$0xff] }
  0x43   :  { %9018 = vmatprep.subr.bf16.mxu0 %v12814_v0  ;;  %v9049_v49 = vpack.c.bf16 %v427_v47, %v426_v46  ;;  %v429_v51 = vld [vmem:[#allocation7 + $0xe8] sm:$0xff]  ;;  %v430_v54 = vld [vmem:[#allocation7 + $0xf0] sm:$0xff]  ;;  %v431_v55 = vld [vmem:[#allocation7 + $0xf8] sm:$0xff] }
  0x44   :  { %v108_v52 = vld [vmem:[#allocation4 + $0x35] sm:$0xff]  ;;  %v9052_v53 = vpack.c.bf16 %v429_v51, %v428_v50  ;;  %v109_v56 = vld [vmem:[#allocation4 + $0x3d] sm:$0xff]  ;;  %v9055_v57 = vpack.c.bf16 %v431_v55, %v430_v54  ;;  %v110_v58 = vld [vmem:[#allocation4 + $0x45] sm:$0xff] }
  0x45   :  { %v111_v59 = vld [vmem:[#allocation4 + $0x4d] sm:$0xff]  ;;  %v112_v60 = vld [vmem:[#allocation4 + $0x55] sm:$0xff]  ;;  %v113_v61 = vld [vmem:[#allocation4 + $0x5d] sm:$0xff] }
  0x46   :  { %9020 = vmatpush3.bf16.msra.mxu0 %v9019_v13  ;;  %v114_v62 = vld [vmem:[#allocation4 + $0x65] sm:$0xff]  ;;  %v115_v63 = vld [vmem:[#allocation4 + $0x6d] sm:$0xff]  ;;  %v116_v2 = vld [vmem:[#allocation4 + $0x75] sm:$0xff] }
  0x47   :  { %9021 = vmatprep.subr.bf16.mxu0 %v12814_v0  ;;  %v117_v3 = vld [vmem:[#allocation4 + $0x7d] sm:$0xff]  ;;  %v118_v4 = vld [vmem:[#allocation4 + $0x85] sm:$0xff]  ;;  %v119_v5 = vld [vmem:[#allocation4 + $0x8d] sm:$0xff] }
  0x48   :  { %v120_v6 = vld [vmem:[#allocation4 + $0x95] sm:$0xff]  ;;  %v121_v7 = vld [vmem:[#allocation4 + $0x9d] sm:$0xff]  ;;  %v122_v8 = vld [vmem:[#allocation4 + $0xa5] sm:$0xff] }
  0x49   :  { %v123_v9 = vld [vmem:[#allocation4 + $0xad] sm:$0xff]  ;;  %v124_v10 = vld [vmem:[#allocation4 + $0xb5] sm:$0xff]  ;;  %v125_v11 = vld [vmem:[#allocation4 + $0xbd] sm:$0xff] }
  0x4a   :  { %9023 = vmatpush3.bf16.msra.mxu0 %v9022_v16  ;;  %v126_v12 = vld [vmem:[#allocation4 + $0xc5] sm:$0xff]  ;;  %v724_v14 = vld [vmem:[#allocation7 + $0x108] sm:$0xff]  ;;  %v725_v17 = vld [vmem:[#allocation7 + $0x110] sm:$0xff] }
  0x4b   :  { %9024 = vmatprep.subr.bf16.mxu0 %v12814_v0  ;;  %v723_v13 = vld [vmem:[#allocation7 + $0x100] sm:$0xff]  ;;  %v726_v18 = vld [vmem:[#allocation7 + $0x118] sm:$0xff]  ;;  %v392_v23 = vld [vmem:[#allocation4 + $0x16] sm:$0xff] }
  0x4c   :  { %v390_v15 = vld [vmem:[#allocation4 + $0x6] sm:$0xff]  ;;  %v9058_v16 = vpack.c.bf16 %v724_v14, %v723_v13  ;;  %v9061_v20 = vpack.c.bf16 %v726_v18, %v725_v17  ;;  %v393_v27 = vld [vmem:[#allocation4 + $0x1e] sm:$0xff]  ;;  %v732_v30 = vld [vmem:[#allocation7 + $0x148] sm:$0xff] }
  0x4d   :  { %v727_v21 = vld [vmem:[#allocation7 + $0x120] sm:$0xff]  ;;  %v730_v26 = vld [vmem:[#allocation7 + $0x138] sm:$0xff]  ;;  %v736_v38 = vld [vmem:[#allocation7 + $0x168] sm:$0xff] }
  0x4e   :  { %9026 = vmatpush3.bf16.msra.mxu0 %v9025_v19  ;;  %v391_v19 = vld [vmem:[#allocation4 + $0xe] sm:$0xff]  ;;  %v394_v31 = vld [vmem:[#allocation4 + $0x26] sm:$0xff]  ;;  %v396_v39 = vld [vmem:[#allocation4 + $0x36] sm:$0xff] }
  0x4f   :  { %9027 = vmatprep.subr.bf16.mxu0 %v12814_v0  ;;  %v734_v34 = vld [vmem:[#allocation7 + $0x158] sm:$0xff]  ;;  %v395_v35 = vld [vmem:[#allocation4 + $0x2e] sm:$0xff]  ;;  %v400_v47 = vld [vmem:[#allocation4 + $0x56] sm:$0xff] }
  0x50   :  { %v738_v42 = vld [vmem:[#allocation7 + $0x178] sm:$0xff]  ;;  %v399_v46 = vld [vmem:[#allocation4 + $0x4e] sm:$0xff]  ;;  %v404_v51 = vld [vmem:[#allocation4 + $0x76] sm:$0xff] }
  0x51   :  { %v397_v43 = vld [vmem:[#allocation4 + $0x3e] sm:$0xff]  ;;  %v403_v50 = vld [vmem:[#allocation4 + $0x6e] sm:$0xff]  ;;  %v408_v55 = vld [vmem:[#allocation4 + $0x96] sm:$0xff] }
  0x52   :  { %9029 = vmatpush3.bf16.msra.mxu0 %v9028_v22  ;;  %v728_v22 = vld [vmem:[#allocation7 + $0x128] sm:$0xff]  ;;  %v1037_v13 = vld [vmem:[#allocation7 + $0x1b8] sm:$0xff] }
  0x53   :  { %9030 = vmatprep.subr.bf16.mxu0 %v12814_v0  ;;  %v9064_v24 = vpack.c.bf16 %v728_v22, %v727_v21  ;;  %v407_v54 = vld [vmem:[#allocation4 + $0x8e] sm:$0xff]  ;;  %v10670_v14 = vld [vmem:[#allocation4 + $0x1f] sm:$0xff] }
  0x54   :  { %v1039_v17 = vld [vmem:[#allocation7 + $0x1c8] sm:$0xff]  ;;  %v10676_v18 = vld [vmem:[#allocation4 + $0x27] sm:$0xff] }
  0x55   :  { %v1041_v21 = vld [vmem:[#allocation7 + $0x1d8] sm:$0xff]  ;;  %v10682_v22 = vld [vmem:[#allocation4 + $0x2f] sm:$0xff] }
  0x56   :  { %9032 = vmatpush3.bf16.msra.mxu0 %v9031_v25  ;;  %v729_v25 = vld [vmem:[#allocation7 + $0x130] sm:$0xff] }
  0x57   :  { %9033 = vmatprep.subr.bf16.mxu0 %v12814_v0 }
  0x59   :  { %7116 = vmatmul.mubr.f32.vlgmr.msra.gmra.mrb[0].mxu0 %v102_v28  ;;  %v9067_v28 = vpack.c.bf16 %v730_v26, %v729_v25  ;;  %v1043_v25 = vld [vmem:[#allocation7 + $0x1e8] sm:$0xff] }
  0x5a   :  { %9035 = vmatpush3.bf16.msra.mxu0 %v9034_v29  ;;  %7118 = vmatprep.mubr.msk.f32.mxu0 %vm10411_vm0, %v10412_v1  ;;  %v731_v29 = vld [vmem:[#allocation7 + $0x140] sm:$0xff]  ;;  %v10688_v26 = vld [vmem:[#allocation4 + $0x37] sm:$0xff] }
  0x5b   :  { %9036 = vmatprep.subr.bf16.mxu0 %v12814_v0 }
  0x5d   :  { %7119 = vmatmul.mubr.f32.gmra.mrb[2].mxu0 %v103_v32  ;;  %v9070_v32 = vpack.c.bf16 %v732_v30, %v731_v29  ;;  %v1045_v29 = vld [vmem:[#allocation7 + $0x1f8] sm:$0xff] }
  0x5e   :  { %7121 = vmatprep.mubr.msk.f32.mxu0 %vm10411_vm0, %v10412_v1  ;;  %9038 = vmatpush3.bf16.msra.mxu0 %v9037_v33  ;;  %v733_v33 = vld [vmem:[#allocation7 + $0x150] sm:$0xff] }
  0x5f   :  { %9039 = vmatprep.subr.bf16.mxu0 %v12814_v0  ;;  %v10694_v30 = vld [vmem:[#allocation4 + $0x3f] sm:$0xff] }
  0x61   :  { %7122 = vmatmul.mubr.f32.gmra.mrb[4].mxu0 %v104_v36  ;;  %v9073_v36 = vpack.c.bf16 %v734_v34, %v733_v33  ;;  %v10706_v33 = vld [vmem:[#allocation4 + $0x4f] sm:$0xff]  ;;  %v10711_v34 = vld [vmem:[#allocation4 + $0x57] sm:$0xff] }
  0x62   :  { %7124 = vmatprep.mubr.msk.f32.mxu0 %vm10411_vm0, %v10412_v1  ;;  %9041 = vmatpush3.bf16.msra.mxu0 %v9040_v37  ;;  %v735_v37 = vld [vmem:[#allocation7 + $0x160] sm:$0xff] }
  0x63   :  { %9042 = vmatprep.subr.bf16.mxu0 %v12814_v0 }
  0x65   :  { %7125 = vmatmul.mubr.f32.gmra.mrb[6].mxu0 %v105_v40  ;;  %v9076_v40 = vpack.c.bf16 %v736_v38, %v735_v37  ;;  %v10726_v37 = vld [vmem:[#allocation4 + $0x6f] sm:$0xff]  ;;  %v10731_v38 = vld [vmem:[#allocation4 + $0x77] sm:$0xff] }
  0x66   :  { %7127 = vmatprep.mubr.msk.f32.mxu0 %vm10411_vm0, %v10412_v1  ;;  %9044 = vmatpush3.bf16.msra.mxu0 %v9043_v41  ;;  %v737_v41 = vld [vmem:[#allocation7 + $0x170] sm:$0xff] }
  0x67   :  { %9045 = vmatprep.subr.bf16.mxu0 %v12814_v0 }
  0x69   :  { %7128 = vmatmul.mubr.f32.gmra.mrb[8].mxu0 %v106_v44  ;;  %v9079_v44 = vpack.c.bf16 %v738_v42, %v737_v41  ;;  %v10746_v41 = vld [vmem:[#allocation4 + $0x8f] sm:$0xff]  ;;  %v10751_v42 = vld [vmem:[#allocation4 + $0x97] sm:$0xff] }
  0x6a   :  { %7130 = vmatprep.mubr.msk.f32.mxu0 %vm10411_vm0, %v10412_v1  ;;  %9047 = vmatpush3.bf16.msra.mxu0 %v9046_v45  ;;  %v398_v45 = vld [vmem:[#allocation4 + $0x46] sm:$0xff] }
  0x6b   :  { %9048 = vmatprep.subr.bf16.mxu0 %v12814_v0 }
  0x6d   :  { %7131 = vmatmul.mubr.f32.gmra.mrb[10].mxu0 %v107_v48  ;;  %v401_v48 = vld [vmem:[#allocation4 + $0x5e] sm:$0xff] }
  0x6e   :  { %7133 = vmatprep.mubr.msk.f32.mxu0 %vm10411_vm0, %v10412_v1  ;;  %9050 = vmatpush3.bf16.msra.mxu0 %v9049_v49  ;;  %v402_v49 = vld [vmem:[#allocation4 + $0x66] sm:$0xff] }
  0x6f   :  { %9051 = vmatprep.subr.bf16.mxu0 %v12814_v0 }
  0x71   :  { %7134 = vmatmul.mubr.f32.gmra.mrb[12].mxu0 %v108_v52  ;;  %v405_v52 = vld [vmem:[#allocation4 + $0x7e] sm:$0xff] }
  0x72   :  { %7136 = vmatprep.mubr.msk.f32.mxu0 %vm10411_vm0, %v10412_v1  ;;  %9053 = vmatpush3.bf16.msra.mxu0 %v9052_v53  ;;  %v406_v53 = vld [vmem:[#allocation4 + $0x86] sm:$0xff] }
  0x73   :  { %9054 = vmatprep.subr.bf16.mxu0 %v12814_v0 }
  0x75   :  { %7137 = vmatmul.mubr.f32.gmra.mrb[14].mxu0 %v109_v56  ;;  %v409_v56 = vld [vmem:[#allocation4 + $0x9e] sm:$0xff] }
  0x76   :  { %7139 = vmatprep.mubr.msk.f32.mxu0 %vm10411_vm0, %v10412_v1  ;;  %9056 = vmatpush3.bf16.msra.mxu0 %v9055_v57  ;;  %v410_v57 = vld [vmem:[#allocation4 + $0xa6] sm:$0xff] }
  0x77   :  { %9057 = vmatprep.subr.bf16.mxu0 %v12814_v0 }
  0x79   :  { %7140 = vmatmul.mubr.f32.gmra.mrb[16].mxu0 %v110_v58  ;;  %v411_v58 = vld [vmem:[#allocation4 + $0xae] sm:$0xff] }
  0x7a   :  { %7142 = vmatprep.mubr.msk.f32.mxu0 %vm10411_vm0, %v10412_v1 }
  0x7d   :  { %7143 = vmatmul.mubr.f32.gmra.mrb[18].mxu0 %v111_v59  ;;  %v412_v59 = vld [vmem:[#allocation4 + $0xb6] sm:$0xff] }
  0x7e   :  { %7145 = vmatprep.mubr.msk.f32.mxu0 %vm10411_vm0, %v10412_v1 }
  0x81   :  { %7146 = vmatmul.mubr.f32.gmra.mrb[20].mxu0 %v112_v60  ;;  %v413_v60 = vld [vmem:[#allocation4 + $0xbe] sm:$0xff] }
  0x82   :  { %7148 = vmatprep.mubr.msk.f32.mxu0 %vm10411_vm0, %v10412_v1 }
  0x85   :  { %7149 = vmatmul.mubr.f32.gmra.mrb[22].mxu0 %v113_v61  ;;  %v414_v61 = vld [vmem:[#allocation4 + $0xc6] sm:$0xff] }
  0x86   :  { %7151 = vmatprep.mubr.msk.f32.mxu0 %vm10411_vm0, %v10412_v1 }
  0x89   :  { %7152 = vmatmul.mubr.f32.gmra.mrb[24].mxu0 %v114_v62  ;;  %v1030_v62 = vld [vmem:[#allocation7 + $0x180] sm:$0xff] }
  0x8a   :  { %7154 = vmatprep.mubr.msk.f32.mxu0 %vm10411_vm0, %v10412_v1 }
  0x8d   :  { %7155 = vmatmul.mubr.f32.gmra.mrb[26].mxu0 %v115_v63  ;;  %v1031_v63 = vld [vmem:[#allocation7 + $0x188] sm:$0xff] }
  0x8e   :  { %7157 = vmatprep.mubr.msk.f32.mxu0 %vm10411_vm0, %v10412_v1 }
  0x91   :  { %7158 = vmatmul.mubr.f32.gmra.mrb[28].mxu0 %v116_v2  ;;  %v697_v2 = vld [vmem:[#allocation4 + $0x7] sm:$0xff] }
  0x92   :  { %7160 = vmatprep.mubr.msk.f32.mxu0 %vm10411_vm0, %v10412_v1 }
  0x95   :  { %7161 = vmatmul.mubr.f32.gmra.mrb[30].mxu0 %v117_v3  ;;  %v9082_v3 = vpack.c.bf16 %v1031_v63, %v1030_v62  ;;  %v1346_v62 = vld [vmem:[#allocation7 + $0x248] sm:$0xff] }
  0x96   :  { %7163 = vmatprep.mubr.msk.f32.mxu0 %vm10411_vm0, %v10412_v1 }
  0x99   :  { %7164 = vmatmul.mubr.f32.gmra.mrb[32].mxu0 %v118_v4  ;;  %v1032_v4 = vld [vmem:[#allocation7 + $0x190] sm:$0xff] }
  0x9a   :  { %7166 = vmatprep.mubr.msk.f32.mxu0 %vm10411_vm0, %v10412_v1 }
  0x9d   :  { %7167 = vmatmul.mubr.f32.gmra.mrb[34].mxu0 %v119_v5  ;;  %v1033_v5 = vld [vmem:[#allocation7 + $0x198] sm:$0xff] }
  0x9e   :  { %7169 = vmatprep.mubr.msk.f32.mxu0 %vm10411_vm0, %v10412_v1 }
  0xa1   :  { %7170 = vmatmul.mubr.f32.gmra.mrb[36].mxu0 %v120_v6  ;;  %v10658_v6 = vld [vmem:[#allocation4 + $0xf] sm:$0xff] }
  0xa2   :  { %7172 = vmatprep.mubr.msk.f32.mxu0 %vm10411_vm0, %v10412_v1 }
  0xa5   :  { %7173 = vmatmul.mubr.f32.gmra.mrb[38].mxu0 %v121_v7  ;;  %v9085_v7 = vpack.c.bf16 %v1033_v5, %v1032_v4  ;;  %v1349_v5 = vld [vmem:[#allocation7 + $0x260] sm:$0xff] }
  0xa6   :  { %7175 = vmatprep.mubr.msk.f32.mxu0 %vm10411_vm0, %v10412_v1 }
  0xa9   :  { %7176 = vmatmul.mubr.f32.gmra.mrb[40].mxu0 %v122_v8  ;;  %v1034_v8 = vld [vmem:[#allocation7 + $0x1a0] sm:$0xff] }
  0xaa   :  { %7178 = vmatprep.mubr.msk.f32.mxu0 %vm10411_vm0, %v10412_v1 }
  0xad   :  { %7179 = vmatmul.mubr.f32.gmra.mrb[42].mxu0 %v123_v9  ;;  %v1035_v9 = vld [vmem:[#allocation7 + $0x1a8] sm:$0xff] }
  0xae   :  { %7181 = vmatprep.mubr.msk.f32.mxu0 %vm10411_vm0, %v10412_v1 }
  0xb1   :  { %7182 = vmatmul.mubr.f32.gmra.mrb[44].mxu0 %v124_v10  ;;  %v10664_v10 = vld [vmem:[#allocation4 + $0x17] sm:$0xff] }
  0xb2   :  { %7184 = vmatprep.mubr.msk.f32.mxu0 %vm10411_vm0, %v10412_v1 }
  0xb5   :  { %7185 = vmatmul.mubr.f32.gmra.mrb[46].mxu0 %v125_v11  ;;  %v9088_v11 = vpack.c.bf16 %v1035_v9, %v1034_v8  ;;  %v1351_v8 = vld [vmem:[#allocation7 + $0x270] sm:$0xff]  ;;  %v1352_v9 = vld [vmem:[#allocation7 + $0x278] sm:$0xff] }
  0xb6   :  { %7187 = vmatprep.mubr.msk.f32.mxu0 %vm10411_vm0, %v10412_v1 }
  0xb9   :  { %7188 = vmatmul.mubr.f32.gmra.mrb[48].mxu0 %v126_v12  ;;  %v1036_v12 = vld [vmem:[#allocation7 + $0x1b0] sm:$0xff] }
  0xba   :  { %7222 = vmatprep.mubr.msk.f32.mxu0 %vm10411_vm0, %v10412_v1 }
  0xbd   :  { %7223 = vmatmul.mubr.f32.vlgmr.msra.gmra.mrb[0].mxu0 %v390_v15  ;;  %v9091_v15 = vpack.c.bf16 %v1037_v13, %v1036_v12  ;;  %v1644_v12 = vld [vmem:[#allocation7 + $0x280] sm:$0xff]  ;;  %v1645_v13 = vld [vmem:[#allocation7 + $0x288] sm:$0xff] }
  0xbe   :  { %9059 = vmatpush3.bf16.msra.mxu0 %v9058_v16  ;;  %7225 = vmatprep.mubr.msk.f32.mxu0 %vm10411_vm0, %v10412_v1  ;;  %v1038_v16 = vld [vmem:[#allocation7 + $0x1c0] sm:$0xff] }
  0xbf   :  { %9060 = vmatprep.subr.bf16.mxu0 %v12814_v0 }
  0xc1   :  { %7226 = vmatmul.mubr.f32.gmra.mrb[2].mxu0 %v391_v19  ;;  %v9094_v19 = vpack.c.bf16 %v1039_v17, %v1038_v16  ;;  %v1646_v16 = vld [vmem:[#allocation7 + $0x290] sm:$0xff]  ;;  %v1647_v17 = vld [vmem:[#allocation7 + $0x298] sm:$0xff] }
  0xc2   :  { %7228 = vmatprep.mubr.msk.f32.mxu0 %vm10411_vm0, %v10412_v1  ;;  %9062 = vmatpush3.bf16.msra.mxu0 %v9061_v20  ;;  %v1040_v20 = vld [vmem:[#allocation7 + $0x1d0] sm:$0xff] }
  0xc3   :  { %9063 = vmatprep.subr.bf16.mxu0 %v12814_v0 }
  0xc5   :  { %7229 = vmatmul.mubr.f32.gmra.mrb[4].mxu0 %v392_v23  ;;  %v9097_v23 = vpack.c.bf16 %v1041_v21, %v1040_v20  ;;  %v1648_v20 = vld [vmem:[#allocation7 + $0x2a0] sm:$0xff]  ;;  %v1649_v21 = vld [vmem:[#allocation7 + $0x2a8] sm:$0xff] }
  0xc6   :  { %7231 = vmatprep.mubr.msk.f32.mxu0 %vm10411_vm0, %v10412_v1  ;;  %9065 = vmatpush3.bf16.msra.mxu0 %v9064_v24  ;;  %v1042_v24 = vld [vmem:[#allocation7 + $0x1e0] sm:$0xff] }
  0xc7   :  { %9066 = vmatprep.subr.bf16.mxu0 %v12814_v0 }
  0xc9   :  { %7232 = vmatmul.mubr.f32.gmra.mrb[6].mxu0 %v393_v27  ;;  %v9100_v27 = vpack.c.bf16 %v1043_v25, %v1042_v24  ;;  %v1650_v24 = vld [vmem:[#allocation7 + $0x2b0] sm:$0xff]  ;;  %v1651_v25 = vld [vmem:[#allocation7 + $0x2b8] sm:$0xff] }
  0xca   :  { %7234 = vmatprep.mubr.msk.f32.mxu0 %vm10411_vm0, %v10412_v1  ;;  %9068 = vmatpush3.bf16.msra.mxu0 %v9067_v28  ;;  %v1044_v28 = vld [vmem:[#allocation7 + $0x1f0] sm:$0xff] }
  0xcb   :  { %9069 = vmatprep.subr.bf16.mxu0 %v12814_v0 }
  0xcd   :  { %7235 = vmatmul.mubr.f32.gmra.mrb[8].mxu0 %v394_v31  ;;  %v9103_v31 = vpack.c.bf16 %v1045_v29, %v1044_v28  ;;  %v1652_v28 = vld [vmem:[#allocation7 + $0x2c0] sm:$0xff]  ;;  %v1653_v29 = vld [vmem:[#allocation7 + $0x2c8] sm:$0xff] }
  0xce   :  { %7237 = vmatprep.mubr.msk.f32.mxu0 %vm10411_vm0, %v10412_v1  ;;  %9071 = vmatpush3.bf16.msra.mxu0 %v9070_v32  ;;  %v10700_v32 = vld [vmem:[#allocation4 + $0x47] sm:$0xff] }
  0xcf   :  { %9072 = vmatprep.subr.bf16.mxu0 %v12814_v0 }
  0xd1   :  { %7238 = vmatmul.mubr.f32.gmra.mrb[10].mxu0 %v395_v35  ;;  %v10716_v35 = vld [vmem:[#allocation4 + $0x5f] sm:$0xff] }
  0xd2   :  { %7240 = vmatprep.mubr.msk.f32.mxu0 %vm10411_vm0, %v10412_v1  ;;  %9074 = vmatpush3.bf16.msra.mxu0 %v9073_v36  ;;  %v10721_v36 = vld [vmem:[#allocation4 + $0x67] sm:$0xff] }
  0xd3   :  { %9075 = vmatprep.subr.bf16.mxu0 %v12814_v0 }
  0xd5   :  { %7241 = vmatmul.mubr.f32.gmra.mrb[12].mxu0 %v396_v39  ;;  %v10736_v39 = vld [vmem:[#allocation4 + $0x7f] sm:$0xff] }
  0xd6   :  { %7243 = vmatprep.mubr.msk.f32.mxu0 %vm10411_vm0, %v10412_v1  ;;  %9077 = vmatpush3.bf16.msra.mxu0 %v9076_v40  ;;  %v10741_v40 = vld [vmem:[#allocation4 + $0x87] sm:$0xff] }
  0xd7   :  { %9078 = vmatprep.subr.bf16.mxu0 %v12814_v0 }
  0xd9   :  { %7244 = vmatmul.mubr.f32.gmra.mrb[14].mxu0 %v397_v43  ;;  %v10756_v43 = vld [vmem:[#allocation4 + $0x9f] sm:$0xff] }
  0xda   :  { %7246 = vmatprep.mubr.msk.f32.mxu0 %vm10411_vm0, %v10412_v1  ;;  %9080 = vmatpush3.bf16.msra.mxu0 %v9079_v44  ;;  %v10761_v44 = vld [vmem:[#allocation4 + $0xa7] sm:$0xff] }
  0xdb   :  { %9081 = vmatprep.subr.bf16.mxu0 %v12814_v0 }
  0xdd   :  { %7247 = vmatmul.mubr.f32.gmra.mrb[16].mxu0 %v398_v45  ;;  %v10766_v45 = vld [vmem:[#allocation4 + $0xaf] sm:$0xff] }
  0xde   :  { %7249 = vmatprep.mubr.msk.f32.mxu0 %vm10411_vm0, %v10412_v1 }
  0xe1   :  { %7250 = vmatmul.mubr.f32.gmra.mrb[18].mxu0 %v399_v46  ;;  %v10771_v46 = vld [vmem:[#allocation4 + $0xb7] sm:$0xff] }
  0xe2   :  { %7252 = vmatprep.mubr.msk.f32.mxu0 %vm10411_vm0, %v10412_v1 }
  0xe5   :  { %7253 = vmatmul.mubr.f32.gmra.mrb[20].mxu0 %v400_v47  ;;  %v10776_v47 = vld [vmem:[#allocation4 + $0xbf] sm:$0xff] }
  0xe6   :  { %7255 = vmatprep.mubr.msk.f32.mxu0 %vm10411_vm0, %v10412_v1 }
  0xe9   :  { %7256 = vmatmul.mubr.f32.gmra.mrb[22].mxu0 %v401_v48  ;;  %v10781_v48 = vld [vmem:[#allocation4 + $0xc7] sm:$0xff] }
  0xea   :  { %7258 = vmatprep.mubr.msk.f32.mxu0 %vm10411_vm0, %v10412_v1 }
  0xed   :  { %7259 = vmatmul.mubr.f32.gmra.mrb[24].mxu0 %v402_v49  ;;  %v1337_v49 = vld [vmem:[#allocation7 + $0x200] sm:$0xff] }
  0xee   :  { %7261 = vmatprep.mubr.msk.f32.mxu0 %vm10411_vm0, %v10412_v1 }
  0xf1   :  { %7262 = vmatmul.mubr.f32.gmra.mrb[26].mxu0 %v403_v50  ;;  %v1338_v50 = vld [vmem:[#allocation7 + $0x208] sm:$0xff] }
  0xf2   :  { %7264 = vmatprep.mubr.msk.f32.mxu0 %vm10411_vm0, %v10412_v1 }
  0xf5   :  { %7265 = vmatmul.mubr.f32.gmra.mrb[28].mxu0 %v404_v51  ;;  %v9106_v51 = vpack.c.bf16 %v1338_v50, %v1337_v49  ;;  %v1324_v49 = vld [vmem:[#allocation4 + $0x78] sm:$0xff]  ;;  %v1325_v50 = vld [vmem:[#allocation4 + $0x80] sm:$0xff] }
  0xf6   :  { %7267 = vmatprep.mubr.msk.f32.mxu0 %vm10411_vm0, %v10412_v1 }
  0xf9   :  { %7268 = vmatmul.mubr.f32.gmra.mrb[30].mxu0 %v405_v52  ;;  %v1339_v52 = vld [vmem:[#allocation7 + $0x210] sm:$0xff] }
  0xfa   :  { %7270 = vmatprep.mubr.msk.f32.mxu0 %vm10411_vm0, %v10412_v1 }
  0xfd   :  { %7271 = vmatmul.mubr.f32.gmra.mrb[32].mxu0 %v406_v53  ;;  %v1340_v53 = vld [vmem:[#allocation7 + $0x218] sm:$0xff] }
  0xfe   :  { %7273 = vmatprep.mubr.msk.f32.mxu0 %vm10411_vm0, %v10412_v1 }
 0x101   :  { %7274 = vmatmul.mubr.f32.gmra.mrb[34].mxu0 %v407_v54  ;;  %v9109_v54 = vpack.c.bf16 %v1340_v53, %v1339_v52  ;;  %v1327_v52 = vld [vmem:[#allocation4 + $0x90] sm:$0xff]  ;;  %v1328_v53 = vld [vmem:[#allocation4 + $0x98] sm:$0xff] }
 0x102   :  { %7276 = vmatprep.mubr.msk.f32.mxu0 %vm10411_vm0, %v10412_v1 }
 0x105   :  { %7277 = vmatmul.mubr.f32.gmra.mrb[36].mxu0 %v408_v55  ;;  %v1341_v55 = vld [vmem:[#allocation7 + $0x220] sm:$0xff] }
 0x106   :  { %7279 = vmatprep.mubr.msk.f32.mxu0 %vm10411_vm0, %v10412_v1 }
 0x109   :  { %7280 = vmatmul.mubr.f32.gmra.mrb[38].mxu0 %v409_v56  ;;  %v1342_v56 = vld [vmem:[#allocation7 + $0x228] sm:$0xff] }
 0x10a   :  { %7282 = vmatprep.mubr.msk.f32.mxu0 %vm10411_vm0, %v10412_v1 }
 0x10d   :  { %7283 = vmatmul.mubr.f32.gmra.mrb[40].mxu0 %v410_v57  ;;  %v9112_v57 = vpack.c.bf16 %v1342_v56, %v1341_v55  ;;  %v1330_v55 = vld [vmem:[#allocation4 + $0xa8] sm:$0xff]  ;;  %v1331_v56 = vld [vmem:[#allocation4 + $0xb0] sm:$0xff] }
 0x10e   :  { %7285 = vmatprep.mubr.msk.f32.mxu0 %vm10411_vm0, %v10412_v1 }
 0x111   :  { %7286 = vmatmul.mubr.f32.gmra.mrb[42].mxu0 %v411_v58  ;;  %v1343_v58 = vld [vmem:[#allocation7 + $0x230] sm:$0xff] }
 0x112   :  { %7288 = vmatprep.mubr.msk.f32.mxu0 %vm10411_vm0, %v10412_v1 }
 0x115   :  { %7289 = vmatmul.mubr.f32.gmra.mrb[44].mxu0 %v412_v59  ;;  %v1344_v59 = vld [vmem:[#allocation7 + $0x238] sm:$0xff] }
 0x116   :  { %7291 = vmatprep.mubr.msk.f32.mxu0 %vm10411_vm0, %v10412_v1 }
 0x119   :  { %7292 = vmatmul.mubr.f32.gmra.mrb[46].mxu0 %v413_v60  ;;  %v9115_v60 = vpack.c.bf16 %v1344_v59, %v1343_v58  ;;  %v1333_v58 = vld [vmem:[#allocation4 + $0xc0] sm:$0xff]  ;;  %v1334_v59 = vld [vmem:[#allocation4 + $0xc8] sm:$0xff] }
 0x11a   :  { %7294 = vmatprep.mubr.msk.f32.mxu0 %vm10411_vm0, %v10412_v1 }
 0x11d   :  { %7295 = vmatmul.mubr.f32.gmra.mrb[48].mxu0 %v414_v61  ;;  %v1345_v61 = vld [vmem:[#allocation7 + $0x240] sm:$0xff] }
 0x11e   :  { %7329 = vmatprep.mubr.msk.f32.mxu0 %vm10411_vm0, %v10412_v1  ;;  %v9118_v63 = vpack.c.bf16 %v1346_v62, %v1345_v61  ;;  %v1951_v61 = vld [vmem:[#allocation7 + $0x300] sm:$0xff]  ;;  %v1952_v62 = vld [vmem:[#allocation7 + $0x308] sm:$0xff] }
 0x121   :  { %7330 = vmatmul.mubr.f32.vlgmr.msra.gmra.mrb[0].mxu0 %v697_v2  ;;  %v1347_v2 = vld [vmem:[#allocation7 + $0x250] sm:$0xff] }
 0x122   :  { %9083 = vmatpush3.bf16.msra.mxu0 %v9082_v3  ;;  %7332 = vmatprep.mubr.msk.f32.mxu0 %vm10411_vm0, %v10412_v1  ;;  %v1348_v3 = vld [vmem:[#allocation7 + $0x258] sm:$0xff] }
 0x123   :  { %9084 = vmatprep.subr.bf16.mxu0 %v12814_v0  ;;  %v9121_v4 = vpack.c.bf16 %v1348_v3, %v1347_v2  ;;  %v9154_v2 = vpack.c.bf16 %v1952_v62, %v1951_v61  ;;  %v1953_v3 = vld [vmem:[#allocation7 + $0x310] sm:$0xff]  ;;  %v2267_v61 = vld [vmem:[#allocation7 + $0x3c8] sm:$0xff] }
 0x125   :  { %7333 = vmatmul.mubr.f32.gmra.mrb[2].mxu0 %v10658_v6 }
 0x126   :  { %7335 = vmatprep.mubr.msk.f32.mxu0 %vm10411_vm0, %v10412_v1  ;;  %9086 = vmatpush3.bf16.msra.mxu0 %v9085_v7 }
 0x127   :  { %9087 = vmatprep.subr.bf16.mxu0 %v12814_v0 }
 0x129   :  { %7336 = vmatmul.mubr.f32.gmra.mrb[4].mxu0 %v10664_v10 }
 0x12a   :  { %7338 = vmatprep.mubr.msk.f32.mxu0 %vm10411_vm0, %v10412_v1  ;;  %9089 = vmatpush3.bf16.msra.mxu0 %v9088_v11  ;;  %v1028_v11 = vld [vmem:[#allocation4 + $0xcf] sm:$0xff] }
 0x12b   :  { %9090 = vmatprep.subr.bf16.mxu0 %v12814_v0 }
 0x12d   :  { %7339 = vmatmul.mubr.f32.gmra.mrb[6].mxu0 %v10670_v14 }
 0x12e   :  { %7341 = vmatprep.mubr.msk.f32.mxu0 %vm10411_vm0, %v10412_v1  ;;  %9092 = vmatpush3.bf16.msra.mxu0 %v9091_v15  ;;  %v9130_v15 = vpack.c.bf16 %v1645_v13, %v1644_v12  ;;  %v1958_v12 = vld [vmem:[#allocation7 + $0x338] sm:$0xff]  ;;  %v10942_v13 = vld [vmem:[#allocation4 + $0x29] sm:$0xff] }
 0x12f   :  { %9093 = vmatprep.subr.bf16.mxu0 %v12814_v0 }
 0x131   :  { %7342 = vmatmul.mubr.f32.gmra.mrb[8].mxu0 %v10676_v18 }
 0x132   :  { %7344 = vmatprep.mubr.msk.f32.mxu0 %vm10411_vm0, %v10412_v1  ;;  %9095 = vmatpush3.bf16.msra.mxu0 %v9094_v19  ;;  %v9133_v19 = vpack.c.bf16 %v1647_v17, %v1646_v16  ;;  %v1960_v16 = vld [vmem:[#allocation7 + $0x348] sm:$0xff] }
 0x133   :  { %9096 = vmatprep.subr.bf16.mxu0 %v12814_v0  ;;  %v10948_v17 = vld [vmem:[#allocation4 + $0x31] sm:$0xff] }
 0x135   :  { %7345 = vmatmul.mubr.f32.gmra.mrb[10].mxu0 %v10682_v22 }
 0x136   :  { %7347 = vmatprep.mubr.msk.f32.mxu0 %vm10411_vm0, %v10412_v1  ;;  %9098 = vmatpush3.bf16.msra.mxu0 %v9097_v23  ;;  %v9136_v23 = vpack.c.bf16 %v1649_v21, %v1648_v20  ;;  %v1962_v20 = vld [vmem:[#allocation7 + $0x358] sm:$0xff] }
 0x137   :  { %9099 = vmatprep.subr.bf16.mxu0 %v12814_v0  ;;  %v10954_v21 = vld [vmem:[#allocation4 + $0x39] sm:$0xff] }
 0x139   :  { %7348 = vmatmul.mubr.f32.gmra.mrb[12].mxu0 %v10688_v26 }
 0x13a   :  { %7350 = vmatprep.mubr.msk.f32.mxu0 %vm10411_vm0, %v10412_v1  ;;  %9101 = vmatpush3.bf16.msra.mxu0 %v9100_v27  ;;  %v9139_v27 = vpack.c.bf16 %v1651_v25, %v1650_v24  ;;  %v1964_v24 = vld [vmem:[#allocation7 + $0x368] sm:$0xff]  ;;  %v10960_v25 = vld [vmem:[#allocation4 + $0x41] sm:$0xff] }
 0x13b   :  { %9102 = vmatprep.subr.bf16.mxu0 %v12814_v0 }
 0x13d   :  { %7351 = vmatmul.mubr.f32.gmra.mrb[14].mxu0 %v10694_v30 }
 0x13e   :  { %7353 = vmatprep.mubr.msk.f32.mxu0 %vm10411_vm0, %v10412_v1  ;;  %9104 = vmatpush3.bf16.msra.mxu0 %v9103_v31  ;;  %v1315_v31 = vld [vmem:[#allocation4 + $0x30] sm:$0xff] }
 0x13f   :  { %9105 = vmatprep.subr.bf16.mxu0 %v12814_v0 }
 0x141   :  { %7354 = vmatmul.mubr.f32.gmra.mrb[16].mxu0 %v10700_v32 }
 0x142   :  { %7356 = vmatprep.mubr.msk.f32.mxu0 %vm10411_vm0, %v10412_v1 }
 0x145   :  { %7357 = vmatmul.mubr.f32.gmra.mrb[18].mxu0 %v10706_v33 }
 0x146   :  { %7359 = vmatprep.mubr.msk.f32.mxu0 %vm10411_vm0, %v10412_v1 }
 0x149   :  { %7360 = vmatmul.mubr.f32.gmra.mrb[20].mxu0 %v10711_v34 }
 0x14a   :  { %7362 = vmatprep.mubr.msk.f32.mxu0 %vm10411_vm0, %v10412_v1 }
 0x14d   :  { %7363 = vmatmul.mubr.f32.gmra.mrb[22].mxu0 %v10716_v35 }
 0x14e   :  { %7365 = vmatprep.mubr.msk.f32.mxu0 %vm10411_vm0, %v10412_v1 }
 0x151   :  { %7366 = vmatmul.mubr.f32.gmra.mrb[24].mxu0 %v10721_v36 }
 0x152   :  { %7368 = vmatprep.mubr.msk.f32.mxu0 %vm10411_vm0, %v10412_v1 }
 0x155   :  { %7369 = vmatmul.mubr.f32.gmra.mrb[26].mxu0 %v10726_v37 }
 0x156   :  { %7371 = vmatprep.mubr.msk.f32.mxu0 %vm10411_vm0, %v10412_v1 }
 0x159   :  { %7372 = vmatmul.mubr.f32.gmra.mrb[28].mxu0 %v10731_v38 }
 0x15a   :  { %7374 = vmatprep.mubr.msk.f32.mxu0 %vm10411_vm0, %v10412_v1 }
 0x15d   :  { %7375 = vmatmul.mubr.f32.gmra.mrb[30].mxu0 %v10736_v39 }
 0x15e   :  { %7377 = vmatprep.mubr.msk.f32.mxu0 %vm10411_vm0, %v10412_v1 }
 0x161   :  { %7378 = vmatmul.mubr.f32.gmra.mrb[32].mxu0 %v10741_v40 }
 0x162   :  { %7380 = vmatprep.mubr.msk.f32.mxu0 %vm10411_vm0, %v10412_v1 }
 0x165   :  { %7381 = vmatmul.mubr.f32.gmra.mrb[34].mxu0 %v10746_v41 }
 0x166   :  { %7383 = vmatprep.mubr.msk.f32.mxu0 %vm10411_vm0, %v10412_v1 }
 0x169   :  { %7384 = vmatmul.mubr.f32.gmra.mrb[36].mxu0 %v10751_v42 }
 0x16a   :  { %7386 = vmatprep.mubr.msk.f32.mxu0 %vm10411_vm0, %v10412_v1 }
 0x16d   :  { %7387 = vmatmul.mubr.f32.gmra.mrb[38].mxu0 %v10756_v43 }
 0x16e   :  { %7389 = vmatprep.mubr.msk.f32.mxu0 %vm10411_vm0, %v10412_v1 }
 0x171   :  { %7390 = vmatmul.mubr.f32.gmra.mrb[40].mxu0 %v10761_v44 }
 0x172   :  { %7392 = vmatprep.mubr.msk.f32.mxu0 %vm10411_vm0, %v10412_v1 }
 0x175   :  { %7393 = vmatmul.mubr.f32.gmra.mrb[42].mxu0 %v10766_v45 }
 0x176   :  { %7395 = vmatprep.mubr.msk.f32.mxu0 %vm10411_vm0, %v10412_v1 }
 0x179   :  { %7396 = vmatmul.mubr.f32.gmra.mrb[44].mxu0 %v10771_v46 }
 0x17a   :  { %7398 = vmatprep.mubr.msk.f32.mxu0 %vm10411_vm0, %v10412_v1 }
 0x17d   :  { %7399 = vmatmul.mubr.f32.gmra.mrb[46].mxu0 %v10776_v47 }
 0x17e   :  { %7401 = vmatprep.mubr.msk.f32.mxu0 %vm10411_vm0, %v10412_v1 }
 0x181   :  { %7402 = vmatmul.mubr.f32.gmra.mrb[48].mxu0 %v10781_v48 }
 0x182   :  { %7436 = vmatprep.mubr.msk.f32.mxu0 %vm10411_vm0, %v10412_v1 }
 0x185   :  { %7437 = vmatmul.mubr.f32.vlgmr.msra.gmra.mrb[0].mxu0 %v10658_v6  ;;  %v1350_v6 = vld [vmem:[#allocation7 + $0x268] sm:$0xff] }
 0x186   :  { %9107 = vmatpush3.bf16.msra.mxu0 %v9106_v51  ;;  %7439 = vmatprep.mubr.msk.f32.mxu0 %vm10411_vm0, %v10412_v1  ;;  %v9124_v7 = vpack.c.bf16 %v1350_v6, %v1349_v5  ;;  %v1326_v51 = vld [vmem:[#allocation4 + $0x88] sm:$0xff]  ;;  %v10930_v5 = vld [vmem:[#allocation4 + $0x19] sm:$0xff] }
 0x187   :  { %9108 = vmatprep.subr.bf16.mxu0 %v12814_v0 }
 0x189   :  { %7440 = vmatmul.mubr.f32.gmra.mrb[2].mxu0 %v10664_v10  ;;  %v9127_v10 = vpack.c.bf16 %v1352_v9, %v1351_v8  ;;  %v1956_v8 = vld [vmem:[#allocation7 + $0x328] sm:$0xff]  ;;  %v10936_v9 = vld [vmem:[#allocation4 + $0x21] sm:$0xff] }
 0x18a   :  { %7442 = vmatprep.mubr.msk.f32.mxu0 %vm10411_vm0, %v10412_v1  ;;  %9110 = vmatpush3.bf16.msra.mxu0 %v9109_v54  ;;  %v1329_v54 = vld [vmem:[#allocation4 + $0xa0] sm:$0xff] }
 0x18b   :  { %9111 = vmatprep.subr.bf16.mxu0 %v12814_v0 }
 0x18d   :  { %7443 = vmatmul.mubr.f32.gmra.mrb[4].mxu0 %v10670_v14  ;;  %v1311_v14 = vld [vmem:[#allocation4 + $0x10] sm:$0xff] }
 0x18e   :  { %7445 = vmatprep.mubr.msk.f32.mxu0 %vm10411_vm0, %v10412_v1  ;;  %9113 = vmatpush3.bf16.msra.mxu0 %v9112_v57  ;;  %v1332_v57 = vld [vmem:[#allocation4 + $0xb8] sm:$0xff] }
 0x18f   :  { %9114 = vmatprep.subr.bf16.mxu0 %v12814_v0 }
 0x191   :  { %7446 = vmatmul.mubr.f32.gmra.mrb[6].mxu0 %v10676_v18  ;;  %v1312_v18 = vld [vmem:[#allocation4 + $0x18] sm:$0xff] }
 0x192   :  { %7448 = vmatprep.mubr.msk.f32.mxu0 %vm10411_vm0, %v10412_v1  ;;  %9116 = vmatpush3.bf16.msra.mxu0 %v9115_v60  ;;  %v1335_v60 = vld [vmem:[#allocation4 + $0xd0] sm:$0xff] }
 0x193   :  { %9117 = vmatprep.subr.bf16.mxu0 %v12814_v0 }
 0x195   :  { %7449 = vmatmul.mubr.f32.gmra.mrb[8].mxu0 %v10682_v22  ;;  %v1313_v22 = vld [vmem:[#allocation4 + $0x20] sm:$0xff] }
 0x196   :  { %7451 = vmatprep.mubr.msk.f32.mxu0 %vm10411_vm0, %v10412_v1  ;;  %9119 = vmatpush3.bf16.msra.mxu0 %v9118_v63  ;;  %v1618_v63 = vld [vmem:[#allocation4 + $0x11] sm:$0xff] }
 0x197   :  { %9120 = vmatprep.subr.bf16.mxu0 %v12814_v0 }
 0x199   :  { %7452 = vmatmul.mubr.f32.gmra.mrb[10].mxu0 %v10688_v26  ;;  %v1314_v26 = vld [vmem:[#allocation4 + $0x28] sm:$0xff] }
 0x19a   :  { %7454 = vmatprep.mubr.msk.f32.mxu0 %vm10411_vm0, %v10412_v1  ;;  %9122 = vmatpush3.bf16.msra.mxu0 %v9121_v4  ;;  %v1954_v4 = vld [vmem:[#allocation7 + $0x318] sm:$0xff] }
 0x19b   :  { %9123 = vmatprep.subr.bf16.mxu0 %v12814_v0  ;;  %v9157_v6 = vpack.c.bf16 %v1954_v4, %v1953_v3  ;;  %v2270_v4 = vld [vmem:[#allocation7 + $0x3e0] sm:$0xff] }
 0x19d   :  { %7455 = vmatmul.mubr.f32.gmra.mrb[12].mxu0 %v10694_v30  ;;  %v10877_v30 = vld [vmem:[#allocation2] sm:$0xff] }
 0x19e   :  { %7457 = vmatprep.mubr.msk.f32.mxu0 %vm10411_vm0, %v10412_v1  ;;  %9125 = vmatpush3.bf16.msra.mxu0 %v9124_v7  ;;  %v1955_v7 = vld [vmem:[#allocation7 + $0x320] sm:$0xff] }
 0x19f   :  { %9126 = vmatprep.subr.bf16.mxu0 %v12814_v0 }
 0x1a1   :  { %7458 = vmatmul.mubr.f32.gmra.mrb[14].mxu0 %v10700_v32  ;;  %v9142_v32 = vpack.c.bf16 %v1653_v29, %v1652_v28  ;;  %v1966_v28 = vld [vmem:[#allocation7 + $0x378] sm:$0xff]  ;;  %v10966_v29 = vld [vmem:[#allocation4 + $0x49] sm:$0xff] }
 0x1a2   :  { %7460 = vmatprep.mubr.msk.f32.mxu0 %vm10411_vm0, %v10412_v1  ;;  %9128 = vmatpush3.bf16.msra.mxu0 %v9127_v10  ;;  %v9160_v10 = vpack.c.bf16 %v1956_v8, %v1955_v7  ;;  %v2272_v7 = vld [vmem:[#allocation7 + $0x3f0] sm:$0xff]  ;;  %v2273_v8 = vld [vmem:[#allocation7 + $0x3f8] sm:$0xff] }
 0x1a3   :  { %9129 = vmatprep.subr.bf16.mxu0 %v12814_v0 }
 0x1a5   :  { %7461 = vmatmul.mubr.f32.gmra.mrb[16].mxu0 %v10706_v33  ;;  %v1654_v33 = vld [vmem:[#allocation7 + $0x2d0] sm:$0xff] }
 0x1a6   :  { %7463 = vmatprep.mubr.msk.f32.mxu0 %vm10411_vm0, %v10412_v1 }
 0x1a9   :  { %7464 = vmatmul.mubr.f32.gmra.mrb[18].mxu0 %v10711_v34  ;;  %v1316_v34 = vld [vmem:[#allocation4 + $0x38] sm:$0xff] }
 0x1aa   :  { %7466 = vmatprep.mubr.msk.f32.mxu0 %vm10411_vm0, %v10412_v1 }
 0x1ad   :  { %7467 = vmatmul.mubr.f32.gmra.mrb[20].mxu0 %v10716_v35 }
 0x1ae   :  { %7469 = vmatprep.mubr.msk.f32.mxu0 %vm10411_vm0, %v10412_v1 }
 0x1b1   :  { %7470 = vmatmul.mubr.f32.gmra.mrb[22].mxu0 %v10721_v36  ;;  %v1656_v36 = vld [vmem:[#allocation7 + $0x2e0] sm:$0xff] }
 0x1b2   :  { %7472 = vmatprep.mubr.msk.f32.mxu0 %vm10411_vm0, %v10412_v1 }
 0x1b5   :  { %7473 = vmatmul.mubr.f32.gmra.mrb[24].mxu0 %v10726_v37  ;;  %v1657_v37 = vld [vmem:[#allocation7 + $0x2e8] sm:$0xff] }
 0x1b6   :  { %7475 = vmatprep.mubr.msk.f32.mxu0 %vm10411_vm0, %v10412_v1 }
 0x1b9   :  { %7476 = vmatmul.mubr.f32.gmra.mrb[26].mxu0 %v10731_v38  ;;  %v1317_v38 = vld [vmem:[#allocation4 + $0x40] sm:$0xff] }
 0x1ba   :  { %7478 = vmatprep.mubr.msk.f32.mxu0 %vm10411_vm0, %v10412_v1 }
 0x1bd   :  { %7479 = vmatmul.mubr.f32.gmra.mrb[28].mxu0 %v10736_v39  ;;  %v9148_v39 = vpack.c.bf16 %v1657_v37, %v1656_v36  ;;  %v10998_v36 = vld [vmem:[#allocation4 + $0x79] sm:$0xff]  ;;  %v11003_v37 = vld [vmem:[#allocation4 + $0x81] sm:$0xff] }
 0x1be   :  { %7481 = vmatprep.mubr.msk.f32.mxu0 %vm10411_vm0, %v10412_v1 }
 0x1c1   :  { %7482 = vmatmul.mubr.f32.gmra.mrb[30].mxu0 %v10741_v40  ;;  %v1658_v40 = vld [vmem:[#allocation7 + $0x2f0] sm:$0xff] }
 0x1c2   :  { %7484 = vmatprep.mubr.msk.f32.mxu0 %vm10411_vm0, %v10412_v1 }
 0x1c5   :  { %7485 = vmatmul.mubr.f32.gmra.mrb[32].mxu0 %v10746_v41  ;;  %v1659_v41 = vld [vmem:[#allocation7 + $0x2f8] sm:$0xff] }
 0x1c6   :  { %7487 = vmatprep.mubr.msk.f32.mxu0 %vm10411_vm0, %v10412_v1 }
 0x1c9   :  { %7488 = vmatmul.mubr.f32.gmra.mrb[34].mxu0 %v10751_v42  ;;  %v1318_v42 = vld [vmem:[#allocation4 + $0x48] sm:$0xff] }
 0x1ca   :  { %7490 = vmatprep.mubr.msk.f32.mxu0 %vm10411_vm0, %v10412_v1 }
 0x1cd   :  { %7491 = vmatmul.mubr.f32.gmra.mrb[36].mxu0 %v10756_v43  ;;  %v9151_v43 = vpack.c.bf16 %v1659_v41, %v1658_v40  ;;  %v11018_v40 = vld [vmem:[#allocation4 + $0x99] sm:$0xff]  ;;  %v11023_v41 = vld [vmem:[#allocation4 + $0xa1] sm:$0xff] }
 0x1ce   :  { %7493 = vmatprep.mubr.msk.f32.mxu0 %vm10411_vm0, %v10412_v1 }
 0x1d1   :  { %7494 = vmatmul.mubr.f32.gmra.mrb[38].mxu0 %v10761_v44  ;;  %v1319_v44 = vld [vmem:[#allocation4 + $0x50] sm:$0xff] }
 0x1d2   :  { %7496 = vmatprep.mubr.msk.f32.mxu0 %vm10411_vm0, %v10412_v1 }
 0x1d5   :  { %7497 = vmatmul.mubr.f32.gmra.mrb[40].mxu0 %v10766_v45  ;;  %v1320_v45 = vld [vmem:[#allocation4 + $0x58] sm:$0xff] }
 0x1d6   :  { %7499 = vmatprep.mubr.msk.f32.mxu0 %vm10411_vm0, %v10412_v1 }
 0x1d9   :  { %7500 = vmatmul.mubr.f32.gmra.mrb[42].mxu0 %v10771_v46  ;;  %v1321_v46 = vld [vmem:[#allocation4 + $0x60] sm:$0xff] }
 0x1da   :  { %7502 = vmatprep.mubr.msk.f32.mxu0 %vm10411_vm0, %v10412_v1 }
 0x1dd   :  { %7503 = vmatmul.mubr.f32.gmra.mrb[44].mxu0 %v10776_v47  ;;  %v1322_v47 = vld [vmem:[#allocation4 + $0x68] sm:$0xff] }
 0x1de   :  { %7505 = vmatprep.mubr.msk.f32.mxu0 %vm10411_vm0, %v10412_v1 }
 0x1e1   :  { %7506 = vmatmul.mubr.f32.gmra.mrb[46].mxu0 %v10781_v48  ;;  %v1323_v48 = vld [vmem:[#allocation4 + $0x70] sm:$0xff] }
 0x1e2   :  { %7508 = vmatprep.mubr.msk.f32.mxu0 %vm10411_vm0, %v10412_v1 }
 0x1e5   :  { %7509 = vmatmul.mubr.f32.gmra.mrb[48].mxu0 %v1028_v11  ;;  %v1957_v11 = vld [vmem:[#allocation7 + $0x330] sm:$0xff] }
 0x1e6   :  { %7543 = vmatprep.mubr.msk.f32.mxu0 %vm10411_vm0, %v10412_v1 }
 0x1e9   :  { %7544 = vmatmul.mubr.f32.vlgmr.msra.gmra.mrb[0].mxu0 %v1311_v14  ;;  %v9163_v14 = vpack.c.bf16 %v1958_v12, %v1957_v11  ;;  %v2565_v11 = vld [vmem:[#allocation7 + $0x400] sm:$0xff]  ;;  %v2566_v12 = vld [vmem:[#allocation7 + $0x408] sm:$0xff] }
 0x1ea   :  { %9131 = vmatpush3.bf16.msra.mxu0 %v9130_v15  ;;  %7546 = vmatprep.mubr.msk.f32.mxu0 %vm10411_vm0, %v10412_v1  ;;  %v1959_v15 = vld [vmem:[#allocation7 + $0x340] sm:$0xff] }
 0x1eb   :  { %9132 = vmatprep.subr.bf16.mxu0 %v12814_v0 }
 0x1ed   :  { %7547 = vmatmul.mubr.f32.gmra.mrb[2].mxu0 %v1312_v18  ;;  %v9166_v18 = vpack.c.bf16 %v1960_v16, %v1959_v15  ;;  %v2567_v15 = vld [vmem:[#allocation7 + $0x410] sm:$0xff]  ;;  %v2568_v16 = vld [vmem:[#allocation7 + $0x418] sm:$0xff] }
 0x1ee   :  { %7549 = vmatprep.mubr.msk.f32.mxu0 %vm10411_vm0, %v10412_v1  ;;  %9134 = vmatpush3.bf16.msra.mxu0 %v9133_v19  ;;  %v1961_v19 = vld [vmem:[#allocation7 + $0x350] sm:$0xff] }
 0x1ef   :  { %9135 = vmatprep.subr.bf16.mxu0 %v12814_v0 }
 0x1f1   :  { %7550 = vmatmul.mubr.f32.gmra.mrb[4].mxu0 %v1313_v22  ;;  %v9169_v22 = vpack.c.bf16 %v1962_v20, %v1961_v19  ;;  %v2569_v19 = vld [vmem:[#allocation7 + $0x420] sm:$0xff]  ;;  %v2570_v20 = vld [vmem:[#allocation7 + $0x428] sm:$0xff] }
 0x1f2   :  { %7552 = vmatprep.mubr.msk.f32.mxu0 %vm10411_vm0, %v10412_v1  ;;  %9137 = vmatpush3.bf16.msra.mxu0 %v9136_v23  ;;  %v1655_v1 = vld [vmem:[#allocation7 + $0x2d8] sm:$0xff]  ;;  %v1963_v23 = vld [vmem:[#allocation7 + $0x360] sm:$0xff] }
 0x1f3   :  { %9138 = vmatprep.subr.bf16.mxu0 %v12814_v0  ;;  %v9145_v35 = vpack.c.bf16 %v1655_v1, %v1654_v33  ;;  %v10978_v33 = vld [vmem:[#allocation4 + $0x59] sm:$0xff]  ;;  %v10983_v1 = vld [vmem:[#allocation4 + $0x61] sm:$0xff] }
 0x1f5   :  { %7553 = vmatmul.mubr.f32.gmra.mrb[6].mxu0 %v1314_v26  ;;  %v9172_v26 = vpack.c.bf16 %v1964_v24, %v1963_v23  ;;  %v2571_v23 = vld [vmem:[#allocation7 + $0x430] sm:$0xff]  ;;  %v2572_v24 = vld [vmem:[#allocation7 + $0x438] sm:$0xff] }
 0x1f6   :  { %7555 = vmatprep.mubr.msk.f32.mxu0 %vm10411_vm0, %v10877_v30  ;;  %9140 = vmatpush3.bf16.msra.mxu0 %v9139_v27  ;;  %v1965_v27 = vld [vmem:[#allocation7 + $0x370] sm:$0xff] }
 0x1f7   :  { %9141 = vmatprep.subr.bf16.mxu0 %v12814_v0 }
 0x1f9   :  { %7556 = vmatmul.mubr.f32.gmra.mrb[8].mxu0 %v1315_v31  ;;  %v9175_v31 = vpack.c.bf16 %v1966_v28, %v1965_v27  ;;  %v2573_v27 = vld [vmem:[#allocation7 + $0x440] sm:$0xff]  ;;  %v2574_v28 = vld [vmem:[#allocation7 + $0x448] sm:$0xff] }
 0x1fa   :  { %7558 = vmatprep.mubr.msk.f32.mxu0 %vm10411_vm0, %v10877_v30  ;;  %9143 = vmatpush3.bf16.msra.mxu0 %v9142_v32  ;;  %v10972_v32 = vld [vmem:[#allocation4 + $0x51] sm:$0xff] }
 0x1fb   :  { %9144 = vmatprep.subr.bf16.mxu0 %v12814_v0 }
 0x1fd   :  { %7559 = vmatmul.mubr.f32.gmra.mrb[10].mxu0 %v1316_v34  ;;  %v10988_v34 = vld [vmem:[#allocation4 + $0x69] sm:$0xff] }
 0x1fe   :  { %7561 = vmatprep.mubr.msk.f32.mxu0 %vm10411_vm0, %v10877_v30  ;;  %9146 = vmatpush3.bf16.msra.mxu0 %v9145_v35  ;;  %v10993_v35 = vld [vmem:[#allocation4 + $0x71] sm:$0xff] }
 0x1ff   :  { %9147 = vmatprep.subr.bf16.mxu0 %v12814_v0 }
 0x201   :  { %7562 = vmatmul.mubr.f32.gmra.mrb[12].mxu0 %v1317_v38  ;;  %v11008_v38 = vld [vmem:[#allocation4 + $0x89] sm:$0xff] }
 0x202   :  { %7564 = vmatprep.mubr.msk.f32.mxu0 %vm10411_vm0, %v10877_v30  ;;  %9149 = vmatpush3.bf16.msra.mxu0 %v9148_v39  ;;  %v11013_v39 = vld [vmem:[#allocation4 + $0x91] sm:$0xff] }
 0x203   :  { %9150 = vmatprep.subr.bf16.mxu0 %v12814_v0 }
 0x205   :  { %7565 = vmatmul.mubr.f32.gmra.mrb[14].mxu0 %v1318_v42  ;;  %v11028_v42 = vld [vmem:[#allocation4 + $0xa9] sm:$0xff] }
 0x206   :  { %7567 = vmatprep.mubr.msk.f32.mxu0 %vm10411_vm0, %v10877_v30  ;;  %9152 = vmatpush3.bf16.msra.mxu0 %v9151_v43  ;;  %v11033_v43 = vld [vmem:[#allocation4 + $0xb1] sm:$0xff] }
 0x207   :  { %9153 = vmatprep.subr.bf16.mxu0 %v12814_v0 }
 0x209   :  { %7568 = vmatmul.mubr.f32.gmra.mrb[16].mxu0 %v1319_v44  ;;  %v11038_v44 = vld [vmem:[#allocation4 + $0xb9] sm:$0xff] }
 0x20a   :  { %7570 = vmatprep.mubr.msk.f32.mxu0 %vm10411_vm0, %v10877_v30 }
 0x20d   :  { %7571 = vmatmul.mubr.f32.gmra.mrb[18].mxu0 %v1320_v45  ;;  %v11043_v45 = vld [vmem:[#allocation4 + $0xc1] sm:$0xff] }
 0x20e   :  { %7573 = vmatprep.mubr.msk.f32.mxu0 %vm10411_vm0, %v10877_v30 }
 0x211   :  { %7574 = vmatmul.mubr.f32.gmra.mrb[20].mxu0 %v1321_v46  ;;  %v11048_v46 = vld [vmem:[#allocation4 + $0xc9] sm:$0xff] }
 0x212   :  { %7576 = vmatprep.mubr.msk.f32.mxu0 %vm10411_vm0, %v10877_v30 }
 0x215   :  { %7577 = vmatmul.mubr.f32.gmra.mrb[22].mxu0 %v1322_v47  ;;  %v11053_v47 = vld [vmem:[#allocation4 + $0xd1] sm:$0xff] }
 0x216   :  { %7579 = vmatprep.mubr.msk.f32.mxu0 %vm10411_vm0, %v10877_v30 }
 0x219   :  { %7580 = vmatmul.mubr.f32.gmra.mrb[24].mxu0 %v1323_v48  ;;  %v2258_v48 = vld [vmem:[#allocation7 + $0x380] sm:$0xff] }
 0x21a   :  { %7582 = vmatprep.mubr.msk.f32.mxu0 %vm10411_vm0, %v10877_v30 }
 0x21d   :  { %7583 = vmatmul.mubr.f32.gmra.mrb[26].mxu0 %v1324_v49  ;;  %v2259_v49 = vld [vmem:[#allocation7 + $0x388] sm:$0xff] }
 0x21e   :  { %7585 = vmatprep.mubr.msk.f32.mxu0 %vm10411_vm0, %v10877_v30 }
 0x221   :  { %7586 = vmatmul.mubr.f32.gmra.mrb[28].mxu0 %v1325_v50  ;;  %v9178_v50 = vpack.c.bf16 %v2259_v49, %v2258_v48  ;;  %v2245_v48 = vld [vmem:[#allocation4 + $0x82] sm:$0xff]  ;;  %v2246_v49 = vld [vmem:[#allocation4 + $0x8a] sm:$0xff] }
 0x222   :  { %7588 = vmatprep.mubr.msk.f32.mxu0 %vm10411_vm0, %v10877_v30 }
 0x225   :  { %7589 = vmatmul.mubr.f32.gmra.mrb[30].mxu0 %v1326_v51  ;;  %v2260_v51 = vld [vmem:[#allocation7 + $0x390] sm:$0xff] }
 0x226   :  { %7591 = vmatprep.mubr.msk.f32.mxu0 %vm10411_vm0, %v10877_v30 }
 0x229   :  { %7592 = vmatmul.mubr.f32.gmra.mrb[32].mxu0 %v1327_v52  ;;  %v2261_v52 = vld [vmem:[#allocation7 + $0x398] sm:$0xff] }
 0x22a   :  { %7594 = vmatprep.mubr.msk.f32.mxu0 %vm10411_vm0, %v10877_v30 }
 0x22d   :  { %7595 = vmatmul.mubr.f32.gmra.mrb[34].mxu0 %v1328_v53  ;;  %v9181_v53 = vpack.c.bf16 %v2261_v52, %v2260_v51  ;;  %v77_v51 = vld [vmem:[%s12796_s1] sm:$0xff] }
 0x22e   :  { %7597 = vmatprep.mubr.msk.f32.mxu0 %vm10411_vm0, %v10877_v30  ;;  %v2247_v52 = vld [vmem:[#allocation4 + $0x92] sm:$0xff] }
 0x231   :  { %7598 = vmatmul.mubr.f32.gmra.mrb[36].mxu0 %v1329_v54  ;;  %v2262_v54 = vld [vmem:[#allocation7 + $0x3a0] sm:$0xff] }
 0x232   :  { %7600 = vmatprep.mubr.msk.f32.mxu0 %vm10411_vm0, %v10877_v30 }
 0x235   :  { %7601 = vmatmul.mubr.f32.gmra.mrb[38].mxu0 %v1330_v55  ;;  %v2263_v55 = vld [vmem:[#allocation7 + $0x3a8] sm:$0xff] }
 0x236   :  { %7603 = vmatprep.mubr.msk.f32.mxu0 %vm10411_vm0, %v10877_v30 }
 0x239   :  { %7604 = vmatmul.mubr.f32.gmra.mrb[40].mxu0 %v1331_v56  ;;  %v9184_v56 = vpack.c.bf16 %v2263_v55, %v2262_v54  ;;  %v2248_v54 = vld [vmem:[#allocation4 + $0x9a] sm:$0xff]  ;;  %v79_v55 = vld [vmem:[%s12796_s1 + $0x10] sm:$0xff] }
 0x23a   :  { %7606 = vmatprep.mubr.msk.f32.mxu0 %vm10411_vm0, %v10877_v30 }
 0x23d   :  { %7607 = vmatmul.mubr.f32.gmra.mrb[42].mxu0 %v1332_v57  ;;  %v2264_v57 = vld [vmem:[#allocation7 + $0x3b0] sm:$0xff] }
 0x23e   :  { %7609 = vmatprep.mubr.msk.f32.mxu0 %vm10411_vm0, %v10877_v30 }
 0x241   :  { %7610 = vmatmul.mubr.f32.gmra.mrb[44].mxu0 %v1333_v58  ;;  %v2265_v58 = vld [vmem:[#allocation7 + $0x3b8] sm:$0xff] }
 0x242   :  { %7612 = vmatprep.mubr.msk.f32.mxu0 %vm10411_vm0, %v10877_v30 }
 0x245   :  { %7613 = vmatmul.mubr.f32.gmra.mrb[46].mxu0 %v1334_v59  ;;  %v9187_v59 = vpack.c.bf16 %v2265_v58, %v2264_v57  ;;  %v2249_v57 = vld [vmem:[#allocation4 + $0xa2] sm:$0xff]  ;;  %v80_v58 = vld [vmem:[%s12796_s1 + $0x18] sm:$0xff] }
 0x246   :  { %7615 = vmatprep.mubr.msk.f32.mxu0 %vm10411_vm0, %v10877_v30 }
 0x249   :  { %7616 = vmatmul.mubr.f32.gmra.mrb[48].mxu0 %v1335_v60  ;;  %v2266_v60 = vld [vmem:[#allocation7 + $0x3c0] sm:$0xff] }
 0x24a   :  { %7650 = vmatprep.mubr.msk.f32.mxu0 %vm10411_vm0, %v10877_v30  ;;  %v9190_v62 = vpack.c.bf16 %v2267_v61, %v2266_v60  ;;  %v2250_v60 = vld [vmem:[#allocation4 + $0xaa] sm:$0xff]  ;;  %v82_v61 = vld [vmem:[%s12796_s1 + $0x28] sm:$0xff] }
 0x24d   :  { %7651 = vmatmul.mubr.f32.vlgmr.msra.gmra.mrb[0].mxu0 %v1618_v63  ;;  %v2268_v63 = vld [vmem:[#allocation7 + $0x3d0] sm:$0xff] }
 0x24e   :  { %9155 = vmatpush3.bf16.msra.mxu0 %v9154_v2  ;;  %7653 = vmatprep.mubr.msk.f32.mxu0 %vm10411_vm0, %v10877_v30  ;;  %v2269_v2 = vld [vmem:[#allocation7 + $0x3d8] sm:$0xff] }
 0x24f   :  { %9156 = vmatprep.subr.bf16.mxu0 %v12814_v0  ;;  %v9193_v3 = vpack.c.bf16 %v2269_v2, %v2268_v63  ;;  %v2251_v63 = vld [vmem:[#allocation4 + $0xb2] sm:$0xff] }
 0x250   :  { %v84_v2 = vld [vmem:[%s12796_s1 + $0x38] sm:$0xff] }
 0x251   :  { %7654 = vmatmul.mubr.f32.gmra.mrb[2].mxu0 %v10930_v5 }
 0x252   :  { %7656 = vmatprep.mubr.msk.f32.mxu0 %vm10411_vm0, %v10877_v30  ;;  %9158 = vmatpush3.bf16.msra.mxu0 %v9157_v6 }
 0x253   :  { %9159 = vmatprep.subr.bf16.mxu0 %v12814_v0 }
 0x255   :  { %7657 = vmatmul.mubr.f32.gmra.mrb[4].mxu0 %v10936_v9 }
 0x256   :  { %7659 = vmatprep.mubr.msk.f32.mxu0 %vm10411_vm0, %v10877_v30  ;;  %9161 = vmatpush3.bf16.msra.mxu0 %v9160_v10  ;;  %v1949_v10 = vld [vmem:[#allocation4 + $0xd9] sm:$0xff] }
 0x257   :  { %9162 = vmatprep.subr.bf16.mxu0 %v12814_v0 }
 0x259   :  { %7660 = vmatmul.mubr.f32.gmra.mrb[6].mxu0 %v10942_v13 }
 0x25a   :  { %7662 = vmatprep.mubr.msk.f32.mxu0 %vm10411_vm0, %v10877_v30  ;;  %9164 = vmatpush3.bf16.msra.mxu0 %v9163_v14  ;;  %v9202_v14 = vpack.c.bf16 %v2566_v12, %v2565_v11  ;;  %v90_v11 = vld [vmem:[%s12796_s1 + $0x68] sm:$0xff]  ;;  %v93_v12 = vld [vmem:[%s12796_s1 + $0x80] sm:$0xff] }
 0x25b   :  { %9165 = vmatprep.subr.bf16.mxu0 %v12814_v0 }
 0x25d   :  { %7663 = vmatmul.mubr.f32.gmra.mrb[8].mxu0 %v10948_v17 }
 0x25e   :  { %7665 = vmatprep.mubr.msk.f32.mxu0 %vm10411_vm0, %v10877_v30  ;;  %9167 = vmatpush3.bf16.msra.mxu0 %v9166_v18  ;;  %v9205_v18 = vpack.c.bf16 %v2568_v16, %v2567_v15  ;;  %v95_v15 = vld [vmem:[%s12796_s1 + $0x90] sm:$0xff]  ;;  %v2256_v16 = vld [vmem:[#allocation4 + $0xda] sm:$0xff] }
 0x25f   :  { %9168 = vmatprep.subr.bf16.mxu0 %v12814_v0 }
 0x261   :  { %7666 = vmatmul.mubr.f32.gmra.mrb[10].mxu0 %v10954_v21 }
 0x262   :  { %7668 = vmatprep.mubr.msk.f32.mxu0 %vm10411_vm0, %v10877_v30  ;;  %9170 = vmatpush3.bf16.msra.mxu0 %v9169_v22  ;;  %v9208_v22 = vpack.c.bf16 %v2570_v20, %v2569_v19  ;;  %v2539_v19 = vld [vmem:[#allocation4 + $0x1b] sm:$0xff]  ;;  %v96_v20 = vld [vmem:[%s12796_s1 + $0x98] sm:$0xff] }
 0x263   :  { %9171 = vmatprep.subr.bf16.mxu0 %v12814_v0 }
 0x265   :  { %7669 = vmatmul.mubr.f32.gmra.mrb[12].mxu0 %v10960_v25 }
 0x266   :  { %7671 = vmatprep.mubr.msk.f32.mxu0 %vm10411_vm0, %v10877_v30  ;;  %9173 = vmatpush3.bf16.msra.mxu0 %v9172_v26  ;;  %v9211_v26 = vpack.c.bf16 %v2572_v24, %v2571_v23  ;;  %v98_v23 = vld [vmem:[%s12796_s1 + $0xa8] sm:$0xff]  ;;  %v101_v24 = vld [vmem:[%s12796_s1 + $0xc0] sm:$0xff] }
 0x267   :  { %9174 = vmatprep.subr.bf16.mxu0 %v12814_v0 }
 0x269   :  { %7672 = vmatmul.mubr.f32.gmra.mrb[14].mxu0 %v10966_v29 }
 0x26a   :  { %7674 = vmatprep.mubr.msk.f32.mxu0 %vm10411_vm0, %v10877_v30  ;;  %9176 = vmatpush3.bf16.msra.mxu0 %v9175_v31  ;;  %v9214_v31 = vpack.c.bf16 %v2574_v28, %v2573_v27  ;;  %v2542_v27 = vld [vmem:[#allocation4 + $0x33] sm:$0xff]  ;;  %v2543_v28 = vld [vmem:[#allocation4 + $0x3b] sm:$0xff] }
 0x26b   :  { %9177 = vmatprep.subr.bf16.mxu0 %v12814_v0 }
 0x26d   :  { %7675 = vmatmul.mubr.f32.gmra.mrb[16].mxu0 %v10972_v32 }
 0x26e   :  { %7677 = vmatprep.mubr.msk.f32.mxu0 %vm10411_vm0, %v10877_v30 }
 0x271   :  { %7678 = vmatmul.mubr.f32.gmra.mrb[18].mxu0 %v10978_v33 }
 0x272   :  { %7680 = vmatprep.mubr.msk.f32.mxu0 %vm10411_vm0, %v10877_v30 }
 0x275   :  { %7681 = vmatmul.mubr.f32.gmra.mrb[20].mxu0 %v10983_v1 }
 0x276   :  { %7683 = vmatprep.mubr.msk.f32.mxu0 %vm10411_vm0, %v10877_v30 }
 0x279   :  { %7684 = vmatmul.mubr.f32.gmra.mrb[22].mxu0 %v10988_v34 }
 0x27a   :  { %7686 = vmatprep.mubr.msk.f32.mxu0 %vm10411_vm0, %v10877_v30 }
 0x27d   :  { %7687 = vmatmul.mubr.f32.gmra.mrb[24].mxu0 %v10993_v35 }
 0x27e   :  { %7689 = vmatprep.mubr.msk.f32.mxu0 %vm10411_vm0, %v10877_v30 }
 0x281   :  { %7690 = vmatmul.mubr.f32.gmra.mrb[26].mxu0 %v10998_v36 }
 0x282   :  { %7692 = vmatprep.mubr.msk.f32.mxu0 %vm10411_vm0, %v10877_v30 }
 0x285   :  { %7693 = vmatmul.mubr.f32.gmra.mrb[28].mxu0 %v11003_v37 }
 0x286   :  { %7695 = vmatprep.mubr.msk.f32.mxu0 %vm10411_vm0, %v10877_v30 }
 0x289   :  { %7696 = vmatmul.mubr.f32.gmra.mrb[30].mxu0 %v11008_v38 }
 0x28a   :  { %7698 = vmatprep.mubr.msk.f32.mxu0 %vm10411_vm0, %v10877_v30 }
 0x28d   :  { %7699 = vmatmul.mubr.f32.gmra.mrb[32].mxu0 %v11013_v39 }
 0x28e   :  { %7701 = vmatprep.mubr.msk.f32.mxu0 %vm10411_vm0, %v10877_v30 }
 0x291   :  { %7702 = vmatmul.mubr.f32.gmra.mrb[34].mxu0 %v11018_v40 }
 0x292   :  { %7704 = vmatprep.mubr.msk.f32.mxu0 %vm10411_vm0, %v10877_v30 }
 0x295   :  { %7705 = vmatmul.mubr.f32.gmra.mrb[36].mxu0 %v11023_v41 }
 0x296   :  { %7707 = vmatprep.mubr.msk.f32.mxu0 %vm10411_vm0, %v10877_v30 }
 0x299   :  { %7708 = vmatmul.mubr.f32.gmra.mrb[38].mxu0 %v11028_v42 }
 0x29a   :  { %7710 = vmatprep.mubr.msk.f32.mxu0 %vm10411_vm0, %v10877_v30 }
 0x29d   :  { %7711 = vmatmul.mubr.f32.gmra.mrb[40].mxu0 %v11033_v43 }
 0x29e   :  { %7713 = vmatprep.mubr.msk.f32.mxu0 %vm10411_vm0, %v10877_v30 }
 0x2a1   :  { %7714 = vmatmul.mubr.f32.gmra.mrb[42].mxu0 %v11038_v44 }
 0x2a2   :  { %7716 = vmatprep.mubr.msk.f32.mxu0 %vm10411_vm0, %v10877_v30 }
 0x2a5   :  { %7717 = vmatmul.mubr.f32.gmra.mrb[44].mxu0 %v11043_v45 }
 0x2a6   :  { %7719 = vmatprep.mubr.msk.f32.mxu0 %vm10411_vm0, %v10877_v30 }
 0x2a9   :  { %7720 = vmatmul.mubr.f32.gmra.mrb[46].mxu0 %v11048_v46 }
 0x2aa   :  { %7722 = vmatprep.mubr.msk.f32.mxu0 %vm10411_vm0, %v10877_v30 }
 0x2ad   :  { %7723 = vmatmul.mubr.f32.gmra.mrb[48].mxu0 %v11053_v47 }
 0x2ae   :  { %7757 = vmatprep.mubr.msk.f32.mxu0 %vm10411_vm0, %v10877_v30 }
 0x2b1   :  { %7758 = vmatmul.mubr.f32.vlgmr.msra.gmra.mrb[0].mxu0 %v10930_v5  ;;  %v2271_v5 = vld [vmem:[#allocation7 + $0x3e8] sm:$0xff] }
 0x2b2   :  { %9179 = vmatpush3.bf16.msra.mxu0 %v9178_v50  ;;  %7760 = vmatprep.mubr.msk.f32.mxu0 %vm10411_vm0, %v10877_v30  ;;  %v9196_v6 = vpack.c.bf16 %v2271_v5, %v2270_v4  ;;  %v10413_v50 = vmov 0   ;;  %v2252_v4 = vld [vmem:[#allocation4 + $0xba] sm:$0xff] }
 0x2b3   :  { %9180 = vmatprep.subr.bf16.mxu0 %v12814_v0  ;;  %10301 = vset.pattern.permute.xlu0 %v10413_v50  ;;  %v86_v5 = vld [vmem:[%s12796_s1 + $0x48] sm:$0xff] }
 0x2b4   :  { %10302 = vset.pattern.permute.xlu1 %v10413_v50  ;;  %2848 = vperm.xlu0 %10301, %v77_v51  }
 0x2b5   :  { %7761 = vmatmul.mubr.f32.gmra.mrb[2].mxu0 %v10936_v9  ;;  %v9199_v9 = vpack.c.bf16 %v2273_v8, %v2272_v7  ;;  %2858 = vperm.xlu1 %10302, %v79_v55   ;;  %v2253_v7 = vld [vmem:[#allocation4 + $0xc2] sm:$0xff]  ;;  %v88_v8 = vld [vmem:[%s12796_s1 + $0x58] sm:$0xff] }
 0x2b6   :  { %7763 = vmatprep.mubr.msk.f32.mxu0 %vm10411_vm0, %v10877_v30  ;;  %9182 = vmatpush3.bf16.msra.mxu0 %v9181_v53  ;;  %v78_v53 = vld [vmem:[%s12796_s1 + $0x8] sm:$0xff] }
 0x2b7   :  { %9183 = vmatprep.subr.bf16.mxu0 %v12814_v0 }
 0x2b8   :  { %2853 = vperm.xlu0 %10301, %v78_v53  }
 0x2b9   :  { %7764 = vmatmul.mubr.f32.gmra.mrb[4].mxu0 %v10942_v13  ;;  %v2232_v13 = vld [vmem:[#allocation4 + $0x1a] sm:$0xff]  ;;  %2863 = vperm.xlu1 %10302, %v80_v58  }
 0x2ba   :  { %7766 = vmatprep.mubr.msk.f32.mxu0 %vm10411_vm0, %v10877_v30  ;;  %9185 = vmatpush3.bf16.msra.mxu0 %v9184_v56  ;;  %v81_v56 = vld [vmem:[%s12796_s1 + $0x20] sm:$0xff] }
 0x2bb   :  { %9186 = vmatprep.subr.bf16.mxu0 %v12814_v0 }
 0x2bc   :  { %2868 = vperm.xlu0 %10301, %v81_v56  }
 0x2bd   :  { %7767 = vmatmul.mubr.f32.gmra.mrb[6].mxu0 %v10948_v17  ;;  %v2233_v17 = vld [vmem:[#allocation4 + $0x22] sm:$0xff]  ;;  %2873 = vperm.xlu1 %10302, %v82_v61  }
 0x2be   :  { %7769 = vmatprep.mubr.msk.f32.mxu0 %vm10411_vm0, %v10877_v30  ;;  %9188 = vmatpush3.bf16.msra.mxu0 %v9187_v59  ;;  %v83_v59 = vld [vmem:[%s12796_s1 + $0x30] sm:$0xff] }
 0x2bf   :  { %9189 = vmatprep.subr.bf16.mxu0 %v12814_v0 }
 0x2c0   :  { %2878 = vperm.xlu0 %10301, %v83_v59  }
 0x2c1   :  { %7770 = vmatmul.mubr.f32.gmra.mrb[8].mxu0 %v10954_v21  ;;  %v2234_v21 = vld [vmem:[#allocation4 + $0x2a] sm:$0xff]  ;;  %2883 = vperm.xlu1 %10302, %v84_v2  }
 0x2c2   :  { %7772 = vmatprep.mubr.msk.f32.mxu0 %vm10411_vm0, %v10877_v30  ;;  %9191 = vmatpush3.bf16.msra.mxu0 %v9190_v62  ;;  %v85_v62 = vld [vmem:[%s12796_s1 + $0x40] sm:$0xff] }
 0x2c3   :  { %9192 = vmatprep.subr.bf16.mxu0 %v12814_v0 }
 0x2c4   :  { %2888 = vperm.xlu0 %10301, %v85_v62  }
 0x2c5   :  { %7773 = vmatmul.mubr.f32.gmra.mrb[10].mxu0 %v10960_v25  ;;  %v2235_v25 = vld [vmem:[#allocation4 + $0x32] sm:$0xff]  ;;  %2893 = vperm.xlu1 %10302, %v86_v5  }
 0x2c6   :  { %7775 = vmatprep.mubr.msk.f32.mxu0 %vm10411_vm0, %v10877_v30  ;;  %9194 = vmatpush3.bf16.msra.mxu0 %v9193_v3  ;;  %v87_v3 = vld [vmem:[%s12796_s1 + $0x50] sm:$0xff] }
 0x2c7   :  { %9195 = vmatprep.subr.bf16.mxu0 %v12814_v0 }
 0x2c8   :  { %2898 = vperm.xlu0 %10301, %v87_v3  }
 0x2c9   :  { %7776 = vmatmul.mubr.f32.gmra.mrb[12].mxu0 %v10966_v29  ;;  %v2236_v29 = vld [vmem:[#allocation4 + $0x3a] sm:$0xff]  ;;  %2903 = vperm.xlu1 %10302, %v88_v8  }
 0x2ca   :  { %7778 = vmatprep.mubr.msk.f32.mxu0 %vm10411_vm0, %v10877_v30  ;;  %9197 = vmatpush3.bf16.msra.mxu0 %v9196_v6  ;;  %v89_v6 = vld [vmem:[%s12796_s1 + $0x60] sm:$0xff] }
 0x2cb   :  { %9198 = vmatprep.subr.bf16.mxu0 %v12814_v0 }
 0x2cc   :  { %2908 = vperm.xlu0 %10301, %v89_v6  }
 0x2cd   :  { %7779 = vmatmul.mubr.f32.gmra.mrb[14].mxu0 %v10972_v32  ;;  %v2575_v32 = vld [vmem:[#allocation7 + $0x450] sm:$0xff]  ;;  %2913 = vperm.xlu1 %10302, %v90_v11  }
 0x2ce   :  { %7781 = vmatprep.mubr.msk.f32.mxu0 %vm10411_vm0, %v10877_v30  ;;  %9200 = vmatpush3.bf16.msra.mxu0 %v9199_v9  ;;  %v91_v9 = vld [vmem:[%s12796_s1 + $0x70] sm:$0xff] }
 0x2cf   :  { %9201 = vmatprep.subr.bf16.mxu0 %v12814_v0 }
 0x2d0   :  { %2918 = vperm.xlu0 %10301, %v91_v9  }
 0x2d1   :  { %7782 = vmatmul.mubr.f32.gmra.mrb[16].mxu0 %v10978_v33  ;;  %v2576_v33 = vld [vmem:[#allocation7 + $0x458] sm:$0xff] }
 0x2d2   :  { %7784 = vmatprep.mubr.msk.f32.mxu0 %vm10411_vm0, %v10877_v30 }
 0x2d4   :  { %2928 = vperm.xlu0 %10301, %v93_v12  }
 0x2d5   :  { %7785 = vmatmul.mubr.f32.gmra.mrb[18].mxu0 %v10983_v1  ;;  %v2237_v1 = vld [vmem:[#allocation4 + $0x42] sm:$0xff] }
 0x2d6   :  { %7787 = vmatprep.mubr.msk.f32.mxu0 %vm10411_vm0, %v10877_v30 }
 0x2d8   :  { %2938 = vperm.xlu0 %10301, %v95_v15  }
 0x2d9   :  { %7788 = vmatmul.mubr.f32.gmra.mrb[20].mxu0 %v10988_v34  ;;  %v9217_v34 = vpack.c.bf16 %v2576_v33, %v2575_v32  ;;  %v2546_v32 = vld [vmem:[#allocation4 + $0x53] sm:$0xff]  ;;  %v2547_v33 = vld [vmem:[#allocation4 + $0x5b] sm:$0xff] }
 0x2da   :  { %7790 = vmatprep.mubr.msk.f32.mxu0 %vm10411_vm0, %v10877_v30 }
 0x2dd   :  { %7791 = vmatmul.mubr.f32.gmra.mrb[22].mxu0 %v10993_v35  ;;  %v2577_v35 = vld [vmem:[#allocation7 + $0x460] sm:$0xff] }
 0x2de   :  { %7793 = vmatprep.mubr.msk.f32.mxu0 %vm10411_vm0, %v10877_v30 }
 0x2e1   :  { %7794 = vmatmul.mubr.f32.gmra.mrb[24].mxu0 %v10998_v36  ;;  %v2578_v36 = vld [vmem:[#allocation7 + $0x468] sm:$0xff] }
 0x2e2   :  { %7796 = vmatprep.mubr.msk.f32.mxu0 %vm10411_vm0, %v10877_v30 }
 0x2e5   :  { %7797 = vmatmul.mubr.f32.gmra.mrb[26].mxu0 %v11003_v37  ;;  %v2238_v37 = vld [vmem:[#allocation4 + $0x4a] sm:$0xff] }
 0x2e6   :  { %7799 = vmatprep.mubr.msk.f32.mxu0 %vm10411_vm0, %v10877_v30 }
 0x2e9   :  { %7800 = vmatmul.mubr.f32.gmra.mrb[28].mxu0 %v11008_v38  ;;  %v9220_v38 = vpack.c.bf16 %v2578_v36, %v2577_v35  ;;  %v2550_v35 = vld [vmem:[#allocation4 + $0x73] sm:$0xff]  ;;  %v2551_v36 = vld [vmem:[#allocation4 + $0x7b] sm:$0xff] }
 0x2ea   :  { %7802 = vmatprep.mubr.msk.f32.mxu0 %vm10411_vm0, %v10877_v30 }
 0x2ed   :  { %7803 = vmatmul.mubr.f32.gmra.mrb[30].mxu0 %v11013_v39  ;;  %v2579_v39 = vld [vmem:[#allocation7 + $0x470] sm:$0xff] }
 0x2ee   :  { %7805 = vmatprep.mubr.msk.f32.mxu0 %vm10411_vm0, %v10877_v30 }
 0x2f1   :  { %7806 = vmatmul.mubr.f32.gmra.mrb[32].mxu0 %v11018_v40  ;;  %v2580_v40 = vld [vmem:[#allocation7 + $0x478] sm:$0xff] }
 0x2f2   :  { %7808 = vmatprep.mubr.msk.f32.mxu0 %vm10411_vm0, %v10877_v30 }
 0x2f5   :  { %7809 = vmatmul.mubr.f32.gmra.mrb[34].mxu0 %v11023_v41  ;;  %v2239_v41 = vld [vmem:[#allocation4 + $0x52] sm:$0xff] }
 0x2f6   :  { %7811 = vmatprep.mubr.msk.f32.mxu0 %vm10411_vm0, %v10877_v30 }
 0x2f9   :  { %7812 = vmatmul.mubr.f32.gmra.mrb[36].mxu0 %v11028_v42  ;;  %v9223_v42 = vpack.c.bf16 %v2580_v40, %v2579_v39  ;;  %v2554_v39 = vld [vmem:[#allocation4 + $0x93] sm:$0xff]  ;;  %v2555_v40 = vld [vmem:[#allocation4 + $0x9b] sm:$0xff] }
 0x2fa   :  { %7814 = vmatprep.mubr.msk.f32.mxu0 %vm10411_vm0, %v10877_v30 }
 0x2fd   :  { %7815 = vmatmul.mubr.f32.gmra.mrb[38].mxu0 %v11033_v43  ;;  %v2240_v43 = vld [vmem:[#allocation4 + $0x5a] sm:$0xff] }
 0x2fe   :  { %7817 = vmatprep.mubr.msk.f32.mxu0 %vm10411_vm0, %v10877_v30 }
 0x301   :  { %7818 = vmatmul.mubr.f32.gmra.mrb[40].mxu0 %v11038_v44  ;;  %v2241_v44 = vld [vmem:[#allocation4 + $0x62] sm:$0xff] }
 0x302   :  { %7820 = vmatprep.mubr.msk.f32.mxu0 %vm10411_vm0, %v10877_v30 }
 0x305   :  { %7821 = vmatmul.mubr.f32.gmra.mrb[42].mxu0 %v11043_v45  ;;  %v2242_v45 = vld [vmem:[#allocation4 + $0x6a] sm:$0xff] }
 0x306   :  { %7823 = vmatprep.mubr.msk.f32.mxu0 %vm10411_vm0, %v10877_v30 }
 0x309   :  { %7824 = vmatmul.mubr.f32.gmra.mrb[44].mxu0 %v11048_v46  ;;  %v2243_v46 = vld [vmem:[#allocation4 + $0x72] sm:$0xff] }
 0x30a   :  { %7826 = vmatprep.mubr.msk.f32.mxu0 %vm10411_vm0, %v10877_v30 }
 0x30d   :  { %7827 = vmatmul.mubr.f32.gmra.mrb[46].mxu0 %v11053_v47  ;;  %v2244_v47 = vld [vmem:[#allocation4 + $0x7a] sm:$0xff] }
 0x30e   :  { %7829 = vmatprep.mubr.msk.f32.mxu0 %vm10411_vm0, %v10877_v30 }
 0x311   :  { %7830 = vmatmul.mubr.f32.gmra.mrb[48].mxu0 %v1949_v10  ;;  %v2254_v10 = vld [vmem:[#allocation4 + $0xca] sm:$0xff] }
 0x312   :  { %7864 = vmatprep.mubr.msk.f32.mxu0 %vm10411_vm0, %v10877_v30 }
 0x315   :  { %7865 = vmatmul.mubr.f32.vlgmr.msra.gmra.mrb[0].mxu0 %v2232_v13  ;;  %v2255_v13 = vld [vmem:[#allocation4 + $0xd2] sm:$0xff] }
 0x316   :  { %9203 = vmatpush3.bf16.msra.mxu0 %v9202_v14  ;;  %7867 = vmatprep.mubr.msk.f32.mxu0 %vm10411_vm0, %v10877_v30  ;;  %v92_v14 = vld [vmem:[%s12796_s1 + $0x78] sm:$0xff] }
 0x317   :  { %9204 = vmatprep.subr.bf16.mxu0 %v12814_v0  ;;  %2923 = vperm.xlu1 %10302, %v92_v14  }
 0x319   :  { %7868 = vmatmul.mubr.f32.gmra.mrb[2].mxu0 %v2233_v17  ;;  %v94_v17 = vld [vmem:[%s12796_s1 + $0x88] sm:$0xff] }
 0x31a   :  { %7870 = vmatprep.mubr.msk.f32.mxu0 %vm10411_vm0, %v10877_v30  ;;  %9206 = vmatpush3.bf16.msra.mxu0 %v9205_v18  ;;  %v97_v18 = vld [vmem:[%s12796_s1 + $0xa0] sm:$0xff] }
 0x31b   :  { %9207 = vmatprep.subr.bf16.mxu0 %v12814_v0  ;;  %2933 = vperm.xlu1 %10302, %v94_v17  }
 0x31c   :  { %2948 = vperm.xlu0 %10301, %v97_v18  }
 0x31d   :  { %7871 = vmatmul.mubr.f32.gmra.mrb[4].mxu0 %v2234_v21  ;;  %v99_v21 = vld [vmem:[%s12796_s1 + $0xb0] sm:$0xff] }
 0x31e   :  { %7873 = vmatprep.mubr.msk.f32.mxu0 %vm10411_vm0, %v10877_v30  ;;  %9209 = vmatpush3.bf16.msra.mxu0 %v9208_v22  ;;  %v2540_v22 = vld [vmem:[#allocation4 + $0x23] sm:$0xff] }
 0x31f   :  { %9210 = vmatprep.subr.bf16.mxu0 %v12814_v0  ;;  %2943 = vperm.xlu1 %10302, %v96_v20  }
 0x320   :  { %2958 = vperm.xlu0 %10301, %v99_v21  }
 0x321   :  { %7874 = vmatmul.mubr.f32.gmra.mrb[6].mxu0 %v2235_v25  ;;  %v2541_v25 = vld [vmem:[#allocation4 + $0x2b] sm:$0xff] }
 0x322   :  { %7876 = vmatprep.mubr.msk.f32.mxu0 %vm10411_vm0, %v10877_v30  ;;  %9212 = vmatpush3.bf16.msra.mxu0 %v9211_v26  ;;  %v100_v26 = vld [vmem:[%s12796_s1 + $0xb8] sm:$0xff] }
 0x323   :  { %9213 = vmatprep.subr.bf16.mxu0 %v12814_v0  ;;  %2953 = vperm.xlu1 %10302, %v98_v23  }
 0x324   :  { %2968 = vperm.xlu0 %10301, %v101_v24  }
 0x325   :  { %7877 = vmatmul.mubr.f32.gmra.mrb[8].mxu0 %v2236_v29  ;;  %v2544_v29 = vld [vmem:[#allocation4 + $0x43] sm:$0xff] }
 0x326   :  { %7879 = vmatprep.mubr.msk.f32.mxu0 %vm10411_vm0, %v10877_v30  ;;  %9215 = vmatpush3.bf16.msra.mxu0 %v9214_v31  ;;  %v2545_v31 = vld [vmem:[#allocation4 + $0x4b] sm:$0xff] }
 0x327   :  { %9216 = vmatprep.subr.bf16.mxu0 %v12814_v0  ;;  %2963 = vperm.xlu1 %10302, %v100_v26  }
 0x329   :  { %7880 = vmatmul.mubr.f32.gmra.mrb[10].mxu0 %v2237_v1  ;;  %v2548_v1 = vld [vmem:[#allocation4 + $0x63] sm:$0xff] }
 0x32a   :  { %7882 = vmatprep.mubr.msk.f32.mxu0 %vm10411_vm0, %v10877_v30  ;;  %9218 = vmatpush3.bf16.msra.mxu0 %v9217_v34  ;;  %v2549_v34 = vld [vmem:[#allocation4 + $0x6b] sm:$0xff] }
 0x32b   :  { %9219 = vmatprep.subr.bf16.mxu0 %v12814_v0 }
 0x32d   :  { %7883 = vmatmul.mubr.f32.gmra.mrb[12].mxu0 %v2238_v37  ;;  %v2552_v37 = vld [vmem:[#allocation4 + $0x83] sm:$0xff] }
 0x32e   :  { %7885 = vmatprep.mubr.msk.f32.mxu0 %vm10411_vm0, %v10877_v30  ;;  %9221 = vmatpush3.bf16.msra.mxu0 %v9220_v38  ;;  %v2553_v38 = vld [vmem:[#allocation4 + $0x8b] sm:$0xff] }
 0x32f   :  { %9222 = vmatprep.subr.bf16.mxu0 %v12814_v0 }
 0x331   :  { %7886 = vmatmul.mubr.f32.gmra.mrb[14].mxu0 %v2239_v41  ;;  %v2556_v41 = vld [vmem:[#allocation4 + $0xa3] sm:$0xff] }
 0x332   :  { %7888 = vmatprep.mubr.msk.f32.mxu0 %vm10411_vm0, %v10877_v30  ;;  %9224 = vmatpush3.bf16.msra.mxu0 %v9223_v42  ;;  %v2557_v42 = vld [vmem:[#allocation4 + $0xab] sm:$0xff] }
 0x333   :  { %v11327_v51 = vpop.permute.xlu0 %2848 }
 0x334   :  { %v11341_v61 = vpop.permute.xlu1 %2858 }
 0x335   :  { %7889 = vmatmul.mubr.f32.gmra.mrb[16].mxu0 %v2240_v43  ;;  %v11308_v43 = vld [vmem:[#allocation2] sm:$0xff]  ;;  %12849 = vst [vmem:[#allocation15_spill] sm:$0xff] %v11341_v61 }
 0x336   :  { %7891 = vmatprep.mubr.msk.f32.mxu0 %vm10411_vm0, %v10877_v30  ;;  %12848 = vst [vmem:[#allocation14_spill] sm:$0xff] %v11308_v43 }
 0x338   :  { %v11351_v8 = vpop.permute.xlu1 %2863 }
 0x339   :  { %7892 = vmatmul.mubr.f32.gmra.mrb[18].mxu0 %v2241_v44  ;;  %v2558_v44 = vld [vmem:[#allocation4 + $0xb3] sm:$0xff]  ;;  %12850 = vst [vmem:[#allocation16_spill] sm:$0xff] %v11351_v8 }
 0x33a   :  { %7894 = vmatprep.mubr.msk.f32.mxu0 %vm10411_vm0, %v10877_v30 }
 0x33c   :  { %v11365_v20 = vpop.permute.xlu1 %2873 }
 0x33d   :  { %7895 = vmatmul.mubr.f32.gmra.mrb[20].mxu0 %v2242_v45  ;;  %v2559_v45 = vld [vmem:[#allocation4 + $0xbb] sm:$0xff] }
 0x33e   :  { %7897 = vmatprep.mubr.msk.f32.mxu0 %vm10411_vm0, %v10877_v30 }
 0x341   :  { %7898 = vmatmul.mubr.f32.gmra.mrb[22].mxu0 %v2243_v46  ;;  %v2560_v46 = vld [vmem:[#allocation4 + $0xc3] sm:$0xff] }
 0x342   :  { %7900 = vmatprep.mubr.msk.f32.mxu0 %vm10411_vm0, %v10877_v30 }
 0x345   :  { %7901 = vmatmul.mubr.f32.gmra.mrb[24].mxu0 %v2244_v47  ;;  %v2562_v47 = vld [vmem:[#allocation4 + $0xd3] sm:$0xff] }
 0x346   :  { %7903 = vmatprep.mubr.msk.f32.mxu0 %vm10411_vm0, %v10877_v30 }
 0x349   :  { %7904 = vmatmul.mubr.f32.gmra.mrb[26].mxu0 %v2245_v48  ;;  %v2563_v48 = vld [vmem:[#allocation4 + $0xdb] sm:$0xff] }
 0x34a   :  { %7906 = vmatprep.mubr.msk.f32.mxu0 %vm10411_vm0, %v10877_v30 }
 0x34d   :  { %7907 = vmatmul.mubr.f32.gmra.mrb[28].mxu0 %v2246_v49  ;;  %v11325_v49 = vld [vmem:[%s12798_s3] ss:$0 sm:$0xff] }
 0x34e   :  { %7909 = vmatprep.mubr.msk.f32.mxu0 %vm10411_vm0, %v10877_v30 }
 0x351   :  { %7910 = vmatmul.mubr.f32.gmra.mrb[30].mxu0 %v2247_v52 }
 0x352   :  { %7912 = vmatprep.mubr.msk.f32.mxu0 %vm10411_vm0, %v10877_v30 }
 0x355   :  { %7913 = vmatmul.mubr.f32.gmra.mrb[32].mxu0 %v2248_v54 }
 0x356   :  { %7915 = vmatprep.mubr.msk.f32.mxu0 %vm10411_vm0, %v10877_v30 }
 0x359   :  { %7916 = vmatmul.mubr.f32.gmra.mrb[34].mxu0 %v2249_v57  ;;  %v11335_v57 = vpop.permute.xlu0 %2853 }
 0x35a   :  { %7918 = vmatprep.mubr.msk.f32.mxu0 %vm10411_vm0, %v10877_v30 }
 0x35d   :  { %7919 = vmatmul.mubr.f32.gmra.mrb[36].mxu0 %v2250_v60  ;;  %v11358_v14 = vpop.permute.xlu0 %2868 }
 0x35e   :  { %7921 = vmatprep.mubr.msk.f32.mxu0 %vm10411_vm0, %v10877_v30 }
 0x361   :  { %7922 = vmatmul.mubr.f32.gmra.mrb[38].mxu0 %v2251_v63  ;;  %v11372_v26 = vpop.permute.xlu0 %2878 }
 0x362   :  { %7924 = vmatprep.mubr.msk.f32.mxu0 %vm10411_vm0, %v10877_v30 }
 0x365   :  { %7925 = vmatmul.mubr.f32.gmra.mrb[40].mxu0 %v2252_v4 }
 0x366   :  { %7927 = vmatprep.mubr.msk.f32.mxu0 %vm10411_vm0, %v10877_v30 }
 0x369   :  { %7928 = vmatmul.mubr.f32.gmra.mrb[42].mxu0 %v2253_v7 }
 0x36a   :  { %7930 = vmatprep.mubr.msk.f32.mxu0 %vm10411_vm0, %v10877_v30 }
 0x36d   :  { %7931 = vmatmul.mubr.f32.gmra.mrb[44].mxu0 %v2254_v10 }
 0x36e   :  { %7933 = vmatprep.mubr.msk.f32.mxu0 %vm10411_vm0, %v10877_v30 }
 0x371   :  { %7934 = vmatmul.mubr.f32.gmra.mrb[46].mxu0 %v2255_v13 }
 0x372   :  { %7936 = vmatprep.mubr.msk.f32.mxu0 %vm10411_vm0, %v10877_v30 }
 0x375   :  { %7937 = vmatmul.mubr.f32.gmra.mrb[48].mxu0 %v2256_v16 }
 0x376   :  { %7971 = vmatprep.mubr.msk.f32.mxu0 %vm10411_vm0, %v10877_v30 }
 0x379   :  { %7972 = vmatmul.mubr.f32.vlgmr.msra.gmra.mrb[0].mxu0 %v2539_v19 }
 0x37a   :  { %7974 = vmatprep.mubr.msk.f32.mxu0 %vm10411_vm0, %v10877_v30 }
 0x37d   :  { %7975 = vmatmul.mubr.f32.gmra.mrb[2].mxu0 %v2540_v22 }
 0x37e   :  { %7977 = vmatprep.mubr.msk.f32.mxu0 %vm10411_vm0, %v10877_v30 }
 0x381   :  { %7978 = vmatmul.mubr.f32.gmra.mrb[4].mxu0 %v2541_v25 }
 0x382   :  { %7980 = vmatprep.mubr.msk.f32.mxu0 %vm10411_vm0, %v10877_v30 }
 0x385   :  { %7981 = vmatmul.mubr.f32.gmra.mrb[6].mxu0 %v2542_v27 }
 0x386   :  { %7983 = vmatprep.mubr.msk.f32.mxu0 %vm10411_vm0, %v10877_v30 }
 0x389   :  { %7984 = vmatmul.mubr.f32.gmra.mrb[8].mxu0 %v2543_v28 }
 0x38a   :  { %7986 = vmatprep.mubr.msk.f32.mxu0 %vm10411_vm0, %v10877_v30 }
 0x38d   :  { %7987 = vmatmul.mubr.f32.gmra.mrb[10].mxu0 %v2544_v29 }
 0x38e   :  { %7989 = vmatprep.mubr.msk.f32.mxu0 %vm10411_vm0, %v10877_v30 }
 0x391   :  { %7990 = vmatmul.mubr.f32.gmra.mrb[12].mxu0 %v2545_v31 }
 0x392   :  { %7992 = vmatprep.mubr.msk.f32.mxu0 %vm10411_vm0, %v10877_v30 }
 0x395   :  { %7993 = vmatmul.mubr.f32.gmra.mrb[14].mxu0 %v2546_v32 }
 0x396   :  { %7995 = vmatprep.mubr.msk.f32.mxu0 %vm10411_vm0, %v10877_v30 }
 0x399   :  { %7996 = vmatmul.mubr.f32.gmra.mrb[16].mxu0 %v2547_v33  ;;  %v11379_v33 = vpop.permute.xlu1 %2883 }
 0x39a   :  { %7998 = vmatprep.mubr.msk.f32.mxu0 %vm10411_vm0, %v10877_v30 }
 0x39d   :  { %7999 = vmatmul.mubr.f32.gmra.mrb[18].mxu0 %v2548_v1 }
 0x39e   :  { %8001 = vmatprep.mubr.msk.f32.mxu0 %vm10411_vm0, %v10877_v30 }
 0x3a1   :  { %8002 = vmatmul.mubr.f32.gmra.mrb[20].mxu0 %v2549_v34 }
 0x3a2   :  { %8004 = vmatprep.mubr.msk.f32.mxu0 %vm10411_vm0, %v10877_v30 }
 0x3a5   :  { %8005 = vmatmul.mubr.f32.gmra.mrb[22].mxu0 %v2550_v35 }
 0x3a6   :  { %8007 = vmatprep.mubr.msk.f32.mxu0 %vm10411_vm0, %v10877_v30 }
 0x3a9   :  { %8008 = vmatmul.mubr.f32.gmra.mrb[24].mxu0 %v2551_v36 }
 0x3aa   :  { %8010 = vmatprep.mubr.msk.f32.mxu0 %vm10411_vm0, %v10877_v30 }
 0x3ad   :  { %8011 = vmatmul.mubr.f32.gmra.mrb[26].mxu0 %v2552_v37 }
 0x3ae   :  { %8013 = vmatprep.mubr.msk.f32.mxu0 %vm10411_vm0, %v10877_v30 }
 0x3b1   :  { %8014 = vmatmul.mubr.f32.gmra.mrb[28].mxu0 %v2553_v38  ;;  %v11386_v38 = vpop.permute.xlu0 %2888 }
 0x3b2   :  { %8016 = vmatprep.mubr.msk.f32.mxu0 %vm10411_vm0, %v10877_v30  ;;  %12851 = vst [vmem:[#allocation17_spill] sm:$0xff] %v11386_v38 }
 0x3b5   :  { %8017 = vmatmul.mubr.f32.gmra.mrb[30].mxu0 %v2554_v39 }
 0x3b6   :  { %8019 = vmatprep.mubr.msk.f32.mxu0 %vm10411_vm0, %v10877_v30 }
 0x3b9   :  { %8020 = vmatmul.mubr.f32.gmra.mrb[32].mxu0 %v2555_v40 }
 0x3ba   :  { %8022 = vmatprep.mubr.msk.f32.mxu0 %vm10411_vm0, %v10877_v30 }
 0x3bd   :  { %8023 = vmatmul.mubr.f32.gmra.mrb[34].mxu0 %v2556_v41 }
 0x3be   :  { %8025 = vmatprep.mubr.msk.f32.mxu0 %vm10411_vm0, %v10877_v30  ;;  %v2561_v30 = vld [vmem:[#allocation4 + $0xcb] sm:$0xff] }
 0x3c1   :  { %8026 = vmatmul.mubr.f32.gmra.mrb[36].mxu0 %v2557_v42 }
 0x3c2   :  { %8028 = vmatprep.mubr.msk.f32.mxu0 %vm10411_vm0, %v11308_v43 }
 0x3c5   :  { %8029 = vmatmul.mubr.f32.gmra.mrb[38].mxu0 %v2558_v44 }
 0x3c6   :  { %8031 = vmatprep.mubr.msk.f32.mxu0 %vm10411_vm0, %v11308_v43 }
 0x3c9   :  { %8032 = vmatmul.mubr.f32.gmra.mrb[40].mxu0 %v2559_v45  ;;  %v11393_v45 = vpop.permute.xlu1 %2893 }
 0x3ca   :  { %8034 = vmatprep.mubr.msk.f32.mxu0 %vm10411_vm0, %v11308_v43  ;;  %12852 = vst [vmem:[#allocation18_spill] sm:$0xff] %v11393_v45 }
 0x3cd   :  { %8035 = vmatmul.mubr.f32.gmra.mrb[42].mxu0 %v2560_v46 }
 0x3ce   :  { %8037 = vmatprep.mubr.msk.f32.mxu0 %vm10411_vm0, %v11308_v43 }
 0x3d1   :  { %8038 = vmatmul.mubr.f32.gmra.mrb[44].mxu0 %v2561_v30 }
 0x3d2   :  { %8040 = vmatprep.mubr.msk.f32.mxu0 %vm10411_vm0, %v11308_v43 }
 0x3d5   :  { %8041 = vmatmul.mubr.f32.gmra.mrb[46].mxu0 %v2562_v47 }
 0x3d6   :  { %8043 = vmatprep.mubr.msk.f32.mxu0 %vm10411_vm0, %v11308_v43 }
 0x3d9   :  { %8044 = vmatmul.mubr.f32.gmra.mrb[48].mxu0 %v2563_v48 }
 0x44c   :  { %v2647_v50 = vpop.f32.mrb[0].mxu0 }
 0x44d   :  { %v7973_v52 = vpop.f32.mrb[1].mxu0  ;;  %v11330_v53 = vadd.f32 %v11325_v49, %v2647_v50 }
 0x44e   :  { %v11400_v52 = vpop.permute.xlu0 %2898 }
 0x44f   :  { %v2971_v58 = vmul.f32 %v11330_v53, %v11327_v51  ;;  %12853 = vst [vmem:[#allocation19_spill] sm:$0xff] %v11400_v52 }
 0x450   :  { %v2652_v54 = vpop.f32.mrb[2].mxu0 }
 0x451   :  { %v11333_v55 = vadd.f32 %v11325_v49, %v2652_v54  ;;  %v7976_v56 = vpop.f32.mrb[3].mxu0 }
 0x453   :  { %v2972_v59 = vmul.f32 %v11333_v55, %v11335_v57 }
 0x454   :  { %v2657_v60 = vpop.f32.mrb[4].mxu0 }
 0x455   :  { %v11344_v62 = vadd.f32 %v11325_v49, %v2657_v60  ;;  %v7979_v63 = vpop.f32.mrb[5].mxu0  ;;  %v2996_v2 = vadd.f32 %v2972_v59, %v2971_v58 }
 0x456   :  { %v11407_v63 = vpop.permute.xlu1 %2903 }
 0x457   :  { %v2973_v3 = vmul.f32 %v11344_v62, %v11341_v61  ;;  %12854 = vst [vmem:[#allocation20_spill] sm:$0xff] %v11407_v63 }
 0x458   :  { %v2662_v4 = vpop.f32.mrb[6].mxu0 }
 0x459   :  { %v11349_v5 = vadd.f32 %v11325_v49, %v2662_v4  ;;  %v7982_v6 = vpop.f32.mrb[7].mxu0  ;;  %v2997_v7 = vadd.f32 %v2996_v2, %v2973_v3 }
 0x45b   :  { %v2974_v9 = vmul.f32 %v11349_v5, %v11351_v8 }
 0x45c   :  { %v2667_v10 = vpop.f32.mrb[8].mxu0 }
 0x45d   :  { %v11356_v11 = vadd.f32 %v11325_v49, %v2667_v10  ;;  %v2998_v12 = vadd.f32 %v2997_v7, %v2974_v9  ;;  %v7985_v13 = vpop.f32.mrb[9].mxu0  ;;  %v11414_v9 = vpop.permute.xlu0 %2908 }
 0x45e   :  { %12855 = vst [vmem:[#allocation21_spill] sm:$0xff] %v11414_v9 }
 0x45f   :  { %v2975_v15 = vmul.f32 %v11356_v11, %v11358_v14 }
 0x460   :  { %v2672_v16 = vpop.f32.mrb[10].mxu0 }
 0x461   :  { %v2999_v17 = vadd.f32 %v2998_v12, %v2975_v15  ;;  %v11363_v18 = vadd.f32 %v11325_v49, %v2672_v16  ;;  %v7988_v19 = vpop.f32.mrb[11].mxu0 }
 0x463   :  { %v2976_v21 = vmul.f32 %v11363_v18, %v11365_v20 }
 0x464   :  { %v2677_v22 = vpop.f32.mrb[12].mxu0 }
 0x465   :  { %v3000_v23 = vadd.f32 %v2999_v17, %v2976_v21  ;;  %v11370_v24 = vadd.f32 %v11325_v49, %v2677_v22  ;;  %v7991_v25 = vpop.f32.mrb[13].mxu0  ;;  %v11421_v17 = vpop.permute.xlu1 %2913 }
 0x466   :  { %12856 = vst [vmem:[#allocation22_spill] sm:$0xff] %v11421_v17 }
 0x467   :  { %v2977_v27 = vmul.f32 %v11370_v24, %v11372_v26 }
 0x468   :  { %v2682_v28 = vpop.f32.mrb[14].mxu0 }
 0x469   :  { %v3001_v29 = vadd.f32 %v3000_v23, %v2977_v27  ;;  %v11377_v31 = vadd.f32 %v11325_v49, %v2682_v28  ;;  %v7994_v32 = vpop.f32.mrb[15].mxu0  ;;  %v11428_v27 = vpop.permute.xlu0 %2918 }
 0x46b   :  { %v2978_v1 = vmul.f32 %v11377_v31, %v11379_v33 }
 0x46c   :  { %v2687_v34 = vpop.f32.mrb[16].mxu0 }
 0x46d   :  { %v3002_v35 = vadd.f32 %v3001_v29, %v2978_v1  ;;  %v11384_v36 = vadd.f32 %v11325_v49, %v2687_v34  ;;  %v7997_v37 = vpop.f32.mrb[17].mxu0 }
 0x46f   :  { %v2979_v39 = vmul.f32 %v11384_v36, %v11386_v38 }
 0x470   :  { %v2692_v40 = vpop.f32.mrb[18].mxu0 }
 0x471   :  { %v3003_v41 = vadd.f32 %v3002_v35, %v2979_v39  ;;  %v11391_v42 = vadd.f32 %v11325_v49, %v2692_v40  ;;  %v8000_v44 = vpop.f32.mrb[19].mxu0  ;;  %v11435_v35 = vpop.permute.xlu1 %2923 }
 0x473   :  { %v2980_v46 = vmul.f32 %v11391_v42, %v11393_v45 }
 0x474   :  { %v2697_v30 = vpop.f32.mrb[20].mxu0 }
 0x475   :  { %v3004_v47 = vadd.f32 %v3003_v41, %v2980_v46  ;;  %v11398_v48 = vadd.f32 %v11325_v49, %v2697_v30  ;;  %v8003_v50 = vpop.f32.mrb[21].mxu0  ;;  %v11442_v46 = vpop.permute.xlu0 %2928 }
 0x477   :  { %v2981_v54 = vmul.f32 %v11398_v48, %v11400_v52 }
 0x478   :  { %v2702_v56 = vpop.f32.mrb[22].mxu0 }
 0x479   :  { %v3005_v58 = vadd.f32 %v3004_v47, %v2981_v54  ;;  %v11405_v59 = vadd.f32 %v11325_v49, %v2702_v56  ;;  %v8006_v60 = vpop.f32.mrb[23].mxu0 }
 0x47a   :  { %v3303_v60 = vld [vmem:[#allocation9 + $0x8] sm:$0xff] }
 0x47b   :  { %v2982_v2 = vmul.f32 %v11405_v59, %v11407_v63 }
 0x47c   :  { %v2707_v3 = vpop.f32.mrb[24].mxu0 }
 0x47d   :  { %v3006_v4 = vadd.f32 %v3005_v58, %v2982_v2  ;;  %v11412_v6 = vadd.f32 %v11325_v49, %v2707_v3  ;;  %v8009_v7 = vpop.f32.mrb[25].mxu0  ;;  %v3302_v58 = vld [vmem:[#allocation9] sm:$0xff]  ;;  %v11449_v2 = vpop.permute.xlu1 %2933 }
 0x47e   :  { %12857 = vst [vmem:[#allocation23_spill] sm:$0xff] %v11449_v2  ;;  %v9226_v3 = vpack.c.bf16 %v3303_v60, %v3302_v58  ;;  %v3308_v60 = vld [vmem:[#allocation9 + $0x30] sm:$0xff] }
 0x47f   :  { %v2983_v10 = vmul.f32 %v11412_v6, %v11414_v9 }
 0x480   :  { %v2712_v12 = vpop.f32.mrb[26].mxu0  ;;  %9227 = vmatpush3.bf16.msra.mxu1 %v9226_v3  ;;  %v3309_v3 = vld [vmem:[#allocation9 + $0x38] sm:$0xff] }
 0x481   :  { %v3007_v13 = vadd.f32 %v3006_v4, %v2983_v10  ;;  %v11419_v15 = vadd.f32 %v11325_v49, %v2712_v12  ;;  %v8012_v16 = vpop.f32.mrb[27].mxu0  ;;  %9228 = vmatprep.subr.bf16.mxu1 %v12814_v0 }
 0x482   :  { %v3304_v16 = vld [vmem:[#allocation9 + $0x10] sm:$0xff] }
 0x483   :  { %v2984_v19 = vmul.f32 %v11419_v15, %v11421_v17 }
 0x484   :  { %v2717_v21 = vpop.f32.mrb[28].mxu0 }
 0x485   :  { %v3008_v22 = vadd.f32 %v3007_v13, %v2984_v19  ;;  %v11426_v23 = vadd.f32 %v11325_v49, %v2717_v21  ;;  %v8015_v25 = vpop.f32.mrb[29].mxu0  ;;  %v3305_v19 = vld [vmem:[#allocation9 + $0x18] sm:$0xff]  ;;  %v11457_v21 = vpop.permute.xlu0 %2938 }
 0x486   :  { %12858 = vst [vmem:[#allocation24_spill] sm:$0xff] %v11457_v21 }
 0x487   :  { %v2985_v28 = vmul.f32 %v11426_v23, %v11428_v27 }
 0x488   :  { %v2722_v29 = vpop.f32.mrb[30].mxu0 }
 0x489   :  { %v3009_v32 = vadd.f32 %v3008_v22, %v2985_v28  ;;  %v11433_v1 = vadd.f32 %v11325_v49, %v2722_v29  ;;  %v8018_v34 = vpop.f32.mrb[31].mxu0  ;;  %v9229_v22 = vpack.c.bf16 %v3305_v19, %v3304_v16 }
 0x48b   :  { %v2986_v37 = vmul.f32 %v11433_v1, %v11435_v35  ;;  %9230 = vmatpush3.bf16.msra.mxu1 %v9229_v22 }
 0x48c   :  { %v2727_v39 = vpop.f32.mrb[32].mxu0  ;;  %9231 = vmatprep.subr.bf16.mxu1 %v12814_v0 }
 0x48d   :  { %v3010_v40 = vadd.f32 %v3009_v32, %v2986_v37  ;;  %v11440_v41 = vadd.f32 %v11325_v49, %v2727_v39  ;;  %v8021_v44 = vpop.f32.mrb[33].mxu0  ;;  %v3306_v37 = vld [vmem:[#allocation9 + $0x20] sm:$0xff]  ;;  %v3307_v39 = vld [vmem:[#allocation9 + $0x28] sm:$0xff] }
 0x48e   :  { %v9232_v44 = vpack.c.bf16 %v3307_v39, %v3306_v37 }
 0x48f   :  { %v2987_v30 = vmul.f32 %v11440_v41, %v11442_v46 }
 0x490   :  { %v2732_v47 = vpop.f32.mrb[34].mxu0  ;;  %9233 = vmatpush3.bf16.msra.mxu1 %v9232_v44 }
 0x491   :  { %v3011_v50 = vadd.f32 %v3010_v40, %v2987_v30  ;;  %v11447_v54 = vadd.f32 %v11325_v49, %v2732_v47  ;;  %v8024_v56 = vpop.f32.mrb[35].mxu0  ;;  %v11465_v40 = vpop.permute.xlu1 %2943  ;;  %9234 = vmatprep.subr.bf16.mxu1 %v12814_v0 }
 0x492   :  { %12859 = vst [vmem:[#allocation25_spill] sm:$0xff] %v11465_v40 }
 0x493   :  { %v2988_v4 = vmul.f32 %v11447_v54, %v11449_v2 }
 0x494   :  { %v2737_v7 = vpop.f32.mrb[36].mxu0 }
 0x495   :  { %v3012_v10 = vadd.f32 %v3011_v50, %v2988_v4  ;;  %v11454_v12 = vadd.f32 %v11325_v49, %v2737_v7  ;;  %v8027_v13 = vpop.f32.mrb[37].mxu0  ;;  %v11473_v4 = vpop.permute.xlu0 %2948  ;;  %v9235_v7 = vpack.c.bf16 %v3309_v3, %v3308_v60 }
 0x496   :  { %12860 = vst [vmem:[#allocation26_spill] sm:$0xff] %v11473_v4 }
 0x497   :  { %v2989_v25 = vmul.f32 %v11454_v12, %v11457_v21  ;;  %9236 = vmatpush3.bf16.msra.mxu1 %v9235_v7 }
 0x498   :  { %v2742_v28 = vpop.f32.mrb[38].mxu0  ;;  %9237 = vmatprep.subr.bf16.mxu1 %v12814_v0 }
 0x499   :  { %v3013_v29 = vadd.f32 %v3012_v10, %v2989_v25  ;;  %v11462_v32 = vadd.f32 %v11325_v49, %v2742_v28  ;;  %v8030_v34 = vpop.f32.mrb[39].mxu0  ;;  %v3310_v25 = vld [vmem:[#allocation9 + $0x40] sm:$0xff]  ;;  %v3311_v28 = vld [vmem:[#allocation9 + $0x48] sm:$0xff]  ;;  %v11489_v60 = vpop.permute.xlu0 %2958 }
 0x49a   :  { %v9238_v34 = vpack.c.bf16 %v3311_v28, %v3310_v25  ;;  %12862 = vst [vmem:[#allocation28_spill] sm:$0xff] %v11489_v60  ;;  %v3314_v25 = vld [vmem:[#allocation9 + $0x60] sm:$0xff]  ;;  %v3315_v28 = vld [vmem:[#allocation9 + $0x68] sm:$0xff] }
 0x49b   :  { %v2990_v30 = vmul.f32 %v11462_v32, %v11465_v40 }
 0x49c   :  { %v2747_v47 = vpop.f32.mrb[40].mxu0  ;;  %9239 = vmatpush3.bf16.msra.mxu1 %v9238_v34 }
 0x49d   :  { %v3014_v50 = vadd.f32 %v3013_v29, %v2990_v30  ;;  %v11470_v56 = vadd.f32 %v11325_v49, %v2747_v47  ;;  %v8033_v58 = vpop.f32.mrb[41].mxu0  ;;  %v11481_v29 = vpop.permute.xlu1 %2953  ;;  %9240 = vmatprep.subr.bf16.mxu1 %v12814_v0 }
 0x49e   :  { %12861 = vst [vmem:[#allocation27_spill] sm:$0xff] %v11481_v29  ;;  %v3313_v58 = vld [vmem:[#allocation9 + $0x58] sm:$0xff] }
 0x49f   :  { %v2991_v10 = vmul.f32 %v11470_v56, %v11473_v4  ;;  %v3592_v4 = vld [vmem:[#allocation9 + $0x88] sm:$0xff] }
 0x4a0   :  { %v2752_v13 = vpop.f32.mrb[42].mxu0 }
 0x4a1   :  { %v3015_v16 = vadd.f32 %v3014_v50, %v2991_v10  ;;  %v11478_v19 = vadd.f32 %v11325_v49, %v2752_v13  ;;  %v8036_v22 = vpop.f32.mrb[43].mxu0  ;;  %v3312_v50 = vld [vmem:[#allocation9 + $0x50] sm:$0xff]  ;;  %v11495_v34 = vpop.permute.xlu1 %2963 }
 0x4a2   :  { %v9241_v3 = vpack.c.bf16 %v3313_v58, %v3312_v50  ;;  %12863 = vst [vmem:[#allocation29_spill] sm:$0xff] %v11495_v34 }
 0x4a3   :  { %v2992_v37 = vmul.f32 %v11478_v19, %v11481_v29  ;;  %v3591_v29 = vld [vmem:[#allocation9 + $0x80] sm:$0xff] }
 0x4a4   :  { %v2757_v39 = vpop.f32.mrb[44].mxu0  ;;  %9242 = vmatpush3.bf16.msra.mxu1 %v9241_v3  ;;  %v3317_v3 = vld [vmem:[#allocation9 + $0x78] sm:$0xff] }
 0x4a5   :  { %v3016_v44 = vadd.f32 %v3015_v16, %v2992_v37  ;;  %v11486_v30 = vadd.f32 %v11325_v49, %v2757_v39  ;;  %v8039_v47 = vpop.f32.mrb[45].mxu0  ;;  %9243 = vmatprep.subr.bf16.mxu1 %v12814_v0  ;;  %v9244_v37 = vpack.c.bf16 %v3315_v28, %v3314_v25  ;;  %v3277_v25 = vld [vmem:[#allocation2 + $0x5] sm:$0xff]  ;;  %v9250_v28 = vpack.c.bf16 %v3592_v4, %v3591_v29 }
 0x4a7   :  { %v2993_v7 = vmul.f32 %v11486_v30, %v11489_v60 }
 0x4a8   :  { %v2762_v10 = vpop.f32.mrb[46].mxu0  ;;  %9245 = vmatpush3.bf16.msra.mxu1 %v9244_v37 }
 0x4a9   :  { %v3017_v13 = vadd.f32 %v3016_v44, %v2993_v7  ;;  %v9464_v22 = vadd.f32 %v11325_v49, %v2762_v10  ;;  %v8042_v16 = vpop.f32.mrb[47].mxu0  ;;  %9246 = vmatprep.subr.bf16.mxu1 %v12814_v0  ;;  %v3316_v44 = vld [vmem:[#allocation9 + $0x70] sm:$0xff]  ;;  %v11500_v7 = vpop.permute.xlu0 %2968 }
 0x4aa   :  { %12864 = vst [vmem:[#allocation30_spill] sm:$0xff] %v11500_v7  ;;  %v9247_v10 = vpack.c.bf16 %v3317_v3, %v3316_v44 }
 0x4ab   :  { %v2994_v39 = vmul.f32 %v9464_v22, %v11495_v34 }
 0x4ac   :  { %v2767_v47 = vpop.f32.mrb[48].mxu0  ;;  %9248 = vmatpush3.bf16.msra.mxu1 %v9247_v10 }
 0x4ad   :  { %v3018_v50 = vadd.f32 %v3017_v13, %v2994_v39  ;;  %v9465_v58 = vadd.f32 %v11325_v49, %v2767_v47  ;;  %v8045_v60 = vpop.f32.mrb[49].mxu0  ;;  %9249 = vmatprep.subr.bf16.mxu1 %v12814_v0 }
 0x4af   :  { %v2995_v16 = vmul.f32 %v9465_v58, %v11500_v7  ;;  %8079 = vmatmul.mubr.f32.vlgmr.msra.gmra.mrb[0].mxu1 %v3277_v25 }
 0x4b0   :  { %9251 = vmatpush3.bf16.msra.mxu1 %v9250_v28  ;;  %8081 = vmatprep.mubr.msk.f32.mxu1 %vm10411_vm0, %v11308_v43 }
 0x4b1   :  { %v3019_v34 = vadd.f32 %v3018_v50, %v2995_v16  ;;  %9252 = vmatprep.subr.bf16.mxu1 %v12814_v0 }
 0x4b3   :  { %v3020_v13 = vrot.slane %v3019_v34, 4 }
 0x4b5   :  { %v3021_v49 = vadd.f32 %v3020_v13, %v3019_v34  ;;  %v3594_v13 = vld [vmem:[#allocation9 + $0x98] sm:$0xff] }
 0x4b7   :  { %v3022_v60 = vrot.slane %v3021_v49, 2 }
 0x4b9   :  { %v3023_v37 = vadd.f32 %v3022_v60, %v3021_v49  ;;  %v3595_v60 = vld [vmem:[#allocation9 + $0xa0] sm:$0xff] }
 0x4bb   :  { %v3024_v39 = vrot.slane %v3023_v37, 1 }
 0x4bd   :  { %v3025_v47 = vadd.f32 %v3024_v39, %v3023_v37  ;;  %v3596_v37 = vld [vmem:[#allocation9 + $0xa8] sm:$0xff] }
 0x4bf   :  { %v3026_v44 = vmul.f32 0.0078125, %v3025_v47 }
 0x4c1   :  { %v11508_v3 = vsub.f32 %v11330_v53, %v3026_v44  ;;  %v11511_v4 = vsub.f32 %v11333_v55, %v3026_v44  ;;  %v11514_v29 = vsub.f32 %v11344_v62, %v3026_v44  ;;  %v11517_v50 = vsub.f32 %v11349_v5, %v3026_v44 }
 0x4c2   :  { %v11520_v34 = vsub.f32 %v11356_v11, %v3026_v44  ;;  %v11523_v10 = vsub.f32 %v11363_v18, %v3026_v44  ;;  %v11526_v16 = vsub.f32 %v11370_v24, %v3026_v44  ;;  %v11529_v53 = vsub.f32 %v11377_v31, %v3026_v44 }
 0x4c3   :  { %v11532_v55 = vsub.f32 %v11384_v36, %v3026_v44  ;;  %v11535_v62 = vsub.f32 %v11391_v42, %v3026_v44  ;;  %v11538_v5 = vsub.f32 %v11398_v48, %v3026_v44  ;;  %v11541_v11 = vsub.f32 %v11405_v59, %v3026_v44 }
 0x4c4   :  { %v11544_v18 = vsub.f32 %v11412_v6, %v3026_v44  ;;  %v11547_v24 = vsub.f32 %v11419_v15, %v3026_v44  ;;  %v11550_v31 = vsub.f32 %v11426_v23, %v3026_v44  ;;  %v11553_v36 = vsub.f32 %v11433_v1, %v3026_v44 }
 0x4c5   :  { %v11556_v42 = vsub.f32 %v11440_v41, %v3026_v44  ;;  %v11559_v48 = vsub.f32 %v11447_v54, %v3026_v44  ;;  %v11562_v59 = vsub.f32 %v11454_v12, %v3026_v44  ;;  %v11565_v6 = vsub.f32 %v11462_v32, %v3026_v44 }
 0x4c6   :  { %v11568_v15 = vsub.f32 %v11470_v56, %v3026_v44  ;;  %v11571_v23 = vsub.f32 %v11478_v19, %v3026_v44  ;;  %v11574_v1 = vsub.f32 %v11486_v30, %v3026_v44  ;;  %v11576_v41 = vsub.f32 %v9464_v22, %v3026_v44  ;;  %v3593_v30 = vld [vmem:[#allocation9 + $0x90] sm:$0xff] }
 0x4c7   :  { %v11578_v25 = vsub.f32 %v9465_v58, %v3026_v44  ;;  %v3052_v54 = vmul.f32 %v11508_v3, %v11327_v51  ;;  %v3053_v12 = vmul.f32 %v11511_v4, %v11335_v57  ;;  %v3054_v32 = vmul.f32 %v11514_v29, %v11341_v61 }
 0x4c8   :  { %v3055_v19 = vmul.f32 %v11517_v50, %v11351_v8  ;;  %v3056_v22 = vmul.f32 %v11520_v34, %v11358_v14  ;;  %v9253_v39 = vpack.c.bf16 %v3594_v13, %v3593_v30  ;;  %v3057_v47 = vmul.f32 %v11523_v10, %v11365_v20 }
 0x4c9   :  { %v3077_v56 = vmul.f32 %v3052_v54, %v3052_v54  ;;  %v3078_v28 = vmul.f32 %v3053_v12, %v3053_v12  ;;  %v3079_v58 = vmul.f32 %v3054_v32, %v3054_v32  ;;  %v9256_v54 = vpack.c.bf16 %v3596_v37, %v3595_v60  ;;  %v3598_v60 = vld [vmem:[#allocation9 + $0xb8] sm:$0xff] }
 0x4ca   :  { %v3080_v44 = vmul.f32 %v3055_v19, %v3055_v19  ;;  %9254 = vmatpush3.bf16.msra.mxu1 %v9253_v39  ;;  %v3058_v12 = vmul.f32 %v11526_v16, %v11372_v26  ;;  %v3081_v43 = vmul.f32 %v3056_v22, %v3056_v22  ;;  %v12865_v61 = vmov 0.0|0.0  }
 0x4cb   :  { %v3102_v49 = vadd.f32 %v3078_v28, %v3077_v56  ;;  %9255 = vmatprep.subr.bf16.mxu1 %v12865_v61  ;;  %v3059_v32 = vmul.f32 %v11529_v53, %v11379_v33  ;;  %v3082_v56 = vmul.f32 %v3057_v47, %v3057_v47  ;;  %v3060_v30 = vmul.f32 %v11532_v55, %v11386_v38  ;;  %v3602_v38 = vld [vmem:[#allocation9 + $0xd8] sm:$0xff] }
 0x4cc   :  { %v3083_v19 = vmul.f32 %v3058_v12, %v3058_v12  ;;  %v3062_v37 = vmul.f32 %v11538_v5, %v11400_v52  ;;  %v3063_v47 = vmul.f32 %v11541_v11, %v11407_v63  ;;  %v3064_v12 = vmul.f32 %v11544_v18, %v11414_v9 }
 0x4cd   :  { %v3103_v0 = vadd.f32 %v3102_v49, %v3079_v58  ;;  %v3061_v58 = vmul.f32 %v11535_v62, %v11393_v45  ;;  %v3084_v22 = vmul.f32 %v3059_v32, %v3059_v32  ;;  %v3597_v49 = vld [vmem:[#allocation9 + $0xb0] sm:$0xff]  ;;  %v3085_v39 = vmul.f32 %v3060_v30, %v3060_v30 }
 0x4ce   :  { %9257 = vmatpush3.bf16.msra.mxu1 %v9256_v54  ;;  %v3087_v32 = vmul.f32 %v3062_v37, %v3062_v37  ;;  %v3068_v37 = vmul.f32 %v11556_v42, %v11442_v46 }
 0x4cf   :  { %v3104_v8 = vadd.f32 %v3103_v0, %v3080_v44  ;;  %9258 = vmatprep.subr.bf16.mxu1 %v12865_v61  ;;  %v3086_v44 = vmul.f32 %v3061_v58, %v3061_v58  ;;  %v3067_v58 = vmul.f32 %v11553_v36, %v11435_v35 }
 0x4d1   :  { %v3105_v28 = vadd.f32 %v3104_v8, %v3081_v43  ;;  %v9259_v8 = vpack.c.bf16 %v3598_v60, %v3597_v49 }
 0x4d3   :  { %v3106_v13 = vadd.f32 %v3105_v28, %v3082_v56  ;;  %9260 = vmatpush3.bf16.msra.mxu1 %v9259_v8  ;;  %v3065_v28 = vmul.f32 %v11547_v24, %v11421_v17 }
 0x4d4   :  { %9261 = vmatprep.subr.bf16.mxu1 %v12865_v61 }
 0x4d5   :  { %v3107_v0 = vadd.f32 %v3106_v13, %v3083_v19  ;;  %v3088_v19 = vmul.f32 %v3063_v47, %v3063_v47  ;;  %v3066_v13 = vmul.f32 %v11550_v31, %v11428_v27  ;;  %v3090_v49 = vmul.f32 %v3065_v28, %v3065_v28 }
 0x4d6   :  { %v3069_v47 = vmul.f32 %v11559_v48, %v11449_v2  ;;  %v3093_v28 = vmul.f32 %v3068_v37, %v3068_v37 }
 0x4d7   :  { %v3108_v43 = vadd.f32 %v3107_v0, %v3084_v22  ;;  %v3089_v22 = vmul.f32 %v3064_v12, %v3064_v12  ;;  %v3091_v8 = vmul.f32 %v3066_v13, %v3066_v13  ;;  %v3070_v12 = vmul.f32 %v11562_v59, %v11457_v21 }
 0x4d9   :  { %v3109_v54 = vadd.f32 %v3108_v43, %v3085_v39  ;;  %v3599_v39 = vld [vmem:[#allocation9 + $0xc0] sm:$0xff]  ;;  %v3600_v43 = vld [vmem:[#allocation9 + $0xc8] sm:$0xff] }
 0x4db   :  { %v3110_v56 = vadd.f32 %v3109_v54, %v3086_v44  ;;  %v9262_v54 = vpack.c.bf16 %v3600_v43, %v3599_v39 }
 0x4dd   :  { %v3111_v30 = vadd.f32 %v3110_v56, %v3087_v32  ;;  %v3092_v32 = vmul.f32 %v3067_v58, %v3067_v58  ;;  %9263 = vmatpush3.bf16.msra.mxu1 %v9262_v54  ;;  %v12867_v58 = vld [vmem:[#allocation27_spill] sm:$0xff]  ;;  %v12868_v54 = vld [vmem:[#allocation28_spill] sm:$0xff] }
 0x4de   :  { %9264 = vmatprep.subr.bf16.mxu1 %v12865_v61  ;;  %v3073_v43 = vmul.f32 %v11571_v23, %v12867_v58  ;;  %v3074_v52 = vmul.f32 %v11574_v1, %v12868_v54 }
 0x4df   :  { %v3112_v0 = vadd.f32 %v3111_v30, %v3088_v19  ;;  %v3071_v30 = vmul.f32 %v11565_v6, %v11465_v40 }
 0x4e1   :  { %v3113_v60 = vadd.f32 %v3112_v0, %v3089_v22  ;;  %v3094_v22 = vmul.f32 %v3069_v47, %v3069_v47  ;;  %v12866_v0 = vld [vmem:[#allocation26_spill] sm:$0xff]  ;;  %v3098_v47 = vmul.f32 %v3073_v43, %v3073_v43  ;;  %v3603_v43 = vld [vmem:[#allocation9 + $0xe0] sm:$0xff] }
 0x4e3   :  { %v3114_v44 = vadd.f32 %v3113_v60, %v3090_v49  ;;  %v3072_v49 = vmul.f32 %v11568_v15, %v12866_v0  ;;  %v3095_v60 = vmul.f32 %v3070_v12, %v3070_v12  ;;  %v3076_v12 = vmul.f32 %v11578_v25, %v11500_v7 }
 0x4e5   :  { %v3115_v56 = vadd.f32 %v3114_v44, %v3091_v8  ;;  %v3096_v8 = vmul.f32 %v3071_v30, %v3071_v30  ;;  %v3097_v37 = vmul.f32 %v3072_v49, %v3072_v49  ;;  %v3101_v49 = vmul.f32 %v3076_v12, %v3076_v12 }
 0x4e6   :  { %v3137_v12 = vlaneseq }
 0x4e7   :  { %v3116_v19 = vadd.f32 %v3115_v56, %v3092_v32  ;;  %v12869_v56 = vld [vmem:[#allocation29_spill] sm:$0xff] }
 0x4e8   :  { %v3075_v45 = vmul.f32 %v11576_v41, %v12869_v56 }
 0x4e9   :  { %v3117_v13 = vadd.f32 %v3116_v19, %v3093_v28  ;;  %v3601_v19 = vld [vmem:[#allocation9 + $0xd0] sm:$0xff] }
 0x4ea   :  { %v9265_v9 = vpack.c.bf16 %v3602_v38, %v3601_v19  ;;  %v3100_v30 = vmul.f32 %v3075_v45, %v3075_v45  ;;  %v3606_v19 = vld [vmem:[#allocation9 + $0xf8] sm:$0xff] }
 0x4eb   :  { %v3118_v39 = vadd.f32 %v3117_v13, %v3094_v22  ;;  %v3099_v22 = vmul.f32 %v3074_v52, %v3074_v52 }
 0x4ec   :  { %9266 = vmatpush3.bf16.msra.mxu1 %v9265_v9 }
 0x4ed   :  { %v3119_v44 = vadd.f32 %v3118_v39, %v3095_v60  ;;  %9267 = vmatprep.subr.bf16.mxu1 %v12865_v61 }
 0x4ef   :  { %v3120_v32 = vadd.f32 %v3119_v44, %v3096_v8 }
 0x4f1   :  { %v3121_v28 = vadd.f32 %v3120_v32, %v3097_v37  ;;  %v3604_v37 = vld [vmem:[#allocation9 + $0xe8] sm:$0xff] }
 0x4f2   :  { %v9268_v32 = vpack.c.bf16 %v3604_v37, %v3603_v43  ;;  %v11662_v37 = vld [vmem:[%s12800_s5] ss:$0 sm:$0xff] }
 0x4f3   :  { %v3122_v13 = vadd.f32 %v3121_v28, %v3098_v47  ;;  %v3605_v28 = vld [vmem:[#allocation9 + $0xf0] sm:$0xff] }
 0x4f4   :  { %9269 = vmatpush3.bf16.msra.mxu1 %v9268_v32 }
 0x4f5   :  { %v3123_v60 = vadd.f32 %v3122_v13, %v3099_v22  ;;  %9270 = vmatprep.subr.bf16.mxu1 %v12865_v61  ;;  %v9271_v22 = vpack.c.bf16 %v3606_v19, %v3605_v28  ;;  %v11637_v13 = vshrl.u32 %v3137_v12, 7 }
 0x4f7   :  { %v3124_v39 = vadd.f32 %v3123_v60, %v3100_v30  ;;  %12870 = vst [vmem:[#allocation31_spill] sm:$0xff] %v11637_v13 }
 0x4f8   :  { %9272 = vmatpush3.bf16.msra.mxu1 %v9271_v22 }
 0x4f9   :  { %v3125_v8 = vadd.f32 %v3124_v39, %v3101_v49  ;;  %9273 = vmatprep.subr.bf16.mxu1 %v12865_v61 }
 0x4fb   :  { %v3126_v44 = vrot.slane %v3125_v8, 4 }
 0x4fd   :  { %v3127_v63 = vadd.f32 %v3126_v44, %v3125_v8 }
 0x4ff   :  { %v3128_v17 = vrot.slane %v3127_v63, 2 }
 0x501   :  { %v3129_v38 = vadd.f32 %v3128_v17, %v3127_v63  ;;  %v3135_v63 = vld [vmem:[%s12799_s4] sm:$0x1]  ;;  %v12834_v17 = vsub.s32 0, %v11637_v13  ;;  %v4512_v13 = vld [vmem:[#allocation9 + $0x200] sm:$0xff] }
 0x503   :  { %v3130_v52 = vrot.slane %v3129_v38, 1 }
 0x505   :  { %v3131_v47 = vadd.f32 %v3130_v52, %v3129_v38 }
 0x507   :  { %v3132_v9 = vmul.f32 0.0078125, %v3131_v47 }
 0x509   :  { %v3133_v45 = vadd.f32 1e-05, %v3132_v9 }
 0x50b   :  { %10303 = vrsqrt.f32 %v3133_v45 }
 0x515   :  { %v10304_v30 = vpop.eup %10303 }
 0x516   :  { %v3136_v60 = vmul.f32 %v10304_v30, %v3135_v63 }
 0x518   :  { %v11645_v49 = vrot.slane %v3136_v60, %v12834_v17 }
 0x51a   :  { %v11649_v39 = vmul.f32 %v11645_v49, %v11541_v11  ;;  %v11653_v8 = vmul.f32 %v11645_v49, %v11544_v18  ;;  %v3154_v44 = vmul.f32 %v11645_v49, %v11547_v24  ;;  %v3155_v43 = vmul.f32 %v11645_v49, %v11550_v31 }
 0x51b   :  { %v3156_v32 = vmul.f32 %v11645_v49, %v11553_v36  ;;  %v3157_v11 = vmul.f32 %v11645_v49, %v11556_v42  ;;  %v3158_v18 = vmul.f32 %v11645_v49, %v11559_v48  ;;  %v3159_v24 = vmul.f32 %v11645_v49, %v11562_v59 }
 0x51c   :  { %v3160_v31 = vmul.f32 %v11645_v49, %v11565_v6  ;;  %v3161_v38 = vmul.f32 %v11645_v49, %v11568_v15  ;;  %v3162_v52 = vmul.f32 %v11645_v49, %v11571_v23  ;;  %v3163_v36 = vmul.f32 %v11645_v49, %v11574_v1 }
 0x51d   :  { %v3164_v42 = vmul.f32 %v11645_v49, %v11576_v41  ;;  %v3165_v48 = vmul.f32 %v11645_v49, %v11578_v25  ;;  %v11685_v59 = vadd.f32 %v11662_v37, %v3154_v44  ;;  %v11688_v6 = vadd.f32 %v11662_v37, %v3155_v43 }
 0x51e   :  { %v11691_v15 = vadd.f32 %v11662_v37, %v3156_v32  ;;  %v3189_v23 = vadd.f32 %v11662_v37, %v3157_v11  ;;  %v3190_v47 = vadd.f32 %v11662_v37, %v3158_v18  ;;  %v3191_v1 = vadd.f32 %v11662_v37, %v3159_v24 }
 0x51f   :  { %v3192_v41 = vadd.f32 %v11662_v37, %v3160_v31  ;;  %v3193_v9 = vadd.f32 %v11662_v37, %v3161_v38  ;;  %v3194_v25 = vadd.f32 %v11662_v37, %v3162_v52  ;;  %v3195_v45 = vadd.f32 %v11662_v37, %v3163_v36 }
 0x520   :  { %v3196_v28 = vadd.f32 %v11662_v37, %v3164_v42  ;;  %v3197_v19 = vadd.f32 %v11662_v37, %v3165_v48  ;;  %v3212_v22 = vmax.f32 %v11688_v6, 0.0  ;;  %v3213_v12 = vmax.f32 %v11691_v15, 0.0  ;;  %v12875_v15 = vld [vmem:[#allocation21_spill] sm:$0xff] }
 0x521   :  { %v3214_v63 = vmax.f32 %v3189_v23, 0.0  ;;  %v3215_v30 = vmax.f32 %v3190_v47, 0.0  ;;  %v3216_v60 = vmax.f32 %v3191_v1, 0.0  ;;  %v3217_v44 = vmax.f32 %v3192_v41, 0.0 }
 0x522   :  { %v3218_v43 = vmax.f32 %v3193_v9, 0.0  ;;  %v3219_v32 = vmax.f32 %v3194_v25, 0.0  ;;  %v3220_v11 = vmax.f32 %v3195_v45, 0.0  ;;  %v3221_v18 = vmax.f32 %v3196_v28, 0.0 }
 0x523   :  { %v3222_v24 = vmax.f32 %v3197_v19, 0.0  ;;  %v3243_v31 = vmul.f32 %v3214_v63, %v11442_v46  ;;  %v3244_v38 = vmul.f32 %v3215_v30, %v11449_v2  ;;  %v3245_v52 = vmul.f32 %v3216_v60, %v11457_v21  ;;  %v4516_v21 = vld [vmem:[#allocation9 + $0x220] sm:$0xff]  ;;  %v4517_v2 = vld [vmem:[#allocation9 + $0x228] sm:$0xff] }
 0x524   :  { %v3246_v36 = vmul.f32 %v3217_v44, %v11465_v40  ;;  %v3247_v42 = vmul.f32 %v3218_v43, %v12866_v0  ;;  %v3248_v48 = vmul.f32 %v3219_v32, %v12867_v58  ;;  %v3249_v23 = vmul.f32 %v3220_v11, %v12868_v54  ;;  %v4514_v58 = vld [vmem:[#allocation9 + $0x210] sm:$0xff]  ;;  %v4515_v0 = vld [vmem:[#allocation9 + $0x218] sm:$0xff] }
 0x525   :  { %v3250_v47 = vmul.f32 %v3221_v18, %v12869_v56  ;;  %v3251_v1 = vmul.f32 %v3222_v24, %v11500_v7  ;;  %3270 = vst [vmem:[#allocation2 + $0xa0] sm:$0xff] %v3245_v52  ;;  %3268 = vst [vmem:[#allocation2 + $0x90] sm:$0xff] %v3243_v31  ;;  %v3141_v41 = vmul.f32 %v11645_v49, %v11508_v3  ;;  %v4513_v7 = vld [vmem:[#allocation9 + $0x208] sm:$0xff] }
 0x526   :  { %3269 = vst [vmem:[#allocation2 + $0x98] sm:$0xff] %v3244_v38  ;;  %v3142_v9 = vmul.f32 %v11645_v49, %v11511_v4  ;;  %3271 = vst [vmem:[#allocation2 + $0xa8] sm:$0xff] %v3246_v36  ;;  %v3143_v25 = vmul.f32 %v11645_v49, %v11514_v29  ;;  %v3144_v45 = vmul.f32 %v11645_v49, %v11517_v50  ;;  %v12871_v36 = vld [vmem:[#allocation15_spill] sm:$0xff] }
 0x527   :  { %3272 = vst [vmem:[#allocation2 + $0xb0] sm:$0xff] %v3247_v42  ;;  %3273 = vst [vmem:[#allocation2 + $0xb8] sm:$0xff] %v3248_v48  ;;  %v3145_v28 = vmul.f32 %v11645_v49, %v11520_v34  ;;  %v3146_v19 = vmul.f32 %v11645_v49, %v11523_v10  ;;  %v3173_v3 = vadd.f32 %v11662_v37, %v3141_v41  ;;  %v12872_v48 = vld [vmem:[#allocation16_spill] sm:$0xff] }
 0x528   :  { %3274 = vst [vmem:[#allocation2 + $0xc0] sm:$0xff] %v3249_v23  ;;  %3275 = vst [vmem:[#allocation2 + $0xc8] sm:$0xff] %v3250_v47  ;;  %v3174_v4 = vadd.f32 %v11662_v37, %v3142_v9  ;;  %v3147_v63 = vmul.f32 %v11645_v49, %v11526_v16  ;;  %v3148_v29 = vmul.f32 %v11645_v49, %v11529_v53 }
 0x529   :  { %3276 = vst [vmem:[#allocation2 + $0xd0] sm:$0xff] %v3251_v1  ;;  %v3175_v50 = vadd.f32 %v11662_v37, %v3143_v25  ;;  %v3176_v30 = vadd.f32 %v11662_v37, %v3144_v45  ;;  %v3177_v34 = vadd.f32 %v11662_v37, %v3145_v28  ;;  %v3178_v10 = vadd.f32 %v11662_v37, %v3146_v19 }
 0x52a   :  { %v3198_v60 = vmax.f32 %v3173_v3, 0.0  ;;  %v3199_v44 = vmax.f32 %v3174_v4, 0.0  ;;  %v3179_v43 = vadd.f32 %v11662_v37, %v3147_v63  ;;  %v3180_v32 = vadd.f32 %v11662_v37, %v3148_v29  ;;  %v12873_v63 = vld [vmem:[#allocation22_spill] sm:$0xff] }
 0x52b   :  { %v3200_v11 = vmax.f32 %v3175_v50, 0.0  ;;  %v3201_v18 = vmax.f32 %v3176_v30, 0.0  ;;  %v3202_v16 = vmax.f32 %v3177_v34, 0.0  ;;  %v3203_v24 = vmax.f32 %v3178_v10, 0.0 }
 0x52c   :  { %v3227_v53 = vmul.f32 %v3198_v60, %v11327_v51  ;;  %v3228_v31 = vmul.f32 %v3199_v44, %v11335_v57  ;;  %v3204_v38 = vmax.f32 %v3179_v43, 0.0  ;;  %v3205_v52 = vmax.f32 %v3180_v32, 0.0  ;;  %v12877_v60 = vld [vmem:[#allocation18_spill] sm:$0xff]  ;;  %v12878_v32 = vld [vmem:[#allocation19_spill] sm:$0xff] }
 0x52d   :  { %v3229_v42 = vmul.f32 %v3200_v11, %v12871_v36  ;;  %v11741_v23 = vmul.f32 %v3201_v18, %v12872_v48  ;;  %v11744_v47 = vmul.f32 %v3202_v16, %v11358_v14  ;;  %v11747_v1 = vmul.f32 %v3203_v24, %v11365_v20  ;;  %v12879_v18 = vld [vmem:[#allocation14_spill] sm:$0xff] }
 0x52e   :  { %3252 = vst [vmem:[#allocation2 + $0x10] sm:$0xff] %v3227_v53  ;;  %3253 = vst [vmem:[#allocation2 + $0x18] sm:$0xff] %v3228_v31  ;;  %v11750_v41 = vmul.f32 %v3204_v38, %v11372_v26  ;;  %v11753_v9 = vmul.f32 %v3205_v52, %v11379_v33  ;;  %v3149_v25 = vmul.f32 %v11645_v49, %v11532_v55  ;;  %v3211_v55 = vmax.f32 %v11685_v59, 0.0  ;;  %v11818_v38 = vld [vmem:[#allocation2] sm:$0xff] }
 0x52f   :  { %v3150_v45 = vmul.f32 %v11645_v49, %v11535_v62  ;;  %3254 = vst [vmem:[#allocation2 + $0x20] sm:$0xff] %v3229_v42  ;;  %3255 = vst [vmem:[#allocation2 + $0x28] sm:$0xff] %v11741_v23  ;;  %v3151_v28 = vmul.f32 %v11645_v49, %v11538_v5  ;;  %v3184_v19 = vadd.f32 %v11662_v37, %v11649_v39  ;;  %v12038_v17 = vld [vmem:[#allocation2 + $0xbf] sm:$0xff]  ;;  %v12043_v56 = vld [vmem:[#allocation2 + $0xc7] sm:$0xff] }
 0x530   :  { %3256 = vst [vmem:[#allocation2 + $0x30] sm:$0xff] %v11744_v47  ;;  %3257 = vst [vmem:[#allocation2 + $0x38] sm:$0xff] %v11747_v1  ;;  %v3185_v3 = vadd.f32 %v11662_v37, %v11653_v8  ;;  %v3181_v62 = vadd.f32 %v11662_v37, %v3149_v25  ;;  %v11776_v5 = vmul.f32 %v3212_v22, %v11428_v27  ;;  %v12874_v22 = vld [vmem:[#allocation20_spill] sm:$0xff] }
 0x531   :  { %3258 = vst [vmem:[#allocation2 + $0x40] sm:$0xff] %v11750_v41  ;;  %3259 = vst [vmem:[#allocation2 + $0x48] sm:$0xff] %v11753_v9  ;;  %v3182_v4 = vadd.f32 %v11662_v37, %v3150_v45  ;;  %v11781_v49 = vmul.f32 %v3213_v12, %v11435_v35  ;;  %v3183_v39 = vadd.f32 %v11662_v37, %v3151_v28  ;;  %v3209_v8 = vmax.f32 %v3184_v19, 0.0  ;;  %v12876_v37 = vld [vmem:[#allocation17_spill] sm:$0xff] }
 0x532   :  { %v3210_v59 = vmax.f32 %v3185_v3, 0.0  ;;  %v11785_v29 = vmul.f32 %v3211_v55, %v12873_v63  ;;  %v3206_v50 = vmax.f32 %v3181_v62, 0.0  ;;  %3266 = vst [vmem:[#allocation2 + $0x80] sm:$0xff] %v11776_v5  ;;  %v9322_v54 = vpack.c.bf16 %v4513_v7, %v4512_v13  ;;  %v4518_v13 = vld [vmem:[#allocation9 + $0x230] sm:$0xff] }
 0x533   :  { %v3207_v30 = vmax.f32 %v3182_v4, 0.0  ;;  %3267 = vst [vmem:[#allocation2 + $0x88] sm:$0xff] %v11781_v49  ;;  %v3208_v6 = vmax.f32 %v3183_v39, 0.0  ;;  %v11790_v34 = vmul.f32 %v3209_v8, %v12874_v22  ;;  %v9325_v40 = vpack.c.bf16 %v4515_v0, %v4514_v58  ;;  %v4520_v58 = vld [vmem:[#allocation9 + $0x240] sm:$0xff] }
 0x534   :  { %v11793_v12 = vmul.f32 %v3210_v59, %v12875_v15  ;;  %3265 = vst [vmem:[#allocation2 + $0x78] sm:$0xff] %v11785_v29  ;;  %v11797_v10 = vmul.f32 %v3206_v50, %v12876_v37  ;;  %v3295_v59 = vld [vmem:[#allocation2 + $0x95] sm:$0xff]  ;;  %v3296_v50 = vld [vmem:[#allocation2 + $0x9d] sm:$0xff]  ;;  %v9328_v7 = vpack.c.bf16 %v4517_v2, %v4516_v21 }
 0x535   :  { %v11800_v44 = vmul.f32 %v3207_v30, %v12877_v60  ;;  %v3278_v43 = vld [vmem:[#allocation2 + $0xd] sm:$0xff]  ;;  %v11803_v11 = vmul.f32 %v3208_v6, %v12878_v32  ;;  %3263 = vst [vmem:[#allocation2 + $0x68] sm:$0xff] %v11790_v34  ;;  %v3279_v16 = vld [vmem:[#allocation2 + $0x15] sm:$0xff]  ;;  %v3297_v30 = vld [vmem:[#allocation2 + $0xa5] sm:$0xff] }
 0x536   :  { %3264 = vst [vmem:[#allocation2 + $0x70] sm:$0xff] %v11793_v12  ;;  %8082 = vmatmul.mubr.f32.gmra.mrb[2].mxu1 %v3278_v43  ;;  %3260 = vst [vmem:[#allocation2 + $0x50] sm:$0xff] %v11797_v10  ;;  %v3280_v24 = vld [vmem:[#allocation2 + $0x1d] sm:$0xff]  ;;  %v3281_v53 = vld [vmem:[#allocation2 + $0x25] sm:$0xff] }
 0x537   :  { %3261 = vst [vmem:[#allocation2 + $0x58] sm:$0xff] %v11800_v44  ;;  %8084 = vmatprep.mubr.msk.f32.mxu1 %vm10411_vm0, %v12879_v18  ;;  %3262 = vst [vmem:[#allocation2 + $0x60] sm:$0xff] %v11803_v11  ;;  %v3282_v31 = vld [vmem:[#allocation2 + $0x2d] sm:$0xff]  ;;  %v3283_v52 = vld [vmem:[#allocation2 + $0x35] sm:$0xff] }
 0x538   :  { %v3284_v42 = vld [vmem:[#allocation2 + $0x3d] sm:$0xff]  ;;  %v3285_v25 = vld [vmem:[#allocation2 + $0x45] sm:$0xff]  ;;  %v3298_v6 = vld [vmem:[#allocation2 + $0xad] sm:$0xff] }
 0x539   :  { %v3299_v43 = vld [vmem:[#allocation2 + $0xb5] sm:$0xff]  ;;  %v4522_v21 = vld [vmem:[#allocation9 + $0x250] sm:$0xff] }
 0x53a   :  { %8085 = vmatmul.mubr.f32.gmra.mrb[4].mxu1 %v3279_v16  ;;  %v3293_v39 = vld [vmem:[#allocation2 + $0x85] sm:$0xff]  ;;  %v3294_v8 = vld [vmem:[#allocation2 + $0x8d] sm:$0xff] }
 0x53b   :  { %8087 = vmatprep.mubr.msk.f32.mxu1 %vm10411_vm0, %v12879_v18  ;;  %v3292_v4 = vld [vmem:[#allocation2 + $0x7d] sm:$0xff]  ;;  %v3898_v16 = vld [vmem:[#allocation9 + $0x100] sm:$0xff] }
 0x53d   :  { %v3286_v45 = vld [vmem:[#allocation2 + $0x4d] sm:$0xff]  ;;  %v3291_v62 = vld [vmem:[#allocation2 + $0x75] sm:$0xff] }
 0x53e   :  { %8088 = vmatmul.mubr.f32.gmra.mrb[6].mxu1 %v3280_v24  ;;  %v3287_v28 = vld [vmem:[#allocation2 + $0x55] sm:$0xff]  ;;  %v3288_v19 = vld [vmem:[#allocation2 + $0x5d] sm:$0xff]  ;;  %v3289_v3 = vld [vmem:[#allocation2 + $0x65] sm:$0xff] }
 0x53f   :  { %8090 = vmatprep.mubr.msk.f32.mxu1 %vm10411_vm0, %v12879_v18  ;;  %v3290_v55 = vld [vmem:[#allocation2 + $0x6d] sm:$0xff]  ;;  %v3899_v24 = vld [vmem:[#allocation9 + $0x108] sm:$0xff] }
 0x542   :  { %8091 = vmatmul.mubr.f32.gmra.mrb[8].mxu1 %v3281_v53  ;;  %v3301_v53 = vld [vmem:[#allocation2 + $0xc5] sm:$0xff] }
 0x543   :  { %8093 = vmatprep.mubr.msk.f32.mxu1 %vm10411_vm0, %v12879_v18  ;;  %v3300_v18 = vld [vmem:[#allocation2 + $0xbd] sm:$0xff] }
 0x546   :  { %8094 = vmatmul.mubr.f32.gmra.mrb[10].mxu1 %v3282_v31  ;;  %v3565_v31 = vld [vmem:[#allocation2 + $0x6] sm:$0xff] }
 0x547   :  { %8096 = vmatprep.mubr.msk.f32.mxu1 %vm10411_vm0, %v11818_v38 }
 0x54a   :  { %8097 = vmatmul.mubr.f32.gmra.mrb[12].mxu1 %v3283_v52  ;;  %v9274_v52 = vpack.c.bf16 %v3899_v24, %v3898_v16  ;;  %v3569_v16 = vld [vmem:[#allocation2 + $0x26] sm:$0xff] }
 0x54b   :  { %8099 = vmatprep.mubr.msk.f32.mxu1 %vm10411_vm0, %v11818_v38 }
 0x54e   :  { %8100 = vmatmul.mubr.f32.gmra.mrb[14].mxu1 %v3284_v42  ;;  %v3900_v42 = vld [vmem:[#allocation9 + $0x110] sm:$0xff] }
 0x54f   :  { %8102 = vmatprep.mubr.msk.f32.mxu1 %vm10411_vm0, %v11818_v38 }
 0x552   :  { %8103 = vmatmul.mubr.f32.gmra.mrb[16].mxu1 %v3285_v25  ;;  %v3901_v25 = vld [vmem:[#allocation9 + $0x118] sm:$0xff] }
 0x553   :  { %8105 = vmatprep.mubr.msk.f32.mxu1 %vm10411_vm0, %v11818_v38 }
 0x556   :  { %8106 = vmatmul.mubr.f32.gmra.mrb[18].mxu1 %v3286_v45  ;;  %v9277_v45 = vpack.c.bf16 %v3901_v25, %v3900_v42  ;;  %v3912_v25 = vld [vmem:[#allocation9 + $0x170] sm:$0xff] }
 0x557   :  { %8108 = vmatprep.mubr.msk.f32.mxu1 %vm10411_vm0, %v11818_v38 }
 0x55a   :  { %8109 = vmatmul.mubr.f32.gmra.mrb[20].mxu1 %v3287_v28  ;;  %v3902_v28 = vld [vmem:[#allocation9 + $0x120] sm:$0xff] }
 0x55b   :  { %8111 = vmatprep.mubr.msk.f32.mxu1 %vm10411_vm0, %v11818_v38 }
 0x55e   :  { %8112 = vmatmul.mubr.f32.gmra.mrb[22].mxu1 %v3288_v19  ;;  %v3903_v19 = vld [vmem:[#allocation9 + $0x128] sm:$0xff] }
 0x55f   :  { %8114 = vmatprep.mubr.msk.f32.mxu1 %vm10411_vm0, %v11818_v38 }
 0x562   :  { %8115 = vmatmul.mubr.f32.gmra.mrb[24].mxu1 %v3289_v3  ;;  %v3566_v3 = vld [vmem:[#allocation2 + $0xe] sm:$0xff] }
 0x563   :  { %8117 = vmatprep.mubr.msk.f32.mxu1 %vm10411_vm0, %v11818_v38 }
 0x566   :  { %8118 = vmatmul.mubr.f32.gmra.mrb[26].mxu1 %v3290_v55  ;;  %v9280_v55 = vpack.c.bf16 %v3903_v19, %v3902_v28  ;;  %v3571_v28 = vld [vmem:[#allocation2 + $0x36] sm:$0xff] }
 0x567   :  { %8120 = vmatprep.mubr.msk.f32.mxu1 %vm10411_vm0, %v11818_v38 }
 0x56a   :  { %8121 = vmatmul.mubr.f32.gmra.mrb[28].mxu1 %v3291_v62  ;;  %v3904_v62 = vld [vmem:[#allocation9 + $0x130] sm:$0xff] }
 0x56b   :  { %8123 = vmatprep.mubr.msk.f32.mxu1 %vm10411_vm0, %v11818_v38 }
 0x56e   :  { %8124 = vmatmul.mubr.f32.gmra.mrb[30].mxu1 %v3292_v4  ;;  %v3905_v4 = vld [vmem:[#allocation9 + $0x138] sm:$0xff] }
 0x56f   :  { %8126 = vmatprep.mubr.msk.f32.mxu1 %vm10411_vm0, %v11818_v38 }
 0x572   :  { %8127 = vmatmul.mubr.f32.gmra.mrb[32].mxu1 %v3293_v39  ;;  %v3567_v39 = vld [vmem:[#allocation2 + $0x16] sm:$0xff] }
 0x573   :  { %8129 = vmatprep.mubr.msk.f32.mxu1 %vm10411_vm0, %v11818_v38 }
 0x576   :  { %8130 = vmatmul.mubr.f32.gmra.mrb[34].mxu1 %v3294_v8  ;;  %v9283_v8 = vpack.c.bf16 %v3905_v4, %v3904_v62  ;;  %v3574_v62 = vld [vmem:[#allocation2 + $0x4e] sm:$0xff]  ;;  %v3575_v4 = vld [vmem:[#allocation2 + $0x56] sm:$0xff] }
 0x577   :  { %8132 = vmatprep.mubr.msk.f32.mxu1 %vm10411_vm0, %v11818_v38 }
 0x57a   :  { %8133 = vmatmul.mubr.f32.gmra.mrb[36].mxu1 %v3295_v59  ;;  %v3906_v59 = vld [vmem:[#allocation9 + $0x140] sm:$0xff] }
 0x57b   :  { %8135 = vmatprep.mubr.msk.f32.mxu1 %vm10411_vm0, %v11818_v38 }
 0x57e   :  { %8136 = vmatmul.mubr.f32.gmra.mrb[38].mxu1 %v3296_v50  ;;  %v3907_v50 = vld [vmem:[#allocation9 + $0x148] sm:$0xff] }
 0x57f   :  { %8138 = vmatprep.mubr.msk.f32.mxu1 %vm10411_vm0, %v11818_v38 }
 0x582   :  { %8139 = vmatmul.mubr.f32.gmra.mrb[40].mxu1 %v3297_v30  ;;  %v3568_v30 = vld [vmem:[#allocation2 + $0x1e] sm:$0xff] }
 0x583   :  { %8141 = vmatprep.mubr.msk.f32.mxu1 %vm10411_vm0, %v11818_v38 }
 0x586   :  { %8142 = vmatmul.mubr.f32.gmra.mrb[42].mxu1 %v3298_v6  ;;  %v9286_v6 = vpack.c.bf16 %v3907_v50, %v3906_v59  ;;  %v3578_v59 = vld [vmem:[#allocation2 + $0x6e] sm:$0xff]  ;;  %v3579_v50 = vld [vmem:[#allocation2 + $0x76] sm:$0xff] }
 0x587   :  { %8144 = vmatprep.mubr.msk.f32.mxu1 %vm10411_vm0, %v11818_v38 }
 0x58a   :  { %8145 = vmatmul.mubr.f32.gmra.mrb[44].mxu1 %v3299_v43  ;;  %v3908_v43 = vld [vmem:[#allocation9 + $0x150] sm:$0xff] }
 0x58b   :  { %8147 = vmatprep.mubr.msk.f32.mxu1 %vm10411_vm0, %v11818_v38 }
 0x58e   :  { %8148 = vmatmul.mubr.f32.gmra.mrb[46].mxu1 %v3300_v18  ;;  %v3909_v18 = vld [vmem:[#allocation9 + $0x158] sm:$0xff] }
 0x58f   :  { %8150 = vmatprep.mubr.msk.f32.mxu1 %vm10411_vm0, %v11818_v38  ;;  %v9289_v24 = vpack.c.bf16 %v3909_v18, %v3908_v43  ;;  %v3582_v43 = vld [vmem:[#allocation2 + $0x8e] sm:$0xff]  ;;  %v3583_v18 = vld [vmem:[#allocation2 + $0x96] sm:$0xff] }
 0x592   :  { %8151 = vmatmul.mubr.f32.gmra.mrb[48].mxu1 %v3301_v53  ;;  %v3910_v53 = vld [vmem:[#allocation9 + $0x160] sm:$0xff] }
 0x593   :  { %8185 = vmatprep.mubr.msk.f32.mxu1 %vm10411_vm0, %v11818_v38 }
 0x596   :  { %8186 = vmatmul.mubr.f32.vlgmr.msra.gmra.mrb[0].mxu1 %v3565_v31  ;;  %v3911_v31 = vld [vmem:[#allocation9 + $0x168] sm:$0xff] }
 0x597   :  { %9275 = vmatpush3.bf16.msra.mxu1 %v9274_v52  ;;  %8188 = vmatprep.mubr.msk.f32.mxu1 %vm10411_vm0, %v11818_v38  ;;  %v3570_v52 = vld [vmem:[#allocation2 + $0x2e] sm:$0xff]  ;;  %v9292_v42 = vpack.c.bf16 %v3911_v31, %v3910_v53  ;;  %v3587_v31 = vld [vmem:[#allocation2 + $0xb6] sm:$0xff] }
 0x598   :  { %9276 = vmatprep.subr.bf16.mxu1 %v12865_v61  ;;  %v3586_v53 = vld [vmem:[#allocation2 + $0xae] sm:$0xff] }
 0x59a   :  { %8189 = vmatmul.mubr.f32.gmra.mrb[2].mxu1 %v3566_v3  ;;  %v3572_v3 = vld [vmem:[#allocation2 + $0x3e] sm:$0xff] }
 0x59b   :  { %8191 = vmatprep.mubr.msk.f32.mxu1 %vm10411_vm0, %v11818_v38  ;;  %9278 = vmatpush3.bf16.msra.mxu1 %v9277_v45  ;;  %v3913_v45 = vld [vmem:[#allocation9 + $0x178] sm:$0xff] }
 0x59c   :  { %9279 = vmatprep.subr.bf16.mxu1 %v12865_v61  ;;  %v9295_v19 = vpack.c.bf16 %v3913_v45, %v3912_v25  ;;  %v4206_v25 = vld [vmem:[#allocation9 + $0x188] sm:$0xff]  ;;  %v3589_v45 = vld [vmem:[#allocation2 + $0xc6] sm:$0xff] }
 0x59e   :  { %8192 = vmatmul.mubr.f32.gmra.mrb[4].mxu1 %v3567_v39  ;;  %v3576_v39 = vld [vmem:[#allocation2 + $0x5e] sm:$0xff] }
 0x59f   :  { %8194 = vmatprep.mubr.msk.f32.mxu1 %vm10411_vm0, %v11818_v38  ;;  %9281 = vmatpush3.bf16.msra.mxu1 %v9280_v55  ;;  %v3573_v55 = vld [vmem:[#allocation2 + $0x46] sm:$0xff] }
 0x5a0   :  { %9282 = vmatprep.subr.bf16.mxu1 %v12865_v61 }
 0x5a2   :  { %8195 = vmatmul.mubr.f32.gmra.mrb[6].mxu1 %v3568_v30  ;;  %v3580_v30 = vld [vmem:[#allocation2 + $0x7e] sm:$0xff] }
 0x5a3   :  { %8197 = vmatprep.mubr.msk.f32.mxu1 %vm10411_vm0, %v11818_v38  ;;  %9284 = vmatpush3.bf16.msra.mxu1 %v9283_v8  ;;  %v3577_v8 = vld [vmem:[#allocation2 + $0x66] sm:$0xff] }
 0x5a4   :  { %9285 = vmatprep.subr.bf16.mxu1 %v12865_v61 }
 0x5a6   :  { %8198 = vmatmul.mubr.f32.gmra.mrb[8].mxu1 %v3569_v16  ;;  %v3584_v16 = vld [vmem:[#allocation2 + $0x9e] sm:$0xff] }
 0x5a7   :  { %8200 = vmatprep.mubr.msk.f32.mxu1 %vm10411_vm0, %v11818_v38  ;;  %9287 = vmatpush3.bf16.msra.mxu1 %v9286_v6  ;;  %v3581_v6 = vld [vmem:[#allocation2 + $0x86] sm:$0xff] }
 0x5a8   :  { %9288 = vmatprep.subr.bf16.mxu1 %v12865_v61 }
 0x5aa   :  { %8201 = vmatmul.mubr.f32.gmra.mrb[10].mxu1 %v3570_v52  ;;  %v3588_v52 = vld [vmem:[#allocation2 + $0xbe] sm:$0xff] }
 0x5ab   :  { %8203 = vmatprep.mubr.msk.f32.mxu1 %vm10411_vm0, %v11818_v38  ;;  %9290 = vmatpush3.bf16.msra.mxu1 %v9289_v24  ;;  %v3585_v24 = vld [vmem:[#allocation2 + $0xa6] sm:$0xff] }
 0x5ac   :  { %9291 = vmatprep.subr.bf16.mxu1 %v12865_v61 }
 0x5ae   :  { %8204 = vmatmul.mubr.f32.gmra.mrb[12].mxu1 %v3571_v28  ;;  %v3872_v28 = vld [vmem:[#allocation2 + $0x7] sm:$0xff] }
 0x5af   :  { %8206 = vmatprep.mubr.msk.f32.mxu1 %vm10411_vm0, %v11818_v38  ;;  %9293 = vmatpush3.bf16.msra.mxu1 %v9292_v42  ;;  %v4205_v42 = vld [vmem:[#allocation9 + $0x180] sm:$0xff] }
 0x5b0   :  { %9294 = vmatprep.subr.bf16.mxu1 %v12865_v61 }
 0x5b2   :  { %8207 = vmatmul.mubr.f32.gmra.mrb[14].mxu1 %v3572_v3  ;;  %v4207_v3 = vld [vmem:[#allocation9 + $0x190] sm:$0xff] }
 0x5b3   :  { %8209 = vmatprep.mubr.msk.f32.mxu1 %vm10411_vm0, %v11818_v38  ;;  %9296 = vmatpush3.bf16.msra.mxu1 %v9295_v19  ;;  %v9298_v19 = vpack.c.bf16 %v4206_v25, %v4205_v42  ;;  %v11939_v42 = vld [vmem:[#allocation2 + $0x27] sm:$0xff] }
 0x5b4   :  { %9297 = vmatprep.subr.bf16.mxu1 %v12865_v61 }
 0x5b6   :  { %8210 = vmatmul.mubr.f32.gmra.mrb[16].mxu1 %v3573_v55  ;;  %v4208_v55 = vld [vmem:[#allocation9 + $0x198] sm:$0xff] }
 0x5b7   :  { %8212 = vmatprep.mubr.msk.f32.mxu1 %vm10411_vm0, %v11818_v38 }
 0x5ba   :  { %8213 = vmatmul.mubr.f32.gmra.mrb[18].mxu1 %v3574_v62  ;;  %v9301_v62 = vpack.c.bf16 %v4208_v55, %v4207_v3  ;;  %v4219_v55 = vld [vmem:[#allocation9 + $0x1f0] sm:$0xff] }
 0x5bb   :  { %8215 = vmatprep.mubr.msk.f32.mxu1 %vm10411_vm0, %v11818_v38 }
 0x5be   :  { %8216 = vmatmul.mubr.f32.gmra.mrb[20].mxu1 %v3575_v4  ;;  %v4209_v4 = vld [vmem:[#allocation9 + $0x1a0] sm:$0xff] }
 0x5bf   :  { %8218 = vmatprep.mubr.msk.f32.mxu1 %vm10411_vm0, %v11818_v38 }
 0x5c2   :  { %8219 = vmatmul.mubr.f32.gmra.mrb[22].mxu1 %v3576_v39  ;;  %v4210_v39 = vld [vmem:[#allocation9 + $0x1a8] sm:$0xff] }
 0x5c3   :  { %8221 = vmatprep.mubr.msk.f32.mxu1 %vm10411_vm0, %v11818_v38 }
 0x5c6   :  { %8222 = vmatmul.mubr.f32.gmra.mrb[24].mxu1 %v3577_v8  ;;  %v11921_v8 = vld [vmem:[#allocation2 + $0xf] sm:$0xff] }
 0x5c7   :  { %8224 = vmatprep.mubr.msk.f32.mxu1 %vm10411_vm0, %v11818_v38 }
 0x5ca   :  { %8225 = vmatmul.mubr.f32.gmra.mrb[26].mxu1 %v3578_v59  ;;  %v9304_v59 = vpack.c.bf16 %v4210_v39, %v4209_v4  ;;  %v11951_v4 = vld [vmem:[#allocation2 + $0x37] sm:$0xff] }
 0x5cb   :  { %8227 = vmatprep.mubr.msk.f32.mxu1 %vm10411_vm0, %v11818_v38 }
 0x5ce   :  { %8228 = vmatmul.mubr.f32.gmra.mrb[28].mxu1 %v3579_v50  ;;  %v4211_v50 = vld [vmem:[#allocation9 + $0x1b0] sm:$0xff] }
 0x5cf   :  { %8230 = vmatprep.mubr.msk.f32.mxu1 %vm10411_vm0, %v11818_v38 }
 0x5d2   :  { %8231 = vmatmul.mubr.f32.gmra.mrb[30].mxu1 %v3580_v30  ;;  %v4212_v30 = vld [vmem:[#allocation9 + $0x1b8] sm:$0xff] }
 0x5d3   :  { %8233 = vmatprep.mubr.msk.f32.mxu1 %vm10411_vm0, %v11818_v38 }
 0x5d6   :  { %8234 = vmatmul.mubr.f32.gmra.mrb[32].mxu1 %v3581_v6  ;;  %v11927_v6 = vld [vmem:[#allocation2 + $0x17] sm:$0xff] }
 0x5d7   :  { %8236 = vmatprep.mubr.msk.f32.mxu1 %vm10411_vm0, %v11818_v38 }
 0x5da   :  { %8237 = vmatmul.mubr.f32.gmra.mrb[34].mxu1 %v3582_v43  ;;  %v9307_v43 = vpack.c.bf16 %v4212_v30, %v4211_v50  ;;  %v11963_v50 = vld [vmem:[#allocation2 + $0x47] sm:$0xff]  ;;  %v11968_v30 = vld [vmem:[#allocation2 + $0x4f] sm:$0xff] }
 0x5db   :  { %8239 = vmatprep.mubr.msk.f32.mxu1 %vm10411_vm0, %v11818_v38 }
 0x5de   :  { %8240 = vmatmul.mubr.f32.gmra.mrb[36].mxu1 %v3583_v18  ;;  %v4213_v18 = vld [vmem:[#allocation9 + $0x1c0] sm:$0xff] }
 0x5df   :  { %8242 = vmatprep.mubr.msk.f32.mxu1 %vm10411_vm0, %v11818_v38 }
 0x5e2   :  { %8243 = vmatmul.mubr.f32.gmra.mrb[38].mxu1 %v3584_v16  ;;  %v4214_v16 = vld [vmem:[#allocation9 + $0x1c8] sm:$0xff] }
 0x5e3   :  { %8245 = vmatprep.mubr.msk.f32.mxu1 %vm10411_vm0, %v11818_v38 }
 0x5e6   :  { %8246 = vmatmul.mubr.f32.gmra.mrb[40].mxu1 %v3585_v24  ;;  %v11933_v24 = vld [vmem:[#allocation2 + $0x1f] sm:$0xff] }
 0x5e7   :  { %8248 = vmatprep.mubr.msk.f32.mxu1 %vm10411_vm0, %v11818_v38 }
 0x5ea   :  { %8249 = vmatmul.mubr.f32.gmra.mrb[42].mxu1 %v3586_v53  ;;  %v9310_v53 = vpack.c.bf16 %v4214_v16, %v4213_v18  ;;  %v11978_v18 = vld [vmem:[#allocation2 + $0x5f] sm:$0xff]  ;;  %v11983_v16 = vld [vmem:[#allocation2 + $0x67] sm:$0xff] }
 0x5eb   :  { %8251 = vmatprep.mubr.msk.f32.mxu1 %vm10411_vm0, %v11818_v38 }
 0x5ee   :  { %8252 = vmatmul.mubr.f32.gmra.mrb[44].mxu1 %v3587_v31  ;;  %v4215_v31 = vld [vmem:[#allocation9 + $0x1d0] sm:$0xff] }
 0x5ef   :  { %8254 = vmatprep.mubr.msk.f32.mxu1 %vm10411_vm0, %v11818_v38 }
 0x5f2   :  { %8255 = vmatmul.mubr.f32.gmra.mrb[46].mxu1 %v3588_v52  ;;  %v4216_v52 = vld [vmem:[#allocation9 + $0x1d8] sm:$0xff] }
 0x5f3   :  { %8257 = vmatprep.mubr.msk.f32.mxu1 %vm10411_vm0, %v11818_v38  ;;  %v9313_v25 = vpack.c.bf16 %v4216_v52, %v4215_v31  ;;  %v11993_v31 = vld [vmem:[#allocation2 + $0x77] sm:$0xff]  ;;  %v11998_v52 = vld [vmem:[#allocation2 + $0x7f] sm:$0xff] }
 0x5f6   :  { %8258 = vmatmul.mubr.f32.gmra.mrb[48].mxu1 %v3589_v45  ;;  %v4217_v45 = vld [vmem:[#allocation9 + $0x1e0] sm:$0xff] }
 0x5f7   :  { %8292 = vmatprep.mubr.msk.f32.mxu1 %vm10411_vm0, %v11818_v38 }
 0x5fa   :  { %8293 = vmatmul.mubr.f32.vlgmr.msra.gmra.mrb[0].mxu1 %v3872_v28  ;;  %v4218_v28 = vld [vmem:[#allocation9 + $0x1e8] sm:$0xff] }
 0x5fb   :  { %9299 = vmatpush3.bf16.msra.mxu1 %v9298_v19  ;;  %8295 = vmatprep.mubr.msk.f32.mxu1 %vm10411_vm0, %v11818_v38  ;;  %v11945_v19 = vld [vmem:[#allocation2 + $0x2f] sm:$0xff]  ;;  %v9316_v3 = vpack.c.bf16 %v4218_v28, %v4217_v45  ;;  %v12013_v28 = vld [vmem:[#allocation2 + $0x97] sm:$0xff] }
 0x5fc   :  { %9300 = vmatprep.subr.bf16.mxu1 %v12865_v61  ;;  %v12008_v45 = vld [vmem:[#allocation2 + $0x8f] sm:$0xff] }
 0x5fe   :  { %8296 = vmatmul.mubr.f32.gmra.mrb[2].mxu1 %v11921_v8 }
 0x5ff   :  { %8298 = vmatprep.mubr.msk.f32.mxu1 %vm10411_vm0, %v11818_v38  ;;  %9302 = vmatpush3.bf16.msra.mxu1 %v9301_v62  ;;  %v4220_v62 = vld [vmem:[#allocation9 + $0x1f8] sm:$0xff] }
 0x600   :  { %9303 = vmatprep.subr.bf16.mxu1 %v12865_v61  ;;  %v9319_v39 = vpack.c.bf16 %v4220_v62, %v4219_v55  ;;  %v12023_v55 = vld [vmem:[#allocation2 + $0xa7] sm:$0xff]  ;;  %v12028_v62 = vld [vmem:[#allocation2 + $0xaf] sm:$0xff] }
 0x602   :  { %8299 = vmatmul.mubr.f32.gmra.mrb[4].mxu1 %v11927_v6 }
 0x603   :  { %8301 = vmatprep.mubr.msk.f32.mxu1 %vm10411_vm0, %v11818_v38  ;;  %9305 = vmatpush3.bf16.msra.mxu1 %v9304_v59  ;;  %v11957_v59 = vld [vmem:[#allocation2 + $0x3f] sm:$0xff] }
 0x604   :  { %9306 = vmatprep.subr.bf16.mxu1 %v12865_v61 }
 0x606   :  { %8302 = vmatmul.mubr.f32.gmra.mrb[6].mxu1 %v11933_v24 }
 0x607   :  { %8304 = vmatprep.mubr.msk.f32.mxu1 %vm10411_vm0, %v11818_v38  ;;  %9308 = vmatpush3.bf16.msra.mxu1 %v9307_v43  ;;  %v11973_v43 = vld [vmem:[#allocation2 + $0x57] sm:$0xff] }
 0x608   :  { %9309 = vmatprep.subr.bf16.mxu1 %v12865_v61 }
 0x60a   :  { %8305 = vmatmul.mubr.f32.gmra.mrb[8].mxu1 %v11939_v42 }
 0x60b   :  { %8307 = vmatprep.mubr.msk.f32.mxu1 %vm10411_vm0, %v11818_v38  ;;  %9311 = vmatpush3.bf16.msra.mxu1 %v9310_v53  ;;  %v11988_v53 = vld [vmem:[#allocation2 + $0x6f] sm:$0xff] }
 0x60c   :  { %9312 = vmatprep.subr.bf16.mxu1 %v12865_v61 }
 0x60e   :  { %8308 = vmatmul.mubr.f32.gmra.mrb[10].mxu1 %v11945_v19 }
 0x60f   :  { %8310 = vmatprep.mubr.msk.f32.mxu1 %vm10411_vm0, %v11818_v38  ;;  %9314 = vmatpush3.bf16.msra.mxu1 %v9313_v25  ;;  %v12003_v25 = vld [vmem:[#allocation2 + $0x87] sm:$0xff] }
 0x610   :  { %9315 = vmatprep.subr.bf16.mxu1 %v12865_v61 }
 0x612   :  { %8311 = vmatmul.mubr.f32.gmra.mrb[12].mxu1 %v11951_v4 }
 0x613   :  { %8313 = vmatprep.mubr.msk.f32.mxu1 %vm10411_vm0, %v11818_v38  ;;  %9317 = vmatpush3.bf16.msra.mxu1 %v9316_v3  ;;  %v12018_v3 = vld [vmem:[#allocation2 + $0x9f] sm:$0xff] }
 0x614   :  { %9318 = vmatprep.subr.bf16.mxu1 %v12865_v61 }
 0x616   :  { %8314 = vmatmul.mubr.f32.gmra.mrb[14].mxu1 %v11957_v59 }
 0x617   :  { %8316 = vmatprep.mubr.msk.f32.mxu1 %vm10411_vm0, %v11818_v38  ;;  %9320 = vmatpush3.bf16.msra.mxu1 %v9319_v39  ;;  %v12033_v39 = vld [vmem:[#allocation2 + $0xb7] sm:$0xff] }
 0x618   :  { %9321 = vmatprep.subr.bf16.mxu1 %v12865_v61 }
 0x61a   :  { %8317 = vmatmul.mubr.f32.gmra.mrb[16].mxu1 %v11963_v50 }
 0x61b   :  { %8319 = vmatprep.mubr.msk.f32.mxu1 %vm10411_vm0, %v11818_v38 }
 0x61e   :  { %8320 = vmatmul.mubr.f32.gmra.mrb[18].mxu1 %v11968_v30 }
 0x61f   :  { %8322 = vmatprep.mubr.msk.f32.mxu1 %vm10411_vm0, %v11818_v38 }
 0x622   :  { %8323 = vmatmul.mubr.f32.gmra.mrb[20].mxu1 %v11973_v43 }
 0x623   :  { %8325 = vmatprep.mubr.msk.f32.mxu1 %vm10411_vm0, %v11818_v38 }
 0x626   :  { %8326 = vmatmul.mubr.f32.gmra.mrb[22].mxu1 %v11978_v18 }
 0x627   :  { %8328 = vmatprep.mubr.msk.f32.mxu1 %vm10411_vm0, %v11818_v38 }
 0x62a   :  { %8329 = vmatmul.mubr.f32.gmra.mrb[24].mxu1 %v11983_v16 }
 0x62b   :  { %8331 = vmatprep.mubr.msk.f32.mxu1 %vm10411_vm0, %v11818_v38 }
 0x62e   :  { %8332 = vmatmul.mubr.f32.gmra.mrb[26].mxu1 %v11988_v53 }
 0x62f   :  { %8334 = vmatprep.mubr.msk.f32.mxu1 %vm10411_vm0, %v11818_v38 }
 0x632   :  { %8335 = vmatmul.mubr.f32.gmra.mrb[28].mxu1 %v11993_v31 }
 0x633   :  { %8337 = vmatprep.mubr.msk.f32.mxu1 %vm10411_vm0, %v11818_v38 }
 0x636   :  { %8338 = vmatmul.mubr.f32.gmra.mrb[30].mxu1 %v11998_v52 }
 0x637   :  { %8340 = vmatprep.mubr.msk.f32.mxu1 %vm10411_vm0, %v11818_v38 }
 0x63a   :  { %8341 = vmatmul.mubr.f32.gmra.mrb[32].mxu1 %v12003_v25 }
 0x63b   :  { %8343 = vmatprep.mubr.msk.f32.mxu1 %vm10411_vm0, %v11818_v38 }
 0x63e   :  { %8344 = vmatmul.mubr.f32.gmra.mrb[34].mxu1 %v12008_v45 }
 0x63f   :  { %8346 = vmatprep.mubr.msk.f32.mxu1 %vm10411_vm0, %v11818_v38 }
 0x642   :  { %8347 = vmatmul.mubr.f32.gmra.mrb[36].mxu1 %v12013_v28 }
 0x643   :  { %8349 = vmatprep.mubr.msk.f32.mxu1 %vm10411_vm0, %v11818_v38 }
 0x646   :  { %8350 = vmatmul.mubr.f32.gmra.mrb[38].mxu1 %v12018_v3 }
 0x647   :  { %8352 = vmatprep.mubr.msk.f32.mxu1 %vm10411_vm0, %v11818_v38 }
 0x64a   :  { %8353 = vmatmul.mubr.f32.gmra.mrb[40].mxu1 %v12023_v55 }
 0x64b   :  { %8355 = vmatprep.mubr.msk.f32.mxu1 %vm10411_vm0, %v11818_v38 }
 0x64e   :  { %8356 = vmatmul.mubr.f32.gmra.mrb[42].mxu1 %v12028_v62 }
 0x64f   :  { %8358 = vmatprep.mubr.msk.f32.mxu1 %vm10411_vm0, %v11818_v38 }
 0x652   :  { %8359 = vmatmul.mubr.f32.gmra.mrb[44].mxu1 %v12033_v39 }
 0x653   :  { %8361 = vmatprep.mubr.msk.f32.mxu1 %vm10411_vm0, %v11818_v38 }
 0x656   :  { %8362 = vmatmul.mubr.f32.gmra.mrb[46].mxu1 %v12038_v17 }
 0x657   :  { %8364 = vmatprep.mubr.msk.f32.mxu1 %vm10411_vm0, %v11818_v38 }
 0x65a   :  { %8365 = vmatmul.mubr.f32.gmra.mrb[48].mxu1 %v12043_v56 }
 0x65b   :  { %8399 = vmatprep.mubr.msk.f32.mxu1 %vm10411_vm0, %v11818_v38 }
 0x65e   :  { %8400 = vmatmul.mubr.f32.vlgmr.msra.gmra.mrb[0].mxu1 %v11921_v8  ;;  %v4519_v8 = vld [vmem:[#allocation9 + $0x238] sm:$0xff] }
 0x65f   :  { %9323 = vmatpush3.bf16.msra.mxu1 %v9322_v54  ;;  %8402 = vmatprep.mubr.msk.f32.mxu1 %vm10411_vm0, %v11818_v38  ;;  %v9331_v0 = vpack.c.bf16 %v4519_v8, %v4518_v13  ;;  %v4521_v54 = vld [vmem:[#allocation9 + $0x248] sm:$0xff]  ;;  %v4526_v13 = vld [vmem:[#allocation9 + $0x270] sm:$0xff] }
 0x660   :  { %9324 = vmatprep.subr.bf16.mxu1 %v12865_v61  ;;  %v9334_v2 = vpack.c.bf16 %v4521_v54, %v4520_v58  ;;  %v4830_v58 = vld [vmem:[#allocation9 + $0x2d8] sm:$0xff] }
 0x662   :  { %8403 = vmatmul.mubr.f32.gmra.mrb[2].mxu1 %v11927_v6 }
 0x663   :  { %8405 = vmatprep.mubr.msk.f32.mxu1 %vm10411_vm0, %v11818_v38  ;;  %9326 = vmatpush3.bf16.msra.mxu1 %v9325_v40  ;;  %v4523_v40 = vld [vmem:[#allocation9 + $0x258] sm:$0xff] }
 0x664   :  { %9327 = vmatprep.subr.bf16.mxu1 %v12865_v61  ;;  %v9337_v6 = vpack.c.bf16 %v4523_v40, %v4522_v21  ;;  %v4833_v40 = vld [vmem:[#allocation9 + $0x2f0] sm:$0xff] }
 0x666   :  { %8406 = vmatmul.mubr.f32.gmra.mrb[4].mxu1 %v11933_v24  ;;  %v4524_v24 = vld [vmem:[#allocation9 + $0x260] sm:$0xff] }
 0x667   :  { %8408 = vmatprep.mubr.msk.f32.mxu1 %vm10411_vm0, %v11818_v38  ;;  %9329 = vmatpush3.bf16.msra.mxu1 %v9328_v7 }
 0x668   :  { %9330 = vmatprep.subr.bf16.mxu1 %v12865_v61 }
 0x66a   :  { %8409 = vmatmul.mubr.f32.gmra.mrb[6].mxu1 %v11939_v42  ;;  %v4525_v42 = vld [vmem:[#allocation9 + $0x268] sm:$0xff] }
 0x66b   :  { %8411 = vmatprep.mubr.msk.f32.mxu1 %vm10411_vm0, %v11818_v38  ;;  %9332 = vmatpush3.bf16.msra.mxu1 %v9331_v0  ;;  %v9340_v7 = vpack.c.bf16 %v4525_v42, %v4524_v24  ;;  %v4829_v0 = vld [vmem:[#allocation9 + $0x2d0] sm:$0xff] }
 0x66c   :  { %9333 = vmatprep.subr.bf16.mxu1 %v12865_v61  ;;  %v9361_v54 = vpack.c.bf16 %v4830_v58, %v4829_v0  ;;  %v5128_v42 = vld [vmem:[#allocation9 + $0x310] sm:$0xff]  ;;  %v5141_v58 = vld [vmem:[#allocation9 + $0x378] sm:$0xff] }
 0x66d   :  { %v5140_v0 = vld [vmem:[#allocation9 + $0x370] sm:$0xff] }
 0x66e   :  { %8412 = vmatmul.mubr.f32.gmra.mrb[8].mxu1 %v11945_v19  ;;  %v4527_v19 = vld [vmem:[#allocation9 + $0x278] sm:$0xff] }
 0x66f   :  { %8414 = vmatprep.mubr.msk.f32.mxu1 %vm10411_vm0, %v11818_v38  ;;  %9335 = vmatpush3.bf16.msra.mxu1 %v9334_v2  ;;  %v9343_v8 = vpack.c.bf16 %v4527_v19, %v4526_v13  ;;  %v4831_v2 = vld [vmem:[#allocation9 + $0x2e0] sm:$0xff] }
 0x670   :  { %9336 = vmatprep.subr.bf16.mxu1 %v12865_v61  ;;  %v4793_v13 = vld [vmem:[#allocation2 + $0x11] sm:$0xff] }
 0x672   :  { %8415 = vmatmul.mubr.f32.gmra.mrb[10].mxu1 %v11951_v4  ;;  %v4819_v4 = vld [vmem:[#allocation9 + $0x280] sm:$0xff] }
 0x673   :  { %8417 = vmatprep.mubr.msk.f32.mxu1 %vm10411_vm0, %v11818_v38  ;;  %9338 = vmatpush3.bf16.msra.mxu1 %v9337_v6 }
 0x674   :  { %9339 = vmatprep.subr.bf16.mxu1 %v12865_v61 }
 0x676   :  { %8418 = vmatmul.mubr.f32.gmra.mrb[12].mxu1 %v11957_v59  ;;  %v4820_v59 = vld [vmem:[#allocation9 + $0x288] sm:$0xff] }
 0x677   :  { %8420 = vmatprep.mubr.msk.f32.mxu1 %vm10411_vm0, %v11818_v38  ;;  %9341 = vmatpush3.bf16.msra.mxu1 %v9340_v7  ;;  %v5129_v7 = vld [vmem:[#allocation9 + $0x318] sm:$0xff] }
 0x678   :  { %9342 = vmatprep.subr.bf16.mxu1 %v12865_v61  ;;  %v9373_v19 = vpack.c.bf16 %v5129_v7, %v5128_v42  ;;  %v5433_v42 = vld [vmem:[#allocation9 + $0x380] sm:$0xff]  ;;  %v5434_v7 = vld [vmem:[#allocation9 + $0x388] sm:$0xff] }
 0x67a   :  { %8421 = vmatmul.mubr.f32.gmra.mrb[14].mxu1 %v11963_v50  ;;  %v4203_v50 = vld [vmem:[#allocation2 + $0xcf] sm:$0xff] }
 0x67b   :  { %8423 = vmatprep.mubr.msk.f32.mxu1 %vm10411_vm0, %v11818_v38  ;;  %9344 = vmatpush3.bf16.msra.mxu1 %v9343_v8  ;;  %v5130_v8 = vld [vmem:[#allocation9 + $0x320] sm:$0xff] }
 0x67c   :  { %9345 = vmatprep.subr.bf16.mxu1 %v12865_v61 }
 0x67e   :  { %8424 = vmatmul.mubr.f32.gmra.mrb[16].mxu1 %v11968_v30  ;;  %v9346_v30 = vpack.c.bf16 %v4820_v59, %v4819_v4  ;;  %v5131_v4 = vld [vmem:[#allocation9 + $0x328] sm:$0xff] }
 0x67f   :  { %8426 = vmatprep.mubr.msk.f32.mxu1 %vm10411_vm0, %v11818_v38  ;;  %v12204_v59 = vld [vmem:[#allocation2 + $0x19] sm:$0xff] }
 0x682   :  { %8427 = vmatmul.mubr.f32.gmra.mrb[18].mxu1 %v11973_v43  ;;  %v4821_v43 = vld [vmem:[#allocation9 + $0x290] sm:$0xff] }
 0x683   :  { %8429 = vmatprep.mubr.msk.f32.mxu1 %vm10411_vm0, %v11818_v38 }
 0x686   :  { %8430 = vmatmul.mubr.f32.gmra.mrb[20].mxu1 %v11978_v18  ;;  %v4822_v18 = vld [vmem:[#allocation9 + $0x298] sm:$0xff] }
 0x687   :  { %8432 = vmatprep.mubr.msk.f32.mxu1 %vm10411_vm0, %v11818_v38 }
 0x68a   :  { %8433 = vmatmul.mubr.f32.gmra.mrb[22].mxu1 %v11983_v16  ;;  %v4486_v16 = vld [vmem:[#allocation2 + $0x10] sm:$0xff] }
 0x68b   :  { %8435 = vmatprep.mubr.msk.f32.mxu1 %vm10411_vm0, %v11818_v38 }
 0x68e   :  { %8436 = vmatmul.mubr.f32.gmra.mrb[24].mxu1 %v11988_v53  ;;  %v4824_v53 = vld [vmem:[#allocation9 + $0x2a8] sm:$0xff] }
 0x68f   :  { %8438 = vmatprep.mubr.msk.f32.mxu1 %vm10411_vm0, %v11818_v38 }
 0x692   :  { %8439 = vmatmul.mubr.f32.gmra.mrb[26].mxu1 %v11993_v31  ;;  %v4487_v31 = vld [vmem:[#allocation2 + $0x18] sm:$0xff] }
 0x693   :  { %8441 = vmatprep.mubr.msk.f32.mxu1 %vm10411_vm0, %v11818_v38 }
 0x696   :  { %8442 = vmatmul.mubr.f32.gmra.mrb[28].mxu1 %v11998_v52 }
 0x697   :  { %8444 = vmatprep.mubr.msk.f32.mxu1 %vm10411_vm0, %v11818_v38 }
 0x69a   :  { %8445 = vmatmul.mubr.f32.gmra.mrb[30].mxu1 %v12003_v25  ;;  %v4825_v25 = vld [vmem:[#allocation9 + $0x2b0] sm:$0xff] }
 0x69b   :  { %8447 = vmatprep.mubr.msk.f32.mxu1 %vm10411_vm0, %v11818_v38 }
 0x69e   :  { %8448 = vmatmul.mubr.f32.gmra.mrb[32].mxu1 %v12008_v45  ;;  %v4826_v45 = vld [vmem:[#allocation9 + $0x2b8] sm:$0xff] }
 0x69f   :  { %8450 = vmatprep.mubr.msk.f32.mxu1 %vm10411_vm0, %v11818_v38 }
 0x6a2   :  { %8451 = vmatmul.mubr.f32.gmra.mrb[34].mxu1 %v12013_v28  ;;  %v4488_v28 = vld [vmem:[#allocation2 + $0x20] sm:$0xff] }
 0x6a3   :  { %8453 = vmatprep.mubr.msk.f32.mxu1 %vm10411_vm0, %v11818_v38 }
 0x6a6   :  { %8454 = vmatmul.mubr.f32.gmra.mrb[36].mxu1 %v12018_v3  ;;  %v9355_v3 = vpack.c.bf16 %v4826_v45, %v4825_v25  ;;  %v5137_v25 = vld [vmem:[#allocation9 + $0x358] sm:$0xff]  ;;  %v12224_v45 = vld [vmem:[#allocation2 + $0x31] sm:$0xff] }
 0x6a7   :  { %8456 = vmatprep.mubr.msk.f32.mxu1 %vm10411_vm0, %v11818_v38 }
 0x6aa   :  { %8457 = vmatmul.mubr.f32.gmra.mrb[38].mxu1 %v12023_v55  ;;  %v4827_v55 = vld [vmem:[#allocation9 + $0x2c0] sm:$0xff] }
 0x6ab   :  { %8459 = vmatprep.mubr.msk.f32.mxu1 %vm10411_vm0, %v11818_v38 }
 0x6ae   :  { %8460 = vmatmul.mubr.f32.gmra.mrb[40].mxu1 %v12028_v62  ;;  %v4828_v62 = vld [vmem:[#allocation9 + $0x2c8] sm:$0xff] }
 0x6af   :  { %8462 = vmatprep.mubr.msk.f32.mxu1 %vm10411_vm0, %v11818_v38 }
 0x6b2   :  { %8463 = vmatmul.mubr.f32.gmra.mrb[42].mxu1 %v12033_v39  ;;  %v9358_v39 = vpack.c.bf16 %v4828_v62, %v4827_v55  ;;  %v5139_v55 = vld [vmem:[#allocation9 + $0x368] sm:$0xff] }
 0x6b3   :  { %8465 = vmatprep.mubr.msk.f32.mxu1 %vm10411_vm0, %v11818_v38  ;;  %v12230_v62 = vld [vmem:[#allocation2 + $0x39] sm:$0xff] }
 0x6b6   :  { %8466 = vmatmul.mubr.f32.gmra.mrb[44].mxu1 %v12038_v17  ;;  %v4823_v17 = vld [vmem:[#allocation9 + $0x2a0] sm:$0xff] }
 0x6b7   :  { %8468 = vmatprep.mubr.msk.f32.mxu1 %vm10411_vm0, %v11818_v38  ;;  %v9352_v52 = vpack.c.bf16 %v4824_v53, %v4823_v17  ;;  %v5135_v17 = vld [vmem:[#allocation9 + $0x348] sm:$0xff]  ;;  %v12216_v53 = vld [vmem:[#allocation2 + $0x29] sm:$0xff] }
 0x6ba   :  { %8469 = vmatmul.mubr.f32.gmra.mrb[46].mxu1 %v12043_v56  ;;  %v9349_v56 = vpack.c.bf16 %v4822_v18, %v4821_v43  ;;  %v5133_v43 = vld [vmem:[#allocation9 + $0x338] sm:$0xff] }
 0x6bb   :  { %8471 = vmatprep.mubr.msk.f32.mxu1 %vm10411_vm0, %v11818_v38  ;;  %v12210_v18 = vld [vmem:[#allocation2 + $0x21] sm:$0xff] }
 0x6be   :  { %8472 = vmatmul.mubr.f32.gmra.mrb[48].mxu1 %v4203_v50  ;;  %v9376_v50 = vpack.c.bf16 %v5131_v4, %v5130_v8  ;;  %v5435_v8 = vld [vmem:[#allocation9 + $0x390] sm:$0xff]  ;;  %v5436_v4 = vld [vmem:[#allocation9 + $0x398] sm:$0xff] }
 0x6bf   :  { %8506 = vmatprep.mubr.msk.f32.mxu1 %vm10411_vm0, %v11818_v38 }
 0x6c2   :  { %8507 = vmatmul.mubr.f32.vlgmr.msra.gmra.mrb[0].mxu1 %v4486_v16 }
 0x6c3   :  { %9347 = vmatpush3.bf16.msra.mxu1 %v9346_v30  ;;  %8509 = vmatprep.mubr.msk.f32.mxu1 %vm10411_vm0, %v11818_v38  ;;  %v5132_v30 = vld [vmem:[#allocation9 + $0x330] sm:$0xff] }
 0x6c4   :  { %9348 = vmatprep.subr.bf16.mxu1 %v12865_v61  ;;  %v9379_v16 = vpack.c.bf16 %v5133_v43, %v5132_v30  ;;  %v5437_v30 = vld [vmem:[#allocation9 + $0x3a0] sm:$0xff]  ;;  %v5438_v43 = vld [vmem:[#allocation9 + $0x3a8] sm:$0xff] }
 0x6c6   :  { %8510 = vmatmul.mubr.f32.gmra.mrb[2].mxu1 %v4487_v31  ;;  %v12219_v31 = vld [vmem:[#allocation2] sm:$0xff] }
 0x6c7   :  { %8512 = vmatprep.mubr.msk.f32.mxu1 %vm10411_vm0, %v11818_v38  ;;  %9350 = vmatpush3.bf16.msra.mxu1 %v9349_v56  ;;  %v5134_v56 = vld [vmem:[#allocation9 + $0x340] sm:$0xff] }
 0x6c8   :  { %9351 = vmatprep.subr.bf16.mxu1 %v12865_v61 }
 0x6ca   :  { %8513 = vmatmul.mubr.f32.gmra.mrb[4].mxu1 %v4488_v28 }
 0x6cb   :  { %8515 = vmatprep.mubr.msk.f32.mxu1 %vm10411_vm0, %v11818_v38  ;;  %9353 = vmatpush3.bf16.msra.mxu1 %v9352_v52  ;;  %v9382_v52 = vpack.c.bf16 %v5135_v17, %v5134_v56  ;;  %v5439_v56 = vld [vmem:[#allocation9 + $0x3b0] sm:$0xff] }
 0x6cc   :  { %9354 = vmatprep.subr.bf16.mxu1 %v12865_v61 }
 0x6ce   :  { %8516 = vmatmul.mubr.f32.gmra.mrb[6].mxu1 %v11741_v23  ;;  %v4832_v23 = vld [vmem:[#allocation9 + $0x2e8] sm:$0xff] }
 0x6cf   :  { %8518 = vmatprep.mubr.msk.f32.mxu1 %vm10411_vm0, %v11818_v38  ;;  %9356 = vmatpush3.bf16.msra.mxu1 %v9355_v3  ;;  %v9364_v21 = vpack.c.bf16 %v4832_v23, %v4831_v2  ;;  %v5138_v3 = vld [vmem:[#allocation9 + $0x360] sm:$0xff]  ;;  %v9391_v2 = vpack.c.bf16 %v5141_v58, %v5140_v0  ;;  %v5124_v58 = vld [vmem:[#allocation2 + $0xd9] sm:$0xff] }
 0x6d0   :  { %9357 = vmatprep.subr.bf16.mxu1 %v12865_v61  ;;  %v12242_v23 = vld [vmem:[#allocation2 + $0x49] sm:$0xff] }
 0x6d2   :  { %8519 = vmatmul.mubr.f32.gmra.mrb[8].mxu1 %v11744_v47  ;;  %v4834_v47 = vld [vmem:[#allocation9 + $0x2f8] sm:$0xff] }
 0x6d3   :  { %8521 = vmatprep.mubr.msk.f32.mxu1 %vm10411_vm0, %v11818_v38  ;;  %9359 = vmatpush3.bf16.msra.mxu1 %v9358_v39  ;;  %v9367_v6 = vpack.c.bf16 %v4834_v47, %v4833_v40  ;;  %v9388_v39 = vpack.c.bf16 %v5139_v55, %v5138_v3  ;;  %v12253_v40 = vld [vmem:[#allocation2 + $0x59] sm:$0xff]  ;;  %v12258_v47 = vld [vmem:[#allocation2 + $0x61] sm:$0xff]  ;;  %v5445_v3 = vld [vmem:[#allocation9 + $0x3e0] sm:$0xff] }
 0x6d4   :  { %9360 = vmatprep.subr.bf16.mxu1 %v12865_v61 }
 0x6d6   :  { %8522 = vmatmul.mubr.f32.gmra.mrb[10].mxu1 %v11747_v1  ;;  %v4502_v1 = vld [vmem:[#allocation2 + $0x90] sm:$0xff] }
 0x6d7   :  { %8524 = vmatprep.mubr.msk.f32.mxu1 %vm10411_vm0, %v11818_v38  ;;  %9362 = vmatpush3.bf16.msra.mxu1 %v9361_v54  ;;  %v12236_v54 = vld [vmem:[#allocation2 + $0x41] sm:$0xff] }
 0x6d8   :  { %9363 = vmatprep.subr.bf16.mxu1 %v12865_v61 }
 0x6da   :  { %8525 = vmatmul.mubr.f32.gmra.mrb[12].mxu1 %v11750_v41  ;;  %v4503_v41 = vld [vmem:[#allocation2 + $0x98] sm:$0xff] }
 0x6db   :  { %8527 = vmatprep.mubr.msk.f32.mxu1 %vm10411_vm0, %v11818_v38  ;;  %9365 = vmatpush3.bf16.msra.mxu1 %v9364_v21  ;;  %v12248_v21 = vld [vmem:[#allocation2 + $0x51] sm:$0xff] }
 0x6dc   :  { %9366 = vmatprep.subr.bf16.mxu1 %v12865_v61 }
 0x6de   :  { %8528 = vmatmul.mubr.f32.gmra.mrb[14].mxu1 %v11753_v9  ;;  %v4504_v9 = vld [vmem:[#allocation2 + $0xa0] sm:$0xff] }
 0x6df   :  { %8530 = vmatprep.mubr.msk.f32.mxu1 %vm10411_vm0, %v11818_v38  ;;  %9368 = vmatpush3.bf16.msra.mxu1 %v9367_v6  ;;  %v12263_v6 = vld [vmem:[#allocation2 + $0x69] sm:$0xff] }
 0x6e0   :  { %9369 = vmatprep.subr.bf16.mxu1 %v12865_v61 }
 0x6e2   :  { %8531 = vmatmul.mubr.f32.gmra.mrb[16].mxu1 %v11797_v10  ;;  %v5126_v10 = vld [vmem:[#allocation9 + $0x300] sm:$0xff] }
 0x6e3   :  { %8533 = vmatprep.mubr.msk.f32.mxu1 %vm10411_vm0, %v11818_v38 }
 0x6e6   :  { %8534 = vmatmul.mubr.f32.gmra.mrb[18].mxu1 %v11800_v44  ;;  %v5127_v44 = vld [vmem:[#allocation9 + $0x308] sm:$0xff] }
 0x6e7   :  { %8536 = vmatprep.mubr.msk.f32.mxu1 %vm10411_vm0, %v11818_v38  ;;  %v9370_v24 = vpack.c.bf16 %v5127_v44, %v5126_v10  ;;  %v12308_v10 = vld [vmem:[#allocation2 + $0xb1] sm:$0xff]  ;;  %v12313_v44 = vld [vmem:[#allocation2 + $0xb9] sm:$0xff] }
 0x6ea   :  { %8537 = vmatmul.mubr.f32.gmra.mrb[20].mxu1 %v11803_v11  ;;  %v4510_v11 = vld [vmem:[#allocation2 + $0xd0] sm:$0xff] }
 0x6eb   :  { %8539 = vmatprep.mubr.msk.f32.mxu1 %vm10411_vm0, %v11818_v38 }
 0x6ee   :  { %8540 = vmatmul.mubr.f32.gmra.mrb[22].mxu1 %v11790_v34  ;;  %v4508_v34 = vld [vmem:[#allocation2 + $0xc0] sm:$0xff] }
 0x6ef   :  { %8542 = vmatprep.mubr.msk.f32.mxu1 %vm10411_vm0, %v11818_v38 }
 0x6f2   :  { %8543 = vmatmul.mubr.f32.gmra.mrb[24].mxu1 %v11793_v12  ;;  %v4509_v12 = vld [vmem:[#allocation2 + $0xc8] sm:$0xff] }
 0x6f3   :  { %8545 = vmatprep.mubr.msk.f32.mxu1 %vm10411_vm0, %v11818_v38 }
 0x6f6   :  { %8546 = vmatmul.mubr.f32.gmra.mrb[26].mxu1 %v11785_v29  ;;  %v4507_v29 = vld [vmem:[#allocation2 + $0xb8] sm:$0xff] }
 0x6f7   :  { %8548 = vmatprep.mubr.msk.f32.mxu1 %vm10411_vm0, %v11818_v38 }
 0x6fa   :  { %8549 = vmatmul.mubr.f32.gmra.mrb[28].mxu1 %v11776_v5  ;;  %v4505_v5 = vld [vmem:[#allocation2 + $0xa8] sm:$0xff] }
 0x6fb   :  { %8551 = vmatprep.mubr.msk.f32.mxu1 %vm10411_vm0, %v11818_v38 }
 0x6fe   :  { %8552 = vmatmul.mubr.f32.gmra.mrb[30].mxu1 %v11781_v49  ;;  %v4506_v49 = vld [vmem:[#allocation2 + $0xb0] sm:$0xff] }
 0x6ff   :  { %8554 = vmatprep.mubr.msk.f32.mxu1 %vm10411_vm0, %v11818_v38 }
 0x702   :  { %8555 = vmatmul.mubr.f32.gmra.mrb[32].mxu1 %v4502_v1  ;;  %v12268_v1 = vld [vmem:[#allocation2 + $0x71] sm:$0xff] }
 0x703   :  { %8557 = vmatprep.mubr.msk.f32.mxu1 %vm10411_vm0, %v11818_v38 }
 0x706   :  { %8558 = vmatmul.mubr.f32.gmra.mrb[34].mxu1 %v4503_v41  ;;  %v12273_v41 = vld [vmem:[#allocation2 + $0x79] sm:$0xff] }
 0x707   :  { %8560 = vmatprep.mubr.msk.f32.mxu1 %vm10411_vm0, %v11818_v38 }
 0x70a   :  { %8561 = vmatmul.mubr.f32.gmra.mrb[36].mxu1 %v4504_v9  ;;  %v12278_v9 = vld [vmem:[#allocation2 + $0x81] sm:$0xff] }
 0x70b   :  { %8563 = vmatprep.mubr.msk.f32.mxu1 %vm10411_vm0, %v11818_v38 }
 0x70e   :  { %8564 = vmatmul.mubr.f32.gmra.mrb[38].mxu1 %v4505_v5  ;;  %v12283_v5 = vld [vmem:[#allocation2 + $0x89] sm:$0xff] }
 0x70f   :  { %8566 = vmatprep.mubr.msk.f32.mxu1 %vm10411_vm0, %v11818_v38 }
 0x712   :  { %8567 = vmatmul.mubr.f32.gmra.mrb[40].mxu1 %v4506_v49  ;;  %v12288_v49 = vld [vmem:[#allocation2 + $0x91] sm:$0xff] }
 0x713   :  { %8569 = vmatprep.mubr.msk.f32.mxu1 %vm10411_vm0, %v11818_v38 }
 0x716   :  { %8570 = vmatmul.mubr.f32.gmra.mrb[42].mxu1 %v4507_v29  ;;  %v12293_v29 = vld [vmem:[#allocation2 + $0x99] sm:$0xff] }
 0x717   :  { %8572 = vmatprep.mubr.msk.f32.mxu1 %vm10411_vm0, %v11818_v38 }
 0x71a   :  { %8573 = vmatmul.mubr.f32.gmra.mrb[44].mxu1 %v4508_v34  ;;  %v12298_v34 = vld [vmem:[#allocation2 + $0xa1] sm:$0xff] }
 0x71b   :  { %8575 = vmatprep.mubr.msk.f32.mxu1 %vm10411_vm0, %v11818_v38 }
 0x71e   :  { %8576 = vmatmul.mubr.f32.gmra.mrb[46].mxu1 %v4509_v12  ;;  %v12303_v12 = vld [vmem:[#allocation2 + $0xa9] sm:$0xff] }
 0x71f   :  { %8578 = vmatprep.mubr.msk.f32.mxu1 %vm10411_vm0, %v11818_v38 }
 0x722   :  { %8579 = vmatmul.mubr.f32.gmra.mrb[48].mxu1 %v4510_v11  ;;  %v12318_v11 = vld [vmem:[#allocation2 + $0xc1] sm:$0xff] }
 0x723   :  { %8613 = vmatprep.mubr.msk.f32.mxu1 %vm10411_vm0, %v11818_v38 }
 0x726   :  { %8614 = vmatmul.mubr.f32.vlgmr.msra.gmra.mrb[0].mxu1 %v4793_v13  ;;  %v12328_v13 = vld [vmem:[#allocation2 + $0xd1] sm:$0xff] }
 0x727   :  { %9371 = vmatpush3.bf16.msra.mxu1 %v9370_v24  ;;  %8616 = vmatprep.mubr.msk.f32.mxu1 %vm10411_vm0, %v11818_v38  ;;  %v12323_v24 = vld [vmem:[#allocation2 + $0xc9] sm:$0xff] }
 0x728   :  { %9372 = vmatprep.subr.bf16.mxu1 %v12865_v61 }
 0x72a   :  { %8617 = vmatmul.mubr.f32.gmra.mrb[2].mxu1 %v12204_v59 }
 0x72b   :  { %8619 = vmatprep.mubr.msk.f32.mxu1 %vm10411_vm0, %v11818_v38  ;;  %9374 = vmatpush3.bf16.msra.mxu1 %v9373_v19  ;;  %v9394_v19 = vpack.c.bf16 %v5434_v7, %v5433_v42  ;;  %v5750_v42 = vld [vmem:[#allocation9 + $0x450] sm:$0xff]  ;;  %v5751_v7 = vld [vmem:[#allocation9 + $0x458] sm:$0xff] }
 0x72c   :  { %9375 = vmatprep.subr.bf16.mxu1 %v12865_v61 }
 0x72e   :  { %8620 = vmatmul.mubr.f32.gmra.mrb[4].mxu1 %v12210_v18 }
 0x72f   :  { %8622 = vmatprep.mubr.msk.f32.mxu1 %vm10411_vm0, %v11818_v38  ;;  %9377 = vmatpush3.bf16.msra.mxu1 %v9376_v50  ;;  %v5136_v38 = vld [vmem:[#allocation9 + $0x350] sm:$0xff]  ;;  %v9397_v50 = vpack.c.bf16 %v5436_v4, %v5435_v8  ;;  %v5752_v8 = vld [vmem:[#allocation9 + $0x460] sm:$0xff]  ;;  %v5753_v4 = vld [vmem:[#allocation9 + $0x468] sm:$0xff] }
 0x730   :  { %9378 = vmatprep.subr.bf16.mxu1 %v12865_v61  ;;  %v9385_v28 = vpack.c.bf16 %v5137_v25, %v5136_v38  ;;  %v5443_v25 = vld [vmem:[#allocation9 + $0x3d0] sm:$0xff] }
 0x732   :  { %8623 = vmatmul.mubr.f32.gmra.mrb[6].mxu1 %v12216_v53 }
 0x733   :  { %8625 = vmatprep.mubr.msk.f32.mxu1 %vm10411_vm0, %v12219_v31  ;;  %9380 = vmatpush3.bf16.msra.mxu1 %v9379_v16  ;;  %v9400_v16 = vpack.c.bf16 %v5438_v43, %v5437_v30  ;;  %v9436_v30 = vpack.c.bf16 %v5753_v4, %v5752_v8  ;;  %v5754_v43 = vld [vmem:[#allocation9 + $0x470] sm:$0xff] }
 0x734   :  { %9381 = vmatprep.subr.bf16.mxu1 %v12865_v61  ;;  %v5734_v8 = vld [vmem:[#allocation2 + $0xbb] sm:$0xff]  ;;  %v5735_v4 = vld [vmem:[#allocation2 + $0xc3] sm:$0xff] }
 0x736   :  { %8626 = vmatmul.mubr.f32.gmra.mrb[8].mxu1 %v12224_v45 }
 0x737   :  { %8628 = vmatprep.mubr.msk.f32.mxu1 %vm10411_vm0, %v12219_v31  ;;  %9383 = vmatpush3.bf16.msra.mxu1 %v9382_v52  ;;  %v5441_v52 = vld [vmem:[#allocation9 + $0x3c0] sm:$0xff] }
 0x738   :  { %9384 = vmatprep.subr.bf16.mxu1 %v12865_v61 }
 0x73a   :  { %8629 = vmatmul.mubr.f32.gmra.mrb[10].mxu1 %v12230_v62 }
 0x73b   :  { %8631 = vmatprep.mubr.msk.f32.mxu1 %vm10411_vm0, %v12219_v31  ;;  %9386 = vmatpush3.bf16.msra.mxu1 %v9385_v28 }
 0x73c   :  { %9387 = vmatprep.subr.bf16.mxu1 %v12865_v61 }
 0x73e   :  { %8632 = vmatmul.mubr.f32.gmra.mrb[12].mxu1 %v12236_v54 }
 0x73f   :  { %8634 = vmatprep.mubr.msk.f32.mxu1 %vm10411_vm0, %v12219_v31  ;;  %9389 = vmatpush3.bf16.msra.mxu1 %v9388_v39  ;;  %v5447_v39 = vld [vmem:[#allocation9 + $0x3f0] sm:$0xff] }
 0x740   :  { %9390 = vmatprep.subr.bf16.mxu1 %v12865_v61 }
 0x742   :  { %8635 = vmatmul.mubr.f32.gmra.mrb[14].mxu1 %v12242_v23 }
 0x743   :  { %8637 = vmatprep.mubr.msk.f32.mxu1 %vm10411_vm0, %v12219_v31  ;;  %9392 = vmatpush3.bf16.msra.mxu1 %v9391_v2  ;;  %v5741_v2 = vld [vmem:[#allocation9 + $0x408] sm:$0xff] }
 0x744   :  { %9393 = vmatprep.subr.bf16.mxu1 %v12865_v61 }
 0x746   :  { %8638 = vmatmul.mubr.f32.gmra.mrb[16].mxu1 %v12248_v21 }
 0x747   :  { %8640 = vmatprep.mubr.msk.f32.mxu1 %vm10411_vm0, %v12219_v31 }
 0x74a   :  { %8641 = vmatmul.mubr.f32.gmra.mrb[18].mxu1 %v12253_v40 }
 0x74b   :  { %8643 = vmatprep.mubr.msk.f32.mxu1 %vm10411_vm0, %v12219_v31 }
 0x74e   :  { %8644 = vmatmul.mubr.f32.gmra.mrb[20].mxu1 %v12258_v47 }
 0x74f   :  { %8646 = vmatprep.mubr.msk.f32.mxu1 %vm10411_vm0, %v12219_v31 }
 0x752   :  { %8647 = vmatmul.mubr.f32.gmra.mrb[22].mxu1 %v12263_v6 }
 0x753   :  { %8649 = vmatprep.mubr.msk.f32.mxu1 %vm10411_vm0, %v12219_v31 }
 0x756   :  { %8650 = vmatmul.mubr.f32.gmra.mrb[24].mxu1 %v12268_v1 }
 0x757   :  { %8652 = vmatprep.mubr.msk.f32.mxu1 %vm10411_vm0, %v12219_v31 }
 0x75a   :  { %8653 = vmatmul.mubr.f32.gmra.mrb[26].mxu1 %v12273_v41 }
 0x75b   :  { %8655 = vmatprep.mubr.msk.f32.mxu1 %vm10411_vm0, %v12219_v31 }
 0x75e   :  { %8656 = vmatmul.mubr.f32.gmra.mrb[28].mxu1 %v12278_v9 }
 0x75f   :  { %8658 = vmatprep.mubr.msk.f32.mxu1 %vm10411_vm0, %v12219_v31 }
 0x762   :  { %8659 = vmatmul.mubr.f32.gmra.mrb[30].mxu1 %v12283_v5 }
 0x763   :  { %8661 = vmatprep.mubr.msk.f32.mxu1 %vm10411_vm0, %v12219_v31 }
 0x766   :  { %8662 = vmatmul.mubr.f32.gmra.mrb[32].mxu1 %v12288_v49 }
 0x767   :  { %8664 = vmatprep.mubr.msk.f32.mxu1 %vm10411_vm0, %v12219_v31 }
 0x76a   :  { %8665 = vmatmul.mubr.f32.gmra.mrb[34].mxu1 %v12293_v29 }
 0x76b   :  { %8667 = vmatprep.mubr.msk.f32.mxu1 %vm10411_vm0, %v12219_v31 }
 0x76e   :  { %8668 = vmatmul.mubr.f32.gmra.mrb[36].mxu1 %v12298_v34 }
 0x76f   :  { %8670 = vmatprep.mubr.msk.f32.mxu1 %vm10411_vm0, %v12219_v31 }
 0x772   :  { %8671 = vmatmul.mubr.f32.gmra.mrb[38].mxu1 %v12303_v12 }
 0x773   :  { %8673 = vmatprep.mubr.msk.f32.mxu1 %vm10411_vm0, %v12219_v31 }
 0x776   :  { %8674 = vmatmul.mubr.f32.gmra.mrb[40].mxu1 %v12308_v10 }
 0x777   :  { %8676 = vmatprep.mubr.msk.f32.mxu1 %vm10411_vm0, %v12219_v31 }
 0x77a   :  { %8677 = vmatmul.mubr.f32.gmra.mrb[42].mxu1 %v12313_v44 }
 0x77b   :  { %8679 = vmatprep.mubr.msk.f32.mxu1 %vm10411_vm0, %v12219_v31 }
 0x77e   :  { %8680 = vmatmul.mubr.f32.gmra.mrb[44].mxu1 %v12318_v11 }
 0x77f   :  { %8682 = vmatprep.mubr.msk.f32.mxu1 %vm10411_vm0, %v12219_v31 }
 0x782   :  { %8683 = vmatmul.mubr.f32.gmra.mrb[46].mxu1 %v12323_v24 }
 0x783   :  { %8685 = vmatprep.mubr.msk.f32.mxu1 %vm10411_vm0, %v12219_v31 }
 0x786   :  { %8686 = vmatmul.mubr.f32.gmra.mrb[48].mxu1 %v12328_v13 }
 0x787   :  { %8720 = vmatprep.mubr.msk.f32.mxu1 %vm10411_vm0, %v12219_v31 }
 0x78a   :  { %8721 = vmatmul.mubr.f32.vlgmr.msra.gmra.mrb[0].mxu1 %v12204_v59  ;;  %v5440_v59 = vld [vmem:[#allocation9 + $0x3b8] sm:$0xff] }
 0x78b   :  { %9395 = vmatpush3.bf16.msra.mxu1 %v9394_v19  ;;  %8723 = vmatprep.mubr.msk.f32.mxu1 %vm10411_vm0, %v12219_v31  ;;  %v9403_v17 = vpack.c.bf16 %v5440_v59, %v5439_v56  ;;  %v9433_v19 = vpack.c.bf16 %v5751_v7, %v5750_v42  ;;  %v5413_v56 = vld [vmem:[#allocation2 + $0x4a] sm:$0xff]  ;;  %v5730_v42 = vld [vmem:[#allocation2 + $0x9b] sm:$0xff] }
 0x78c   :  { %9396 = vmatprep.subr.bf16.mxu1 %v12865_v61  ;;  %v5731_v7 = vld [vmem:[#allocation2 + $0xa3] sm:$0xff] }
 0x78e   :  { %8724 = vmatmul.mubr.f32.gmra.mrb[2].mxu1 %v12210_v18  ;;  %v5442_v18 = vld [vmem:[#allocation9 + $0x3c8] sm:$0xff] }
 0x78f   :  { %8726 = vmatprep.mubr.msk.f32.mxu1 %vm10411_vm0, %v12219_v31  ;;  %9398 = vmatpush3.bf16.msra.mxu1 %v9397_v50  ;;  %v9406_v38 = vpack.c.bf16 %v5442_v18, %v5441_v52  ;;  %v5412_v50 = vld [vmem:[#allocation2 + $0x42] sm:$0xff]  ;;  %v5415_v52 = vld [vmem:[#allocation2 + $0x5a] sm:$0xff] }
 0x790   :  { %9399 = vmatprep.subr.bf16.mxu1 %v12865_v61  ;;  %v5416_v18 = vld [vmem:[#allocation2 + $0x62] sm:$0xff] }
 0x792   :  { %8727 = vmatmul.mubr.f32.gmra.mrb[4].mxu1 %v12216_v53  ;;  %v5444_v53 = vld [vmem:[#allocation9 + $0x3d8] sm:$0xff] }
 0x793   :  { %8729 = vmatprep.mubr.msk.f32.mxu1 %vm10411_vm0, %v12219_v31  ;;  %9401 = vmatpush3.bf16.msra.mxu1 %v9400_v16  ;;  %v9409_v28 = vpack.c.bf16 %v5444_v53, %v5443_v25  ;;  %v5755_v16 = vld [vmem:[#allocation9 + $0x478] sm:$0xff]  ;;  %v5419_v25 = vld [vmem:[#allocation2 + $0x7a] sm:$0xff] }
 0x794   :  { %9402 = vmatprep.subr.bf16.mxu1 %v12865_v61  ;;  %v9439_v59 = vpack.c.bf16 %v5755_v16, %v5754_v43  ;;  %v5420_v53 = vld [vmem:[#allocation2 + $0x82] sm:$0xff]  ;;  %v12523_v16 = vld [vmem:[%s12802_s7] ss:$0 sm:$0xff] }
 0x795   :  { %v5738_v43 = vld [vmem:[#allocation2 + $0xdb] sm:$0xff] }
 0x796   :  { %8730 = vmatmul.mubr.f32.gmra.mrb[6].mxu1 %v12224_v45  ;;  %v5446_v45 = vld [vmem:[#allocation9 + $0x3e8] sm:$0xff] }
 0x797   :  { %8732 = vmatprep.mubr.msk.f32.mxu1 %vm10411_vm0, %v12219_v31  ;;  %9404 = vmatpush3.bf16.msra.mxu1 %v9403_v17  ;;  %v9412_v55 = vpack.c.bf16 %v5446_v45, %v5445_v3  ;;  %v5414_v17 = vld [vmem:[#allocation2 + $0x52] sm:$0xff]  ;;  %v5423_v45 = vld [vmem:[#allocation2 + $0x9a] sm:$0xff] }
 0x798   :  { %9405 = vmatprep.subr.bf16.mxu1 %v12865_v61  ;;  %v5422_v3 = vld [vmem:[#allocation2 + $0x92] sm:$0xff] }
 0x79a   :  { %8733 = vmatmul.mubr.f32.gmra.mrb[8].mxu1 %v12230_v62  ;;  %v5448_v62 = vld [vmem:[#allocation9 + $0x3f8] sm:$0xff] }
 0x79b   :  { %8735 = vmatprep.mubr.msk.f32.mxu1 %vm10411_vm0, %v12219_v31  ;;  %9407 = vmatpush3.bf16.msra.mxu1 %v9406_v38  ;;  %v9415_v0 = vpack.c.bf16 %v5448_v62, %v5447_v39  ;;  %v5417_v38 = vld [vmem:[#allocation2 + $0x6a] sm:$0xff]  ;;  %v5426_v62 = vld [vmem:[#allocation2 + $0xb2] sm:$0xff] }
 0x79c   :  { %9408 = vmatprep.subr.bf16.mxu1 %v12865_v61  ;;  %v5425_v39 = vld [vmem:[#allocation2 + $0xaa] sm:$0xff] }
 0x79e   :  { %8736 = vmatmul.mubr.f32.gmra.mrb[10].mxu1 %v12236_v54  ;;  %v5740_v54 = vld [vmem:[#allocation9 + $0x400] sm:$0xff] }
 0x79f   :  { %8738 = vmatprep.mubr.msk.f32.mxu1 %vm10411_vm0, %v12219_v31  ;;  %9410 = vmatpush3.bf16.msra.mxu1 %v9409_v28  ;;  %v5421_v28 = vld [vmem:[#allocation2 + $0x8a] sm:$0xff] }
 0x7a0   :  { %9411 = vmatprep.subr.bf16.mxu1 %v12865_v61 }
 0x7a2   :  { %8739 = vmatmul.mubr.f32.gmra.mrb[12].mxu1 %v12242_v23  ;;  %v9418_v23 = vpack.c.bf16 %v5741_v2, %v5740_v54  ;;  %v5429_v54 = vld [vmem:[#allocation2 + $0xca] sm:$0xff]  ;;  %v5430_v2 = vld [vmem:[#allocation2 + $0xd2] sm:$0xff] }
 0x7a3   :  { %8741 = vmatprep.mubr.msk.f32.mxu1 %vm10411_vm0, %v12219_v31  ;;  %9413 = vmatpush3.bf16.msra.mxu1 %v9412_v55  ;;  %v5424_v55 = vld [vmem:[#allocation2 + $0xa2] sm:$0xff] }
 0x7a4   :  { %9414 = vmatprep.subr.bf16.mxu1 %v12865_v61 }
 0x7a6   :  { %8742 = vmatmul.mubr.f32.gmra.mrb[14].mxu1 %v12248_v21  ;;  %v5742_v21 = vld [vmem:[#allocation9 + $0x410] sm:$0xff] }
 0x7a7   :  { %8744 = vmatprep.mubr.msk.f32.mxu1 %vm10411_vm0, %v12219_v31  ;;  %9416 = vmatpush3.bf16.msra.mxu1 %v9415_v0  ;;  %v5427_v0 = vld [vmem:[#allocation2 + $0xba] sm:$0xff] }
 0x7a8   :  { %9417 = vmatprep.subr.bf16.mxu1 %v12865_v61 }
 0x7aa   :  { %8745 = vmatmul.mubr.f32.gmra.mrb[16].mxu1 %v12253_v40  ;;  %v5743_v40 = vld [vmem:[#allocation9 + $0x418] sm:$0xff] }
 0x7ab   :  { %8747 = vmatprep.mubr.msk.f32.mxu1 %vm10411_vm0, %v12219_v31 }
 0x7ae   :  { %8748 = vmatmul.mubr.f32.gmra.mrb[18].mxu1 %v12258_v47  ;;  %v5407_v47 = vld [vmem:[#allocation2 + $0x1a] sm:$0xff] }
 0x7af   :  { %8750 = vmatprep.mubr.msk.f32.mxu1 %vm10411_vm0, %v12219_v31 }
 0x7b2   :  { %8751 = vmatmul.mubr.f32.gmra.mrb[20].mxu1 %v12263_v6  ;;  %v9421_v6 = vpack.c.bf16 %v5743_v40, %v5742_v21  ;;  %v5714_v21 = vld [vmem:[#allocation2 + $0x1b] sm:$0xff]  ;;  %v5715_v40 = vld [vmem:[#allocation2 + $0x23] sm:$0xff] }
 0x7b3   :  { %8753 = vmatprep.mubr.msk.f32.mxu1 %vm10411_vm0, %v12219_v31 }
 0x7b6   :  { %8754 = vmatmul.mubr.f32.gmra.mrb[22].mxu1 %v12268_v1  ;;  %v5744_v1 = vld [vmem:[#allocation9 + $0x420] sm:$0xff] }
 0x7b7   :  { %8756 = vmatprep.mubr.msk.f32.mxu1 %vm10411_vm0, %v12219_v31 }
 0x7ba   :  { %8757 = vmatmul.mubr.f32.gmra.mrb[24].mxu1 %v12273_v41  ;;  %v5745_v41 = vld [vmem:[#allocation9 + $0x428] sm:$0xff] }
 0x7bb   :  { %8759 = vmatprep.mubr.msk.f32.mxu1 %vm10411_vm0, %v12219_v31 }
 0x7be   :  { %8760 = vmatmul.mubr.f32.gmra.mrb[26].mxu1 %v12278_v9  ;;  %v5408_v9 = vld [vmem:[#allocation2 + $0x22] sm:$0xff] }
 0x7bf   :  { %8762 = vmatprep.mubr.msk.f32.mxu1 %vm10411_vm0, %v12219_v31 }
 0x7c2   :  { %8763 = vmatmul.mubr.f32.gmra.mrb[28].mxu1 %v12283_v5  ;;  %v9424_v5 = vpack.c.bf16 %v5745_v41, %v5744_v1  ;;  %v5718_v1 = vld [vmem:[#allocation2 + $0x3b] sm:$0xff]  ;;  %v5719_v41 = vld [vmem:[#allocation2 + $0x43] sm:$0xff] }
 0x7c3   :  { %8765 = vmatprep.mubr.msk.f32.mxu1 %vm10411_vm0, %v12219_v31 }
 0x7c6   :  { %8766 = vmatmul.mubr.f32.gmra.mrb[30].mxu1 %v12288_v49  ;;  %v5746_v49 = vld [vmem:[#allocation9 + $0x430] sm:$0xff] }
 0x7c7   :  { %8768 = vmatprep.mubr.msk.f32.mxu1 %vm10411_vm0, %v12219_v31 }
 0x7ca   :  { %8769 = vmatmul.mubr.f32.gmra.mrb[32].mxu1 %v12293_v29  ;;  %v5747_v29 = vld [vmem:[#allocation9 + $0x438] sm:$0xff] }
 0x7cb   :  { %8771 = vmatprep.mubr.msk.f32.mxu1 %vm10411_vm0, %v12219_v31 }
 0x7ce   :  { %8772 = vmatmul.mubr.f32.gmra.mrb[34].mxu1 %v12298_v34  ;;  %v5409_v34 = vld [vmem:[#allocation2 + $0x2a] sm:$0xff] }
 0x7cf   :  { %8774 = vmatprep.mubr.msk.f32.mxu1 %vm10411_vm0, %v12219_v31 }
 0x7d2   :  { %8775 = vmatmul.mubr.f32.gmra.mrb[36].mxu1 %v12303_v12  ;;  %v9427_v12 = vpack.c.bf16 %v5747_v29, %v5746_v49  ;;  %v5722_v49 = vld [vmem:[#allocation2 + $0x5b] sm:$0xff]  ;;  %v5723_v29 = vld [vmem:[#allocation2 + $0x63] sm:$0xff] }
 0x7d3   :  { %8777 = vmatprep.mubr.msk.f32.mxu1 %vm10411_vm0, %v12219_v31 }
 0x7d6   :  { %8778 = vmatmul.mubr.f32.gmra.mrb[38].mxu1 %v12308_v10  ;;  %v5748_v10 = vld [vmem:[#allocation9 + $0x440] sm:$0xff] }
 0x7d7   :  { %8780 = vmatprep.mubr.msk.f32.mxu1 %vm10411_vm0, %v12219_v31 }
 0x7da   :  { %8781 = vmatmul.mubr.f32.gmra.mrb[40].mxu1 %v12313_v44  ;;  %v5749_v44 = vld [vmem:[#allocation9 + $0x448] sm:$0xff] }
 0x7db   :  { %8783 = vmatprep.mubr.msk.f32.mxu1 %vm10411_vm0, %v12219_v31 }
 0x7de   :  { %8784 = vmatmul.mubr.f32.gmra.mrb[42].mxu1 %v12318_v11  ;;  %v5410_v11 = vld [vmem:[#allocation2 + $0x32] sm:$0xff] }
 0x7df   :  { %8786 = vmatprep.mubr.msk.f32.mxu1 %vm10411_vm0, %v12219_v31 }
 0x7e2   :  { %8787 = vmatmul.mubr.f32.gmra.mrb[44].mxu1 %v12323_v24  ;;  %v9430_v24 = vpack.c.bf16 %v5749_v44, %v5748_v10  ;;  %v5726_v10 = vld [vmem:[#allocation2 + $0x7b] sm:$0xff]  ;;  %v5727_v44 = vld [vmem:[#allocation2 + $0x83] sm:$0xff] }
 0x7e3   :  { %8789 = vmatprep.mubr.msk.f32.mxu1 %vm10411_vm0, %v12219_v31 }
 0x7e6   :  { %8790 = vmatmul.mubr.f32.gmra.mrb[46].mxu1 %v12328_v13  ;;  %v5411_v13 = vld [vmem:[#allocation2 + $0x3a] sm:$0xff] }
 0x7e7   :  { %8792 = vmatprep.mubr.msk.f32.mxu1 %vm10411_vm0, %v12219_v31 }
 0x7ea   :  { %8793 = vmatmul.mubr.f32.gmra.mrb[48].mxu1 %v5124_v58  ;;  %v5428_v58 = vld [vmem:[#allocation2 + $0xc2] sm:$0xff] }
 0x7eb   :  { %8827 = vmatprep.mubr.msk.f32.mxu1 %vm10411_vm0, %v12219_v31 }
 0x7ee   :  { %8828 = vmatmul.mubr.f32.vlgmr.msra.gmra.mrb[0].mxu1 %v5407_v47  ;;  %v5716_v47 = vld [vmem:[#allocation2 + $0x2b] sm:$0xff] }
 0x7ef   :  { %9419 = vmatpush3.bf16.msra.mxu1 %v9418_v23  ;;  %8830 = vmatprep.mubr.msk.f32.mxu1 %vm10411_vm0, %v12219_v31  ;;  %v5431_v23 = vld [vmem:[#allocation2 + $0xda] sm:$0xff] }
 0x7f0   :  { %9420 = vmatprep.subr.bf16.mxu1 %v12865_v61 }
 0x7f2   :  { %8831 = vmatmul.mubr.f32.gmra.mrb[2].mxu1 %v5408_v9  ;;  %v5720_v9 = vld [vmem:[#allocation2 + $0x4b] sm:$0xff] }
 0x7f3   :  { %8833 = vmatprep.mubr.msk.f32.mxu1 %vm10411_vm0, %v12219_v31  ;;  %9422 = vmatpush3.bf16.msra.mxu1 %v9421_v6  ;;  %v5717_v6 = vld [vmem:[#allocation2 + $0x33] sm:$0xff] }
 0x7f4   :  { %9423 = vmatprep.subr.bf16.mxu1 %v12865_v61 }
 0x7f6   :  { %8834 = vmatmul.mubr.f32.gmra.mrb[4].mxu1 %v5409_v34  ;;  %v5724_v34 = vld [vmem:[#allocation2 + $0x6b] sm:$0xff] }
 0x7f7   :  { %8836 = vmatprep.mubr.msk.f32.mxu1 %vm10411_vm0, %v12219_v31  ;;  %9425 = vmatpush3.bf16.msra.mxu1 %v9424_v5  ;;  %v5721_v5 = vld [vmem:[#allocation2 + $0x53] sm:$0xff] }
 0x7f8   :  { %9426 = vmatprep.subr.bf16.mxu1 %v12865_v61 }
 0x7fa   :  { %8837 = vmatmul.mubr.f32.gmra.mrb[6].mxu1 %v5410_v11  ;;  %v5728_v11 = vld [vmem:[#allocation2 + $0x8b] sm:$0xff] }
 0x7fb   :  { %8839 = vmatprep.mubr.msk.f32.mxu1 %vm10411_vm0, %v12219_v31  ;;  %9428 = vmatpush3.bf16.msra.mxu1 %v9427_v12  ;;  %v5725_v12 = vld [vmem:[#allocation2 + $0x73] sm:$0xff] }
 0x7fc   :  { %9429 = vmatprep.subr.bf16.mxu1 %v12865_v61 }
 0x7fe   :  { %8840 = vmatmul.mubr.f32.gmra.mrb[8].mxu1 %v5411_v13  ;;  %v5732_v13 = vld [vmem:[#allocation2 + $0xab] sm:$0xff] }
 0x7ff   :  { %8842 = vmatprep.mubr.msk.f32.mxu1 %vm10411_vm0, %v12219_v31  ;;  %9431 = vmatpush3.bf16.msra.mxu1 %v9430_v24  ;;  %v5729_v24 = vld [vmem:[#allocation2 + $0x93] sm:$0xff] }
 0x800   :  { %9432 = vmatprep.subr.bf16.mxu1 %v12865_v61 }
 0x802   :  { %8843 = vmatmul.mubr.f32.gmra.mrb[10].mxu1 %v5412_v50  ;;  %v5736_v50 = vld [vmem:[#allocation2 + $0xcb] sm:$0xff] }
 0x803   :  { %8845 = vmatprep.mubr.msk.f32.mxu1 %vm10411_vm0, %v12219_v31  ;;  %9434 = vmatpush3.bf16.msra.mxu1 %v9433_v19  ;;  %v5733_v19 = vld [vmem:[#allocation2 + $0xb3] sm:$0xff] }
 0x804   :  { %9435 = vmatprep.subr.bf16.mxu1 %v12865_v61 }
 0x806   :  { %8846 = vmatmul.mubr.f32.gmra.mrb[12].mxu1 %v5413_v56 }
 0x807   :  { %8848 = vmatprep.mubr.msk.f32.mxu1 %vm10411_vm0, %v12219_v31  ;;  %9437 = vmatpush3.bf16.msra.mxu1 %v9436_v30  ;;  %v5737_v30 = vld [vmem:[#allocation2 + $0xd3] sm:$0xff] }
 0x808   :  { %9438 = vmatprep.subr.bf16.mxu1 %v12865_v61  ;;  %v5418_v61 = vld [vmem:[#allocation2 + $0x72] sm:$0xff] }
 0x80a   :  { %8849 = vmatmul.mubr.f32.gmra.mrb[14].mxu1 %v5414_v17 }
 0x80b   :  { %8851 = vmatprep.mubr.msk.f32.mxu1 %vm10411_vm0, %v12219_v31  ;;  %9440 = vmatpush3.bf16.msra.mxu1 %v9439_v59 }
 0x80e   :  { %8852 = vmatmul.mubr.f32.gmra.mrb[16].mxu1 %v5415_v52 }
 0x80f   :  { %8854 = vmatprep.mubr.msk.f32.mxu1 %vm10411_vm0, %v12219_v31 }
 0x812   :  { %8855 = vmatmul.mubr.f32.gmra.mrb[18].mxu1 %v5416_v18 }
 0x813   :  { %8857 = vmatprep.mubr.msk.f32.mxu1 %vm10411_vm0, %v12219_v31 }
 0x816   :  { %8858 = vmatmul.mubr.f32.gmra.mrb[20].mxu1 %v5417_v38 }
 0x817   :  { %8860 = vmatprep.mubr.msk.f32.mxu1 %vm10411_vm0, %v12219_v31 }
 0x81a   :  { %8861 = vmatmul.mubr.f32.gmra.mrb[22].mxu1 %v5418_v61 }
 0x81b   :  { %8863 = vmatprep.mubr.msk.f32.mxu1 %vm10411_vm0, %v12219_v31 }
 0x81e   :  { %8864 = vmatmul.mubr.f32.gmra.mrb[24].mxu1 %v5419_v25 }
 0x81f   :  { %8866 = vmatprep.mubr.msk.f32.mxu1 %vm10411_vm0, %v12219_v31 }
 0x822   :  { %8867 = vmatmul.mubr.f32.gmra.mrb[26].mxu1 %v5420_v53 }
 0x823   :  { %8869 = vmatprep.mubr.msk.f32.mxu1 %vm10411_vm0, %v12219_v31 }
 0x826   :  { %8870 = vmatmul.mubr.f32.gmra.mrb[28].mxu1 %v5421_v28 }
 0x827   :  { %8872 = vmatprep.mubr.msk.f32.mxu1 %vm10411_vm0, %v12219_v31 }
 0x82a   :  { %8873 = vmatmul.mubr.f32.gmra.mrb[30].mxu1 %v5422_v3 }
 0x82b   :  { %8875 = vmatprep.mubr.msk.f32.mxu1 %vm10411_vm0, %v12219_v31 }
 0x82e   :  { %8876 = vmatmul.mubr.f32.gmra.mrb[32].mxu1 %v5423_v45 }
 0x82f   :  { %8878 = vmatprep.mubr.msk.f32.mxu1 %vm10411_vm0, %v12219_v31 }
 0x832   :  { %8879 = vmatmul.mubr.f32.gmra.mrb[34].mxu1 %v5424_v55 }
 0x833   :  { %8881 = vmatprep.mubr.msk.f32.mxu1 %vm10411_vm0, %v12219_v31 }
 0x836   :  { %8882 = vmatmul.mubr.f32.gmra.mrb[36].mxu1 %v5425_v39 }
 0x837   :  { %8884 = vmatprep.mubr.msk.f32.mxu1 %vm10411_vm0, %v12219_v31 }
 0x83a   :  { %8885 = vmatmul.mubr.f32.gmra.mrb[38].mxu1 %v5426_v62 }
 0x83b   :  { %8887 = vmatprep.mubr.msk.f32.mxu1 %vm10411_vm0, %v12219_v31 }
 0x83e   :  { %8888 = vmatmul.mubr.f32.gmra.mrb[40].mxu1 %v5427_v0 }
 0x83f   :  { %8890 = vmatprep.mubr.msk.f32.mxu1 %vm10411_vm0, %v12219_v31 }
 0x842   :  { %8891 = vmatmul.mubr.f32.gmra.mrb[42].mxu1 %v5428_v58 }
 0x843   :  { %8893 = vmatprep.mubr.msk.f32.mxu1 %vm10411_vm0, %v12219_v31 }
 0x846   :  { %8894 = vmatmul.mubr.f32.gmra.mrb[44].mxu1 %v5429_v54 }
 0x847   :  { %8896 = vmatprep.mubr.msk.f32.mxu1 %vm10411_vm0, %v12219_v31 }
 0x84a   :  { %8897 = vmatmul.mubr.f32.gmra.mrb[46].mxu1 %v5430_v2 }
 0x84b   :  { %8899 = vmatprep.mubr.msk.f32.mxu1 %vm10411_vm0, %v12219_v31 }
 0x84e   :  { %8900 = vmatmul.mubr.f32.gmra.mrb[48].mxu1 %v5431_v23 }
 0x84f   :  { %8934 = vmatprep.mubr.msk.f32.mxu1 %vm10411_vm0, %v12219_v31 }
 0x852   :  { %8935 = vmatmul.mubr.f32.vlgmr.msra.gmra.mrb[0].mxu1 %v5714_v21 }
 0x853   :  { %8937 = vmatprep.mubr.msk.f32.mxu1 %vm10411_vm0, %v12219_v31 }
 0x856   :  { %8938 = vmatmul.mubr.f32.gmra.mrb[2].mxu1 %v5715_v40 }
 0x857   :  { %8940 = vmatprep.mubr.msk.f32.mxu1 %vm10411_vm0, %v12219_v31 }
 0x85a   :  { %8941 = vmatmul.mubr.f32.gmra.mrb[4].mxu1 %v5716_v47 }
 0x85b   :  { %8943 = vmatprep.mubr.msk.f32.mxu1 %vm10411_vm0, %v12219_v31 }
 0x85e   :  { %8944 = vmatmul.mubr.f32.gmra.mrb[6].mxu1 %v5717_v6 }
 0x85f   :  { %8946 = vmatprep.mubr.msk.f32.mxu1 %vm10411_vm0, %v12219_v31 }
 0x862   :  { %8947 = vmatmul.mubr.f32.gmra.mrb[8].mxu1 %v5718_v1 }
 0x863   :  { %8949 = vmatprep.mubr.msk.f32.mxu1 %vm10411_vm0, %v12219_v31 }
 0x866   :  { %8950 = vmatmul.mubr.f32.gmra.mrb[10].mxu1 %v5719_v41 }
 0x867   :  { %8952 = vmatprep.mubr.msk.f32.mxu1 %vm10411_vm0, %v12219_v31 }
 0x86a   :  { %8953 = vmatmul.mubr.f32.gmra.mrb[12].mxu1 %v5720_v9 }
 0x86b   :  { %8955 = vmatprep.mubr.msk.f32.mxu1 %vm10411_vm0, %v12219_v31 }
 0x86e   :  { %8956 = vmatmul.mubr.f32.gmra.mrb[14].mxu1 %v5721_v5 }
 0x86f   :  { %8958 = vmatprep.mubr.msk.f32.mxu1 %vm10411_vm0, %v12219_v31 }
 0x872   :  { %8959 = vmatmul.mubr.f32.gmra.mrb[16].mxu1 %v5722_v49 }
 0x873   :  { %8961 = vmatprep.mubr.msk.f32.mxu1 %vm10411_vm0, %v12219_v31 }
 0x876   :  { %8962 = vmatmul.mubr.f32.gmra.mrb[18].mxu1 %v5723_v29 }
 0x877   :  { %8964 = vmatprep.mubr.msk.f32.mxu1 %vm10411_vm0, %v12219_v31 }
 0x87a   :  { %8965 = vmatmul.mubr.f32.gmra.mrb[20].mxu1 %v5724_v34 }
 0x87b   :  { %8967 = vmatprep.mubr.msk.f32.mxu1 %vm10411_vm0, %v12219_v31 }
 0x87e   :  { %8968 = vmatmul.mubr.f32.gmra.mrb[22].mxu1 %v5725_v12 }
 0x87f   :  { %8970 = vmatprep.mubr.msk.f32.mxu1 %vm10411_vm0, %v12219_v31 }
 0x882   :  { %8971 = vmatmul.mubr.f32.gmra.mrb[24].mxu1 %v5726_v10 }
 0x883   :  { %8973 = vmatprep.mubr.msk.f32.mxu1 %vm10411_vm0, %v12219_v31 }
 0x886   :  { %8974 = vmatmul.mubr.f32.gmra.mrb[26].mxu1 %v5727_v44 }
 0x887   :  { %8976 = vmatprep.mubr.msk.f32.mxu1 %vm10411_vm0, %v12219_v31 }
 0x88a   :  { %8977 = vmatmul.mubr.f32.gmra.mrb[28].mxu1 %v5728_v11 }
 0x88b   :  { %8979 = vmatprep.mubr.msk.f32.mxu1 %vm10411_vm0, %v12219_v31 }
 0x88e   :  { %8980 = vmatmul.mubr.f32.gmra.mrb[30].mxu1 %v5729_v24 }
 0x88f   :  { %8982 = vmatprep.mubr.msk.f32.mxu1 %vm10411_vm0, %v12219_v31 }
 0x892   :  { %8983 = vmatmul.mubr.f32.gmra.mrb[32].mxu1 %v5730_v42 }
 0x893   :  { %8985 = vmatprep.mubr.msk.f32.mxu1 %vm10411_vm0, %v12219_v31 }
 0x896   :  { %8986 = vmatmul.mubr.f32.gmra.mrb[34].mxu1 %v5731_v7 }
 0x897   :  { %8988 = vmatprep.mubr.msk.f32.mxu1 %vm10411_vm0, %v12219_v31 }
 0x89a   :  { %8989 = vmatmul.mubr.f32.gmra.mrb[36].mxu1 %v5732_v13 }
 0x89b   :  { %8991 = vmatprep.mubr.msk.f32.mxu1 %vm10411_vm0, %v12219_v31 }
 0x89e   :  { %8992 = vmatmul.mubr.f32.gmra.mrb[38].mxu1 %v5733_v19 }
 0x89f   :  { %8994 = vmatprep.mubr.msk.f32.mxu1 %vm10411_vm0, %v12219_v31 }
 0x8a2   :  { %8995 = vmatmul.mubr.f32.gmra.mrb[40].mxu1 %v5734_v8 }
 0x8a3   :  { %8997 = vmatprep.mubr.msk.f32.mxu1 %vm10411_vm0, %v12219_v31 }
 0x8a6   :  { %8998 = vmatmul.mubr.f32.gmra.mrb[42].mxu1 %v5735_v4 }
 0x8a7   :  { %9000 = vmatprep.mubr.msk.f32.mxu1 %vm10411_vm0, %v12219_v31 }
 0x8aa   :  { %9001 = vmatmul.mubr.f32.gmra.mrb[44].mxu1 %v5736_v50 }
 0x8ab   :  { %9003 = vmatprep.mubr.msk.f32.mxu1 %vm10411_vm0, %v12219_v31 }
 0x8ae   :  { %9004 = vmatmul.mubr.f32.gmra.mrb[46].mxu1 %v5737_v30 }
 0x8af   :  { %9006 = vmatprep.mubr.msk.f32.mxu1 %vm10411_vm0, %v12219_v31 }
 0x8b2   :  { %9007 = vmatmul.mubr.f32.gmra.mrb[48].mxu1 %v5738_v43 }
 0x925   :  { %v5822_v56 = vpop.f32.mrb[0].mxu1 }
 0x926   :  { %v8936_v59 = vpop.f32.mrb[1].mxu1  ;;  %v12526_v17 = vadd.f32 %v12523_v16, %v5822_v56 }
 0x928   :  { %v6021_v31 = vmul.f32 %v12526_v17, %v11327_v51 }
 0x929   :  { %v5827_v52 = vpop.f32.mrb[2].mxu1 }
 0x92a   :  { %v12529_v18 = vadd.f32 %v12523_v16, %v5827_v52  ;;  %v8939_v38 = vpop.f32.mrb[3].mxu1 }
 0x92c   :  { %v6022_v61 = vmul.f32 %v12529_v18, %v11335_v57 }
 0x92d   :  { %v5832_v25 = vpop.f32.mrb[4].mxu1 }
 0x92e   :  { %v6046_v53 = vadd.f32 %v6022_v61, %v6021_v31  ;;  %v12536_v28 = vadd.f32 %v12523_v16, %v5832_v25  ;;  %v8942_v3 = vpop.f32.mrb[5].mxu1 }
 0x930   :  { %v6023_v45 = vmul.f32 %v12536_v28, %v12871_v36 }
 0x931   :  { %v5837_v55 = vpop.f32.mrb[6].mxu1 }
 0x932   :  { %v6047_v39 = vadd.f32 %v6046_v53, %v6023_v45  ;;  %v12541_v62 = vadd.f32 %v12523_v16, %v5837_v55  ;;  %v8945_v0 = vpop.f32.mrb[7].mxu1 }
 0x934   :  { %v6024_v58 = vmul.f32 %v12541_v62, %v12872_v48 }
 0x935   :  { %v5842_v54 = vpop.f32.mrb[8].mxu1 }
 0x936   :  { %v6048_v2 = vadd.f32 %v6047_v39, %v6024_v58  ;;  %v12546_v23 = vadd.f32 %v12523_v16, %v5842_v54  ;;  %v8948_v21 = vpop.f32.mrb[9].mxu1 }
 0x938   :  { %v6025_v40 = vmul.f32 %v12546_v23, %v11358_v14 }
 0x939   :  { %v5847_v47 = vpop.f32.mrb[10].mxu1 }
 0x93a   :  { %v6049_v6 = vadd.f32 %v6048_v2, %v6025_v40  ;;  %v12551_v1 = vadd.f32 %v12523_v16, %v5847_v47  ;;  %v8951_v41 = vpop.f32.mrb[11].mxu1 }
 0x93c   :  { %v6026_v9 = vmul.f32 %v12551_v1, %v11365_v20 }
 0x93d   :  { %v5852_v5 = vpop.f32.mrb[12].mxu1 }
 0x93e   :  { %v6050_v49 = vadd.f32 %v6049_v6, %v6026_v9  ;;  %v12556_v29 = vadd.f32 %v12523_v16, %v5852_v5  ;;  %v8954_v34 = vpop.f32.mrb[13].mxu1 }
 0x940   :  { %v6027_v12 = vmul.f32 %v12556_v29, %v11372_v26 }
 0x941   :  { %v5857_v10 = vpop.f32.mrb[14].mxu1 }
 0x942   :  { %v6051_v44 = vadd.f32 %v6050_v49, %v6027_v12  ;;  %v12561_v11 = vadd.f32 %v12523_v16, %v5857_v10  ;;  %v8957_v24 = vpop.f32.mrb[15].mxu1 }
 0x944   :  { %v6028_v42 = vmul.f32 %v12561_v11, %v11379_v33 }
 0x945   :  { %v5862_v7 = vpop.f32.mrb[16].mxu1 }
 0x946   :  { %v6052_v13 = vadd.f32 %v6051_v44, %v6028_v42  ;;  %v12566_v19 = vadd.f32 %v12523_v16, %v5862_v7  ;;  %v8960_v8 = vpop.f32.mrb[17].mxu1 }
 0x948   :  { %v6029_v4 = vmul.f32 %v12566_v19, %v12876_v37 }
 0x949   :  { %v5867_v50 = vpop.f32.mrb[18].mxu1 }
 0x94a   :  { %v6053_v30 = vadd.f32 %v6052_v13, %v6029_v4  ;;  %v12571_v43 = vadd.f32 %v12523_v16, %v5867_v50  ;;  %v8963_v56 = vpop.f32.mrb[19].mxu1 }
 0x94c   :  { %v6030_v59 = vmul.f32 %v12571_v43, %v12877_v60 }
 0x94d   :  { %v5872_v52 = vpop.f32.mrb[20].mxu1 }
 0x94e   :  { %v6054_v38 = vadd.f32 %v6053_v30, %v6030_v59  ;;  %v12576_v31 = vadd.f32 %v12523_v16, %v5872_v52  ;;  %v8966_v61 = vpop.f32.mrb[21].mxu1 }
 0x950   :  { %v6031_v25 = vmul.f32 %v12576_v31, %v12878_v32 }
 0x951   :  { %v5877_v53 = vpop.f32.mrb[22].mxu1 }
 0x952   :  { %v6055_v3 = vadd.f32 %v6054_v38, %v6031_v25  ;;  %v12581_v45 = vadd.f32 %v12523_v16, %v5877_v53  ;;  %v8969_v55 = vpop.f32.mrb[23].mxu1  ;;  %v12880_v25 = vld [vmem:[#allocation23_spill] sm:$0xff] }
 0x954   :  { %v6032_v39 = vmul.f32 %v12581_v45, %v12874_v22 }
 0x955   :  { %v5882_v0 = vpop.f32.mrb[24].mxu1 }
 0x956   :  { %v6056_v58 = vadd.f32 %v6055_v3, %v6032_v39  ;;  %v12586_v54 = vadd.f32 %v12523_v16, %v5882_v0  ;;  %v8972_v2 = vpop.f32.mrb[25].mxu1 }
 0x958   :  { %v6033_v21 = vmul.f32 %v12586_v54, %v12875_v15 }
 0x959   :  { %v5887_v40 = vpop.f32.mrb[26].mxu1 }
 0x95a   :  { %v6057_v47 = vadd.f32 %v6056_v58, %v6033_v21  ;;  %v12591_v6 = vadd.f32 %v12523_v16, %v5887_v40  ;;  %v8975_v41 = vpop.f32.mrb[27].mxu1  ;;  %v12881_v58 = vld [vmem:[#allocation24_spill] sm:$0xff] }
 0x95c   :  { %v6034_v9 = vmul.f32 %v12591_v6, %v12873_v63 }
 0x95d   :  { %v5892_v5 = vpop.f32.mrb[28].mxu1 }
 0x95e   :  { %v6058_v49 = vadd.f32 %v6057_v47, %v6034_v9  ;;  %v12596_v34 = vadd.f32 %v12523_v16, %v5892_v5  ;;  %v8978_v12 = vpop.f32.mrb[29].mxu1  ;;  %v12882_v9 = vld [vmem:[#allocation25_spill] sm:$0xff] }
 0x960   :  { %v6035_v10 = vmul.f32 %v12596_v34, %v11428_v27 }
 0x961   :  { %v5897_v44 = vpop.f32.mrb[30].mxu1 }
 0x962   :  { %v6059_v24 = vadd.f32 %v6058_v49, %v6035_v10  ;;  %v12601_v42 = vadd.f32 %v12523_v16, %v5897_v44  ;;  %v8981_v7 = vpop.f32.mrb[31].mxu1 }
 0x964   :  { %v6036_v13 = vmul.f32 %v12601_v42, %v11435_v35 }
 0x965   :  { %v5902_v8 = vpop.f32.mrb[32].mxu1 }
 0x966   :  { %v6060_v4 = vadd.f32 %v6059_v24, %v6036_v13  ;;  %v12606_v50 = vadd.f32 %v12523_v16, %v5902_v8  ;;  %v8984_v30 = vpop.f32.mrb[33].mxu1  ;;  %v12883_v24 = vld [vmem:[#allocation26_spill] sm:$0xff] }
 0x968   :  { %v6037_v56 = vmul.f32 %v12606_v50, %v11442_v46 }
 0x969   :  { %v5907_v59 = vpop.f32.mrb[34].mxu1 }
 0x96a   :  { %v6061_v52 = vadd.f32 %v6060_v4, %v6037_v56  ;;  %v12611_v38 = vadd.f32 %v12523_v16, %v5907_v59  ;;  %v8987_v61 = vpop.f32.mrb[35].mxu1  ;;  %v12884_v56 = vld [vmem:[#allocation27_spill] sm:$0xff] }
 0x96c   :  { %v6038_v53 = vmul.f32 %v12611_v38, %v12880_v25 }
 0x96d   :  { %v5912_v3 = vpop.f32.mrb[36].mxu1 }
 0x96e   :  { %v6062_v55 = vadd.f32 %v6061_v52, %v6038_v53  ;;  %v9484_v39 = vadd.f32 %v12523_v16, %v5912_v3  ;;  %v8990_v0 = vpop.f32.mrb[37].mxu1 }
 0x970   :  { %v6039_v2 = vmul.f32 %v9484_v39, %v12881_v58 }
 0x971   :  { %v5917_v21 = vpop.f32.mrb[38].mxu1 }
 0x972   :  { %v6063_v40 = vadd.f32 %v6062_v55, %v6039_v2  ;;  %v9485_v47 = vadd.f32 %v12523_v16, %v5917_v21  ;;  %v8993_v41 = vpop.f32.mrb[39].mxu1  ;;  %v12885_v55 = vld [vmem:[#allocation28_spill] sm:$0xff] }
 0x974   :  { %v6040_v5 = vmul.f32 %v9485_v47, %v12882_v9 }
 0x975   :  { %v5922_v49 = vpop.f32.mrb[40].mxu1 }
 0x976   :  { %v6064_v12 = vadd.f32 %v6063_v40, %v6040_v5  ;;  %v9486_v10 = vadd.f32 %v12523_v16, %v5922_v49  ;;  %v8996_v44 = vpop.f32.mrb[41].mxu1  ;;  %v12886_v5 = vld [vmem:[#allocation29_spill] sm:$0xff] }
 0x978   :  { %v6041_v7 = vmul.f32 %v9486_v10, %v12883_v24 }
 0x979   :  { %v5927_v13 = vpop.f32.mrb[42].mxu1 }
 0x97a   :  { %v6065_v8 = vadd.f32 %v6064_v12, %v6041_v7  ;;  %v9487_v4 = vadd.f32 %v12523_v16, %v5927_v13  ;;  %v8999_v30 = vpop.f32.mrb[43].mxu1 }
 0x97b   :  { %v12887_v30 = vld [vmem:[#allocation30_spill] sm:$0xff] }
 0x97c   :  { %v6042_v59 = vmul.f32 %v9487_v4, %v12884_v56 }
 0x97d   :  { %v5932_v52 = vpop.f32.mrb[44].mxu1 }
 0x97e   :  { %v6066_v61 = vadd.f32 %v6065_v8, %v6042_v59  ;;  %v9488_v53 = vadd.f32 %v12523_v16, %v5932_v52  ;;  %v9002_v3 = vpop.f32.mrb[45].mxu1 }
 0x980   :  { %v6043_v0 = vmul.f32 %v9488_v53, %v12885_v55 }
 0x981   :  { %v5937_v2 = vpop.f32.mrb[46].mxu1 }
 0x982   :  { %v6067_v21 = vadd.f32 %v6066_v61, %v6043_v0  ;;  %v9489_v40 = vadd.f32 %v12523_v16, %v5937_v2  ;;  %v9005_v41 = vpop.f32.mrb[47].mxu1 }
 0x984   :  { %v6044_v49 = vmul.f32 %v9489_v40, %v12886_v5 }
 0x985   :  { %v5942_v12 = vpop.f32.mrb[48].mxu1 }
 0x986   :  { %v6068_v44 = vadd.f32 %v6067_v21, %v6044_v49  ;;  %v9490_v7 = vadd.f32 %v12523_v16, %v5942_v12  ;;  %v9008_v13 = vpop.f32.mrb[49].mxu1 }
 0x988   :  { %v6045_v56 = vmul.f32 %v9490_v7, %v12887_v30 }
 0x98a   :  { %v6069_v8 = vadd.f32 %v6068_v44, %v6045_v56 }
 0x98c   :  { %v6070_v59 = vrot.slane %v6069_v8, 4 }
 0x98e   :  { %v6071_v52 = vadd.f32 %v6070_v59, %v6069_v8 }
 0x990   :  { %v6072_v3 = vrot.slane %v6071_v52, 2 }
 0x992   :  { %v6073_v24 = vadd.f32 %v6072_v3, %v6071_v52 }
 0x994   :  { %v6074_v55 = vrot.slane %v6073_v24, 1 }
 0x996   :  { %v6075_v9 = vadd.f32 %v6074_v55, %v6073_v24 }
 0x998   :  { %v6076_v61 = vmul.f32 0.0078125, %v6075_v9 }
 0x99a   :  { %v12630_v0 = vsub.f32 %v12526_v17, %v6076_v61  ;;  %v12633_v2 = vsub.f32 %v12529_v18, %v6076_v61  ;;  %v12636_v21 = vsub.f32 %v12536_v28, %v6076_v61  ;;  %v12639_v16 = vsub.f32 %v12541_v62, %v6076_v61 }
 0x99b   :  { %v12642_v56 = vsub.f32 %v12546_v23, %v6076_v61  ;;  %v12645_v41 = vsub.f32 %v12551_v1, %v6076_v61  ;;  %v12648_v9 = vsub.f32 %v12556_v29, %v6076_v61  ;;  %v12651_v17 = vsub.f32 %v12561_v11, %v6076_v61 }
 0x99c   :  { %v12654_v18 = vsub.f32 %v12566_v19, %v6076_v61  ;;  %v12657_v28 = vsub.f32 %v12571_v43, %v6076_v61  ;;  %v12660_v62 = vsub.f32 %v12576_v31, %v6076_v61  ;;  %v12663_v23 = vsub.f32 %v12581_v45, %v6076_v61 }
 0x99d   :  { %v12666_v1 = vsub.f32 %v12586_v54, %v6076_v61  ;;  %v12669_v29 = vsub.f32 %v12591_v6, %v6076_v61  ;;  %v12672_v11 = vsub.f32 %v12596_v34, %v6076_v61  ;;  %v12675_v19 = vsub.f32 %v12601_v42, %v6076_v61 }
 0x99e   :  { %v12678_v43 = vsub.f32 %v12606_v50, %v6076_v61  ;;  %v12681_v31 = vsub.f32 %v12611_v38, %v6076_v61  ;;  %v12683_v45 = vsub.f32 %v9484_v39, %v6076_v61  ;;  %v12685_v24 = vsub.f32 %v9485_v47, %v6076_v61 }
 0x99f   :  { %v12687_v54 = vsub.f32 %v9486_v10, %v6076_v61  ;;  %v12689_v6 = vsub.f32 %v9487_v4, %v6076_v61  ;;  %v12691_v55 = vsub.f32 %v9488_v53, %v6076_v61  ;;  %v12693_v34 = vsub.f32 %v9489_v40, %v6076_v61 }
 0x9a0   :  { %v12695_v42 = vsub.f32 %v9490_v7, %v6076_v61  ;;  %v6102_v50 = vmul.f32 %v12630_v0, %v11327_v51  ;;  %v6103_v38 = vmul.f32 %v12633_v2, %v11335_v57  ;;  %v6104_v39 = vmul.f32 %v12636_v21, %v12871_v36 }
 0x9a1   :  { %v6105_v4 = vmul.f32 %v12639_v16, %v12872_v48  ;;  %v6106_v53 = vmul.f32 %v12642_v56, %v11358_v14  ;;  %v6107_v12 = vmul.f32 %v12645_v41, %v11365_v20  ;;  %v6108_v57 = vmul.f32 %v12648_v9, %v11372_v26 }
 0x9a2   :  { %v6127_v47 = vmul.f32 %v6102_v50, %v6102_v50  ;;  %v6128_v10 = vmul.f32 %v6103_v38, %v6103_v38  ;;  %v6129_v40 = vmul.f32 %v6104_v39, %v6104_v39  ;;  %v6109_v13 = vmul.f32 %v12651_v17, %v11379_v33 }
 0x9a3   :  { %v6130_v51 = vmul.f32 %v6105_v4, %v6105_v4  ;;  %v6131_v7 = vmul.f32 %v6106_v53, %v6106_v53  ;;  %v6132_v8 = vmul.f32 %v6107_v12, %v6107_v12  ;;  %v6110_v14 = vmul.f32 %v12654_v18, %v12876_v37 }
 0x9a4   :  { %v6152_v49 = vadd.f32 %v6128_v10, %v6127_v47  ;;  %v6133_v59 = vmul.f32 %v6108_v57, %v6108_v57  ;;  %v6111_v20 = vmul.f32 %v12657_v28, %v12877_v60  ;;  %v6134_v3 = vmul.f32 %v6109_v13, %v6109_v13 }
 0x9a5   :  { %v6112_v26 = vmul.f32 %v12660_v62, %v12878_v32  ;;  %v6135_v50 = vmul.f32 %v6110_v14, %v6110_v14  ;;  %v6113_v33 = vmul.f32 %v12663_v23, %v12874_v22  ;;  %v6114_v37 = vmul.f32 %v12666_v1, %v12875_v15  ;;  %v12888_v14 = vld [vmem:[#allocation25_spill] sm:$0xff] }
 0x9a6   :  { %v6153_v44 = vadd.f32 %v6152_v49, %v6129_v40  ;;  %v6136_v39 = vmul.f32 %v6111_v20, %v6111_v20  ;;  %v6115_v60 = vmul.f32 %v12669_v29, %v12873_v63  ;;  %v6116_v32 = vmul.f32 %v12672_v11, %v11428_v27  ;;  %v12889_v20 = vld [vmem:[#allocation26_spill] sm:$0xff] }
 0x9a7   :  { %v6137_v10 = vmul.f32 %v6112_v26, %v6112_v26  ;;  %v6138_v53 = vmul.f32 %v6113_v33, %v6113_v33  ;;  %v6139_v49 = vmul.f32 %v6114_v37, %v6114_v37  ;;  %v6117_v22 = vmul.f32 %v12675_v19, %v11435_v35  ;;  %v12890_v26 = vld [vmem:[#allocation27_spill] sm:$0xff]  ;;  %v12891_v33 = vld [vmem:[#allocation28_spill] sm:$0xff] }
 0x9a8   :  { %v6154_v36 = vadd.f32 %v6153_v44, %v6130_v51  ;;  %v6140_v51 = vmul.f32 %v6115_v60, %v6115_v60  ;;  %v6118_v15 = vmul.f32 %v12678_v43, %v11442_v46  ;;  %v6141_v57 = vmul.f32 %v6116_v32, %v6116_v32 }
 0x9a9   :  { %v6119_v63 = vmul.f32 %v12681_v31, %v12880_v25  ;;  %v6120_v27 = vmul.f32 %v12683_v45, %v12881_v58  ;;  %v6121_v35 = vmul.f32 %v12685_v24, %v12888_v14  ;;  %v6122_v46 = vmul.f32 %v12687_v54, %v12889_v20 }
 0x9aa   :  { %v6155_v48 = vadd.f32 %v6154_v36, %v6131_v7  ;;  %v6142_v36 = vmul.f32 %v6117_v22, %v6117_v22  ;;  %v6123_v25 = vmul.f32 %v12689_v6, %v12890_v26  ;;  %v6124_v58 = vmul.f32 %v12691_v55, %v12891_v33 }
 0x9ab   :  { %v6125_v37 = vmul.f32 %v12693_v34, %v12886_v5  ;;  %v6126_v60 = vmul.f32 %v12695_v42, %v12887_v30  ;;  %v6185_v30 = vld [vmem:[%s12803_s8] sm:$0x1] }
 0x9ac   :  { %v6156_v52 = vadd.f32 %v6155_v48, %v6132_v8  ;;  %v6143_v8 = vmul.f32 %v6118_v15, %v6118_v15 }
 0x9ad   :  { %v6150_v32 = vmul.f32 %v6125_v37, %v6125_v37 }
 0x9ae   :  { %v6157_v61 = vadd.f32 %v6156_v52, %v6133_v59  ;;  %v6144_v59 = vmul.f32 %v6119_v63, %v6119_v63 }
 0x9b0   :  { %v6158_v38 = vadd.f32 %v6157_v61, %v6134_v3  ;;  %v6145_v3 = vmul.f32 %v6120_v27, %v6120_v27 }
 0x9b2   :  { %v6159_v47 = vadd.f32 %v6158_v38, %v6135_v50  ;;  %v6146_v50 = vmul.f32 %v6121_v35, %v6121_v35 }
 0x9b4   :  { %v6160_v4 = vadd.f32 %v6159_v47, %v6136_v39  ;;  %v6147_v39 = vmul.f32 %v6122_v46, %v6122_v46 }
 0x9b6   :  { %v6161_v40 = vadd.f32 %v6160_v4, %v6137_v10  ;;  %v6148_v10 = vmul.f32 %v6123_v25, %v6123_v25 }
 0x9b8   :  { %v6162_v12 = vadd.f32 %v6161_v40, %v6138_v53  ;;  %v6149_v53 = vmul.f32 %v6124_v58, %v6124_v58 }
 0x9ba   :  { %v6163_v44 = vadd.f32 %v6162_v12, %v6139_v49  ;;  %v6151_v12 = vmul.f32 %v6126_v60, %v6126_v60  ;;  %v6249_v60 = vld [vmem:[#allocation4 + $0x18] sm:$0xff] }
 0x9bc   :  { %v6164_v7 = vadd.f32 %v6163_v44, %v6140_v51 }
 0x9be   :  { %v6165_v13 = vadd.f32 %v6164_v7, %v6141_v57 }
 0x9c0   :  { %v6166_v48 = vadd.f32 %v6165_v13, %v6142_v36 }
 0x9c2   :  { %v6167_v52 = vadd.f32 %v6166_v48, %v6143_v8  ;;  %v12892_v48 = vld [vmem:[#allocation31_spill] sm:$0xff] }
 0x9c3   :  { %v12893_v14 = vsub.s32 0, %v12892_v48  ;;  %v6260_v48 = vld [vmem:[#allocation4 + $0x70] sm:$0xff] }
 0x9c4   :  { %v6168_v61 = vadd.f32 %v6167_v52, %v6144_v59 }
 0x9c6   :  { %v6169_v38 = vadd.f32 %v6168_v61, %v6145_v3 }
 0x9c8   :  { %v6170_v47 = vadd.f32 %v6169_v38, %v6146_v50 }
 0x9ca   :  { %v6171_v4 = vadd.f32 %v6170_v47, %v6147_v39 }
 0x9cc   :  { %v6172_v40 = vadd.f32 %v6171_v4, %v6148_v10 }
 0x9ce   :  { %v6173_v49 = vadd.f32 %v6172_v40, %v6149_v53  ;;  %v6251_v53 = vld [vmem:[#allocation4 + $0x28] sm:$0xff] }
 0x9d0   :  { %v6174_v22 = vadd.f32 %v6173_v49, %v6150_v32  ;;  %v6253_v49 = vld [vmem:[#allocation4 + $0x38] sm:$0xff] }
 0x9d2   :  { %v6175_v51 = vadd.f32 %v6174_v22, %v6151_v12  ;;  %v6254_v12 = vld [vmem:[#allocation4 + $0x40] sm:$0xff] }
 0x9d4   :  { %v6176_v44 = vrot.slane %v6175_v51, 4 }
 0x9d6   :  { %v6177_v15 = vadd.f32 %v6176_v44, %v6175_v51 }
 0x9d8   :  { %v6178_v57 = vrot.slane %v6177_v15, 2 }
 0x9da   :  { %v6179_v7 = vadd.f32 %v6178_v57, %v6177_v15  ;;  %v6255_v57 = vld [vmem:[#allocation4 + $0x48] sm:$0xff] }
 0x9dc   :  { %v6180_v63 = vrot.slane %v6179_v7, 1 }
 0x9de   :  { %v6181_v36 = vadd.f32 %v6180_v63, %v6179_v7  ;;  %v6256_v7 = vld [vmem:[#allocation4 + $0x50] sm:$0xff]  ;;  %v6257_v63 = vld [vmem:[#allocation4 + $0x58] sm:$0xff] }
 0x9e0   :  { %v6182_v13 = vmul.f32 0.0078125, %v6181_v36 }
 0x9e2   :  { %v6183_v5 = vadd.f32 1e-05, %v6182_v13 }
 0x9e4   :  { %10305 = vrsqrt.f32 %v6183_v5 }
 0x9ee   :  { %v10306_v27 = vpop.eup %10305 }
 0x9ef   :  { %v6186_v8 = vmul.f32 %v10306_v27, %v6185_v30  ;;  %v6258_v27 = vld [vmem:[#allocation4 + $0x60] sm:$0xff] }
 0x9f1   :  { %v6190_v35 = vrot.slane %v6186_v8, %v12893_v14  ;;  %v6259_v8 = vld [vmem:[#allocation4 + $0x68] sm:$0xff] }
 0x9f3   :  { %v6191_v59 = vmul.f32 %v6190_v35, %v12630_v0  ;;  %v6192_v52 = vmul.f32 %v6190_v35, %v12633_v2  ;;  %v6193_v20 = vmul.f32 %v6190_v35, %v12636_v21  ;;  %v6194_v46 = vmul.f32 %v6190_v35, %v12639_v16 }
 0x9f4   :  { %v6195_v3 = vmul.f32 %v6190_v35, %v12642_v56  ;;  %v6196_v61 = vmul.f32 %v6190_v35, %v12645_v41  ;;  %v6197_v26 = vmul.f32 %v6190_v35, %v12648_v9  ;;  %v6198_v25 = vmul.f32 %v6190_v35, %v12651_v17  ;;  %v6344_v9 = vld [vmem:[%s12804_s9] ss:$0 sm:$0xff]  ;;  %s10414_s9 = smov [#allocation10]  }
 0x9f5   :  { %v6199_v50 = vmul.f32 %v6190_v35, %v12654_v18  ;;  %v6200_v38 = vmul.f32 %v6190_v35, %v12657_v28  ;;  %v6201_v0 = vmul.f32 %v6190_v35, %v12660_v62  ;;  %v6202_v2 = vmul.f32 %v6190_v35, %v12663_v23  ;;  %s6328_s24 = sshll.u32 %s10414_s9, 4  ;;  %s6329_s24 = int_to_ptr.vmem [resolvable:$true] %s6328_s24 }
 0x9f6   :  { %v6203_v21 = vmul.f32 %v6190_v35, %v12666_v1  ;;  %v6204_v16 = vmul.f32 %v6190_v35, %v12669_v29  ;;  %v6205_v56 = vmul.f32 %v6190_v35, %v12672_v11  ;;  %v6206_v41 = vmul.f32 %v6190_v35, %v12675_v19  ;;  %s10377_s27 = scalar_lea.vmem %s6329_s24, 3200  ;;  %p10382_p11 = scmp.lt.s32.totalorder %s6329_s24, %s6329_s24 }
 0x9f7   :  { %v6207_v17 = vmul.f32 %v6190_v35, %v12678_v43  ;;  %v6208_v18 = vmul.f32 %v6190_v35, %v12681_v31  ;;  %v6209_v28 = vmul.f32 %v6190_v35, %v12683_v45  ;;  %v6210_v62 = vmul.f32 %v6190_v35, %v12685_v24  ;;  %v6248_v45 = vld [vmem:[#allocation4 + $0x10] sm:$0xff]  ;;  %p10378_p10 = scmp.ne.s32.totalorder %s6329_s24, %s10377_s27  ;;  %p10383_p12 = scmp.lt.s32.totalorder %s10377_s27, %s10377_s27 }
 0x9f8   :  { %v6211_v23 = vmul.f32 %v6190_v35, %v12687_v54  ;;  %v6212_v1 = vmul.f32 %v6190_v35, %v12689_v6  ;;  %v6213_v29 = vmul.f32 %v6190_v35, %v12691_v55  ;;  %v6214_v11 = vmul.f32 %v6190_v35, %v12693_v34  ;;  %v6250_v6 = vld [vmem:[#allocation4 + $0x20] sm:$0xff] }
 0x9f9   :  { %v6215_v19 = vmul.f32 %v6190_v35, %v12695_v42  ;;  %v6223_v33 = vadd.f32 %v6344_v9, %v6191_v59  ;;  %v6224_v58 = vadd.f32 %v6344_v9, %v6192_v52  ;;  %v6225_v39 = vadd.f32 %v6344_v9, %v6193_v20  ;;  %v6252_v42 = vld [vmem:[#allocation4 + $0x30] sm:$0xff]  ;;  %v6261_v59 = vld [vmem:[#allocation4 + $0x78] sm:$0xff]  ;;  %v6262_v52 = vld [vmem:[#allocation4 + $0x80] sm:$0xff]  ;;  %p10384_p13 = por %p10383_p12, %p10382_p11 }
 0x9fa   :  { %v6226_v43 = vadd.f32 %v6344_v9, %v6194_v46  ;;  %v6227_v47 = vadd.f32 %v6344_v9, %v6195_v3  ;;  %v6228_v31 = vadd.f32 %v6344_v9, %v6196_v61  ;;  %v6229_v37 = vadd.f32 %v6344_v9, %v6197_v26  ;;  %v6263_v20 = vld [vmem:[#allocation4 + $0x88] sm:$0xff]  ;;  %v6264_v61 = vld [vmem:[#allocation4 + $0x90] sm:$0xff]  ;;  %v6265_v26 = vld [vmem:[#allocation4 + $0x98] sm:$0xff] }
 0x9fb   :  { %v6230_v10 = vadd.f32 %v6344_v9, %v6198_v25  ;;  %v6231_v24 = vadd.f32 %v6344_v9, %v6199_v50  ;;  %v6232_v4 = vadd.f32 %v6344_v9, %v6200_v38  ;;  %v6233_v54 = vadd.f32 %v6344_v9, %v6201_v0  ;;  %v6266_v25 = vld [vmem:[#allocation4 + $0xa0] sm:$0xff]  ;;  %p10385_p0 = pnand %p10384_p13, %p10378_p10 }
 0x9fc   :  { %v6234_v55 = vadd.f32 %v6344_v9, %v6202_v2  ;;  %v6235_v40 = vadd.f32 %v6344_v9, %v6203_v21  ;;  %v6236_v34 = vadd.f32 %v6344_v9, %v6204_v16  ;;  %v6237_v32 = vadd.f32 %v6344_v9, %v6205_v56  ;;  %v6267_v21 = vld [vmem:[#allocation4 + $0xa8] sm:$0xff]  ;;  %v6268_v16 = vld [vmem:[#allocation4 + $0xb0] sm:$0xff]  ;;  %v6269_v56 = vld [vmem:[#allocation4 + $0xb8] sm:$0xff] }
 0x9fd   :  { %v6238_v22 = vadd.f32 %v6344_v9, %v6206_v41  ;;  %v6239_v51 = vadd.f32 %v6344_v9, %v6207_v17  ;;  %v6240_v44 = vadd.f32 %v6344_v9, %v6208_v18  ;;  %v6241_v15 = vadd.f32 %v6344_v9, %v6209_v28 }
 0x9fe   :  { %v6242_v36 = vadd.f32 %v6344_v9, %v6210_v62  ;;  %v6243_v13 = vadd.f32 %v6344_v9, %v6211_v23  ;;  %v6244_v5 = vadd.f32 %v6344_v9, %v6212_v1  ;;  %v6245_v30 = vadd.f32 %v6344_v9, %v6213_v29  ;;  %v6271_v62 = vld [vmem:[#allocation4 + $0xc8] sm:$0xff]  ;;  %v6272_v23 = vld [vmem:[#allocation4 + $0xd0] sm:$0xff] }
 0x9ff   :  { %v6246_v14 = vadd.f32 %v6344_v9, %v6214_v11  ;;  %v6247_v35 = vadd.f32 %v6344_v9, %v6215_v19  ;;  %v6273_v46 = vadd.f32 %v6248_v45, %v6223_v33  ;;  %v6274_v3 = vadd.f32 %v6249_v60, %v6224_v58  ;;  %v6270_v9 = vld [vmem:[#allocation4 + $0xc0] sm:$0xff] }
 0xa00   :  { %v6275_v50 = vadd.f32 %v6250_v6, %v6225_v39  ;;  %v6276_v38 = vadd.f32 %v6251_v53, %v6226_v43  ;;  %v6277_v0 = vadd.f32 %v6252_v42, %v6227_v47  ;;  %v6278_v2 = vadd.f32 %v6253_v49, %v6228_v31 }
 0xa01   :  { %v6279_v41 = vadd.f32 %v6254_v12, %v6229_v37  ;;  %v6280_v17 = vadd.f32 %v6255_v57, %v6230_v10  ;;  %v6281_v18 = vadd.f32 %v6256_v7, %v6231_v24  ;;  %v6282_v28 = vadd.f32 %v6257_v63, %v6232_v4  ;;  %6298 = vst [vmem:[#allocation10] sm:$0xff] %v6273_v46 }
 0xa02   :  { %6299 = vst [vmem:[#allocation10 + $0x8] sm:$0xff] %v6274_v3  ;;  %v6283_v1 = vadd.f32 %v6258_v27, %v6233_v54  ;;  %v6284_v29 = vadd.f32 %v6259_v8, %v6234_v55  ;;  %v6285_v11 = vadd.f32 %v6260_v48, %v6235_v40  ;;  %v6286_v19 = vadd.f32 %v6261_v59, %v6236_v34 }
 0xa03   :  { %6300 = vst [vmem:[#allocation10 + $0x10] sm:$0xff] %v6275_v50  ;;  %6301 = vst [vmem:[#allocation10 + $0x18] sm:$0xff] %v6276_v38  ;;  %v6287_v33 = vadd.f32 %v6262_v52, %v6237_v32  ;;  %v6288_v58 = vadd.f32 %v6263_v20, %v6238_v22  ;;  %v6289_v39 = vadd.f32 %v6264_v61, %v6239_v51 }
 0xa04   :  { %6302 = vst [vmem:[#allocation10 + $0x20] sm:$0xff] %v6277_v0  ;;  %6303 = vst [vmem:[#allocation10 + $0x28] sm:$0xff] %v6278_v2  ;;  %v6290_v43 = vadd.f32 %v6265_v26, %v6240_v44  ;;  %v6291_v47 = vadd.f32 %v6266_v25, %v6241_v15  ;;  %v6292_v31 = vadd.f32 %v6267_v21, %v6242_v36 }
 0xa05   :  { %6304 = vst [vmem:[#allocation10 + $0x30] sm:$0xff] %v6279_v41  ;;  %6305 = vst [vmem:[#allocation10 + $0x38] sm:$0xff] %v6280_v17  ;;  %v6293_v37 = vadd.f32 %v6268_v16, %v6243_v13  ;;  %v6294_v45 = vadd.f32 %v6269_v56, %v6244_v5  ;;  %v6295_v10 = vadd.f32 %v6270_v9, %v6245_v30 }
 0xa06   :  { %6306 = vst [vmem:[#allocation10 + $0x40] sm:$0xff] %v6281_v18  ;;  %6307 = vst [vmem:[#allocation10 + $0x48] sm:$0xff] %v6282_v28  ;;  %v6296_v24 = vadd.f32 %v6271_v62, %v6246_v14  ;;  %v6297_v4 = vadd.f32 %v6272_v23, %v6247_v35 }
 0xa07   :  { %6308 = vst [vmem:[#allocation10 + $0x50] sm:$0xff] %v6283_v1  ;;  %6309 = vst [vmem:[#allocation10 + $0x58] sm:$0xff] %v6284_v29 }
 0xa08   :  { %6310 = vst [vmem:[#allocation10 + $0x60] sm:$0xff] %v6285_v11  ;;  %6311 = vst [vmem:[#allocation10 + $0x68] sm:$0xff] %v6286_v19 }
 0xa09   :  { %6312 = vst [vmem:[#allocation10 + $0x70] sm:$0xff] %v6287_v33  ;;  %6313 = vst [vmem:[#allocation10 + $0x78] sm:$0xff] %v6288_v58 }
 0xa0a   :  { %6314 = vst [vmem:[#allocation10 + $0x80] sm:$0xff] %v6289_v39  ;;  %6315 = vst [vmem:[#allocation10 + $0x88] sm:$0xff] %v6290_v43 }
 0xa0b   :  { %6316 = vst [vmem:[#allocation10 + $0x90] sm:$0xff] %v6291_v47  ;;  %6317 = vst [vmem:[#allocation10 + $0x98] sm:$0xff] %v6292_v31 }
 0xa0c   :  { %6318 = vst [vmem:[#allocation10 + $0xa0] sm:$0xff] %v6293_v37  ;;  %6319 = vst [vmem:[#allocation10 + $0xa8] sm:$0xff] %v6294_v45 }
 0xa0d   :  { %6320 = vst [vmem:[#allocation10 + $0xb0] sm:$0xff] %v6295_v10  ;;  %6321 = vst [vmem:[#allocation10 + $0xb8] sm:$0xff] %v6296_v24 }
 0xa0e   :  { %6322 = vst [vmem:[#allocation10 + $0xc0] sm:$0xff] %v6297_v4 }
 0xa0f   :  { %10388 = shalt.err (!%p10385_p0)
}
 0xa10   :  { %s10389_s30 = scalar_lea.hbm %s12805_s10, 3200 }
 0xa11   :  { %p10390_p1 = scmp.ne.s32.totalorder %s12805_s10, %s10389_s30  ;;  %p10393_p2 = scmp.lt.u32.totalorder %s10389_s30, %s12805_s10 }
 0xa13   :  { %p10395_p3 = pnand %p10393_p2, %p10390_p1 }
 0xa15   :  { %10398 = shalt.err (!%p10395_p3)
}
 0xa16   :  { %6334 = dma.vmem_to_hbm [thread:$0]  %s6329_s24, 3200, %s12805_s10, [#allocation6], %s10407_s25, %s10407_s25, %s10408_s26  }
 0xa17   :  { %10403 = dma.done.wait [#allocation6], 3200  }
 0xa18   :  { %10404 = vsyncadd [#allocation6], 4294964096 }
 0xa19   :  { %6338 = vsyncpa [#allocation5], 1 }
 0xa1a   :  { %6339 = vsyncpa [#allocation8], 1 }
 0xa1b   :  { %6340 = vsyncpa [#allocation6], 1 }

</bundles_post_ra>
